<compile_context>
chip_gen: v7x
topology: tpu7x:2x2x1
jax: 0.10.0
libtpu: 0.0.40
codegen_flags: <defaults>
</compile_context>

<pallas_src>
import functools

import jax
import jax.numpy as jnp
from jax.experimental import pallas as pl
from jax.experimental.pallas import tpu as pltpu

QMAX = 127.0   # 2**(8-1) - 1
QMIN = -128.0  # -2**(8-1)
EPS = 1e-8


# ----------------------------- small helpers ---------------------------------

def _parallel(n_axes):
    return pltpu.CompilerParams(dimension_semantics=("parallel",) * n_axes)


def _row_tile(n, pref=256):
    # 256 keeps double-buffered weight + activation tiles inside v7x's 64 MiB.
    t = n if n <= pref else pref
    assert n % t == 0, f"row count {n} must divide tile {t}"
    return t


def _time_chunk(s, pref=16):
    t = s if s <= pref else pref
    assert s % t == 0, f"seq len {s} must divide time chunk {t}"
    return t


# ----------------------------- in-kernel helpers ------------------------------

def _rms_norm(x, eps=EPS):
    # matches RMSNormFunction.forward (layernorm-style: mean subtracted)
    mean = jnp.mean(x, axis=-1, keepdims=True)
    var = jnp.mean((x - mean) ** 2, axis=-1, keepdims=True)   # unbiased=False
    r = jax.lax.rsqrt(jnp.maximum(var + eps, 1e-10))          # EUP rsqrt
    return r * (x - mean)


def _quant_codes(x, scale):
    # int8-range quantization codes, carried as exact bf16 integers
    return jnp.clip(jnp.round(x / scale), QMIN, QMAX).astype(jnp.bfloat16)


def _scale_of(amax):
    return jnp.where(amax == 0.0, 1.0, amax / QMAX)


# --------------------------------- kernels ------------------------------------

def mlgru_fused_kernel(x_ref, w_ref, b_ref, y_ref, scale_ref,
                       h_scr, f_scr, c_scr, g_scr, amax_scr):
    """Whole MLGRU layer for one time chunk.

    per-timestep rms_norm -> activation_quant (per-timestep scale) ->
    fused ternary (D,3D) bf16 gate matmul -> sigmoid/silu/sigmoid ->
    sequential h_t recurrence -> o_t -> GLU-input rms_norm (stored bf16)
    + running global abs-max (-> global quant scale output).
    """
    tc_, b_, d = x_ref.shape

    @pl.when(pl.program_id(0) == 0)
    def _():
        h_scr[...] = jnp.zeros_like(h_scr)
        amax_scr[...] = jnp.zeros_like(amax_scr)

    # ---- per-timestep rms_norm + activation_quant (scale over (B,D)) ----
    x = x_ref[...].astype(jnp.float32)                        # (tc, B, D)
    xn = _rms_norm(x)
    a = jnp.max(jnp.abs(xn), axis=2, keepdims=True)
    a = jnp.max(a, axis=1, keepdims=True)                     # (tc, 1, 1)
    scale_t = _scale_of(a)
    q = _quant_codes(xn, scale_t)                             # bf16 integer codes

    # ---- fused ternary gate matmul on the MXU (exact: int codes x {-1,0,1}) ----
    acc = jnp.dot(q.reshape(tc_ * b_, d), w_ref[...],
                  preferred_element_type=jnp.float32)         # (tc*B, 3D)
    acc = acc.reshape(tc_, b_, 3 * d) * scale_t + b_ref[...]  # dequant + bias
    f_scr[...] = jax.nn.sigmoid(acc[..., :d])
    c_lin = acc[..., d:2 * d]
    c_scr[...] = c_lin * jax.nn.sigmoid(c_lin)                # silu
    g_scr[...] = jax.nn.sigmoid(acc[..., 2 * d:])

    # ---- sequential recurrence (pure VPU) + fused GLU-input rms_norm ----
    # TODO(synk): for v7x, split this kernel over a second 'parallel' D-block
    # axis (h_t is elementwise across D) to use both TensorCores.
    def step(t, carry):
        h, amx = carry
        f = f_scr[t]
        h = f * h + (1.0 - f) * c_scr[t]
        yb = _rms_norm(h * g_scr[t]).astype(y_ref.dtype)      # o_t -> rms_norm, bf16
        y_ref[t] = yb
        ya = jnp.max(jnp.abs(yb.astype(jnp.float32)), axis=1, keepdims=True)
        ya = jnp.max(ya, axis=0, keepdims=True)               # (1, 1)
        return h, jnp.maximum(amx, ya)

    h, amx = jax.lax.fori_loop(0, tc_, step, (h_scr[...], amax_scr[...]),
                               unroll=True)
    h_scr[...] = h
    amax_scr[...] = amx
    scale_ref[...] = _scale_of(amx)                           # last chunk wins


def glu_up_kernel(y_ref, s_ref, w_ref, b_ref, p_ref, amax_ref):
    """GLU up/gate path: global-scale quant + (D,2D) ternary matmul + silu(g)*u."""
    scale = s_ref[...]                                        # (1, 1) global scale
    # NOTE: reference double-quantizes (activation_quant of an already-quantized
    # tensor with the same global scale); that is idempotent -> single quant.
    q = _quant_codes(y_ref[...].astype(jnp.float32), scale)
    gu = jnp.dot(q, w_ref[...], preferred_element_type=jnp.float32)
    gu = gu * scale + b_ref[...]
    d = p_ref.shape[-1]
    g = gu[:, :d]
    u = gu[:, d:]
    pg = (g * jax.nn.sigmoid(g) * u).astype(p_ref.dtype)      # bf16 store
    p_ref[...] = pg
    a = jnp.max(jnp.abs(pg.astype(jnp.float32)), axis=1, keepdims=True)
    amax_ref[...] = jnp.max(a, axis=0, keepdims=True).reshape(1, 1, 1)


def glu_down_kernel(p_ref, am_ref, w_ref, b_ref, y_ref, amax_ref):
    """GLU down projection + fused post-GLU rms_norm; amax combine in-kernel."""
    a = jnp.max(am_ref[...], axis=0)                          # (1,1) global amax
    scale = _scale_of(a)
    q = _quant_codes(p_ref[...].astype(jnp.float32), scale)
    dn = jnp.dot(q, w_ref[...], preferred_element_type=jnp.float32)
    dn = dn * scale + b_ref[...]
    yb = _rms_norm(dn).astype(y_ref.dtype)                    # bf16 store
    y_ref[...] = yb
    ay = jnp.max(jnp.abs(yb.astype(jnp.float32)), axis=1, keepdims=True)
    amax_ref[...] = jnp.max(ay, axis=0, keepdims=True).reshape(1, 1, 1)


def quant_out_kernel(y_ref, am_ref, o_ref):
    """Final activation_quant (dequantized f32 output) for the prev=None path."""
    a = jnp.max(am_ref[...], axis=0)
    scale = _scale_of(a)
    y = y_ref[...].astype(jnp.float32)
    o_ref[...] = jnp.clip(jnp.round(y / scale), QMIN, QMAX) * scale


def quant_qkv_kernel(y_ref, am_ref, prev_ref, wq_ref, wkv_ref, bq_ref, bkv_ref,
                     q_ref, k_ref, v_ref):
    """Fused final activation_quant + attention input projections (bf16 MXU)."""
    a = jnp.max(am_ref[...], axis=0)
    scale = _scale_of(a)
    y = y_ref[...].astype(jnp.float32)
    xq = jnp.clip(jnp.round(y / scale), QMIN, QMAX) * scale   # dequantized query in
    q = jnp.dot(xq.astype(jnp.bfloat16), wq_ref[...],
                preferred_element_type=jnp.float32) + bq_ref[...]
    kv = jnp.dot(prev_ref[...].astype(jnp.bfloat16), wkv_ref[...],
                 preferred_element_type=jnp.float32) + bkv_ref[...]
    e = q_ref.shape[-1]
    q_ref[...] = q.astype(q_ref.dtype)
    k_ref[...] = kv[:, :e].astype(k_ref.dtype)
    v_ref[...] = kv[:, e:].astype(v_ref.dtype)


def attn_core_kernel(q_ref, k_ref, v_ref, ctx_ref, attnw_ref, *, num_heads, scale):
    """Per-batch attention; heads stored directly into lane slices of ctx."""
    # TODO(synk): for long S on v7x, tile over query blocks (flash-style) so the
    # O(S^2) score block fits 64 MiB VMEM and the grid pipelines.
    q = q_ref[0]                                              # (S, E) bf16
    k = k_ref[0]
    v = v_ref[0]
    s_len, e = q.shape
    hd = e // num_heads
    attn_acc = jnp.zeros((s_len, s_len), jnp.float32)
    for h in range(num_heads):                                # static unroll
        lo = h * hd
        sc = jnp.einsum('qd,kd->qk', q[:, lo:lo + hd], k[:, lo:lo + hd],
                        preferred_element_type=jnp.float32) * scale
        sc = sc - jnp.max(sc, axis=-1, keepdims=True)
        ex = jnp.exp(sc)
        p = ex / jnp.sum(ex, axis=-1, keepdims=True)          # exact softmax
        ctx_h = jnp.dot(p.astype(jnp.bfloat16), v[:, lo:lo + hd],
                        preferred_element_type=jnp.float32)
        ctx_ref[0, :, lo:lo + hd] = ctx_h.astype(ctx_ref.dtype)
        attn_acc = attn_acc + p
    attnw_ref[0] = attn_acc * (1.0 / num_heads)               # averaged over heads


def outproj_residual_kernel(ctx_ref, prev_ref, w_ref, b_ref, o_ref):
    o = jnp.dot(ctx_ref[...], w_ref[...], preferred_element_type=jnp.float32)
    o_ref[...] = o + b_ref[...] + prev_ref[...]


def vocab_linear_kernel(x_ref, w_ref, b_ref, o_ref):
    o_ref[...] = jnp.dot(x_ref[...].astype(jnp.bfloat16), w_ref[...],
                         preferred_element_type=jnp.float32) + b_ref[...]


# --------------------------------- wrappers -----------------------------------

def node_backbone(h, p):
    """MLGRULayer -> MatMulFreeGLU -> rms_norm.  Returns bf16 y2 + amax partials."""
    B, S, D = h.shape
    N = B * S
    tc = _time_chunk(S)
    n_tchunk = S // tc
    tr = _row_tile(N)
    nr = N // tr

    # ---- fused MLGRU layer (sequential over time chunks) ----
    xt = jnp.transpose(h, (1, 0, 2))                          # (S, B, D) time-major
    y_t, s1 = pl.pallas_call(
        mlgru_fused_kernel,
        out_shape=(jax.ShapeDtypeStruct((S, B, D), jnp.bfloat16),
                   jax.ShapeDtypeStruct((1, 1), jnp.float32)),
        grid=(n_tchunk,),
        in_specs=[pl.BlockSpec((tc, B, D), lambda i: (i, 0, 0)),
                  pl.BlockSpec((D, 3 * D), lambda i: (0, 0)),
                  pl.BlockSpec((1, 3 * D), lambda i: (0, 0))],
        out_specs=(pl.BlockSpec((tc, B, D), lambda i: (i, 0, 0)),
                   pl.BlockSpec((1, 1), lambda i: (0, 0))),
        scratch_shapes=[pltpu.VMEM((B, D), jnp.float32),      # h carry
                        pltpu.VMEM((tc, B, D), jnp.float32),  # sigmoid(f)
                        pltpu.VMEM((tc, B, D), jnp.float32),  # silu(c)
                        pltpu.VMEM((tc, B, D), jnp.float32),  # sigmoid(g)
                        pltpu.VMEM((1, 1), jnp.float32)],     # running amax
        compiler_params=pltpu.CompilerParams(
            dimension_semantics=("arbitrary",)),
    )(xt, p['sW_gates_t'], p['b_gates'])

    y = jnp.transpose(y_t, (1, 0, 2)).reshape(N, D)           # bf16, GLU input

    # ---- GLU up path ----
    pgate, amax2 = pl.pallas_call(
        glu_up_kernel,
        out_shape=(jax.ShapeDtypeStruct((N, D), jnp.bfloat16),
                   jax.ShapeDtypeStruct((nr, 1, 1), jnp.float32)),
        grid=(nr,),
        in_specs=[pl.BlockSpec((tr, D), lambda i: (i, 0)),
                  pl.BlockSpec((1, 1), lambda i: (0, 0)),
                  pl.BlockSpec((D, 2 * D), lambda i: (0, 0)),
                  pl.BlockSpec((1, 2 * D), lambda i: (0, 0))],
        out_specs=(pl.BlockSpec((tr, D), lambda i: (i, 0)),
                   pl.BlockSpec((1, 1, 1), lambda i: (i, 0, 0))),
        compiler_params=_parallel(1),
    )(y, s1, p['sW_gu_t'], p['b_gu'])

    # ---- GLU down path + fused post-GLU rms_norm (amax combine in-kernel) ----
    y2, amax3 = pl.pallas_call(
        glu_down_kernel,
        out_shape=(jax.ShapeDtypeStruct((N, D), jnp.bfloat16),
                   jax.ShapeDtypeStruct((nr, 1, 1), jnp.float32)),
        grid=(nr,),
        in_specs=[pl.BlockSpec((tr, D), lambda i: (i, 0)),
                  pl.BlockSpec((nr, 1, 1), lambda i: (0, 0, 0)),
                  pl.BlockSpec((D, D), lambda i: (0, 0)),
                  pl.BlockSpec((1, D), lambda i: (0, 0))],
        out_specs=(pl.BlockSpec((tr, D), lambda i: (i, 0)),
                   pl.BlockSpec((1, 1, 1), lambda i: (i, 0, 0))),
        compiler_params=_parallel(1),
    )(pgate, amax2, p['sW_d_t'], p['b_d'])

    return y2, amax3


def cross_attention(y2, amax3, prev, p, num_heads, B, S):
    """Final activation_quant fused into q/kv proj, then MHA + residual."""
    E = prev.shape[-1]
    N = B * S
    tr = _row_tile(N)
    nr = N // tr
    nrp = amax3.shape[0]
    prev2 = prev.reshape(N, E)

    q, k, v = pl.pallas_call(
        quant_qkv_kernel,
        out_shape=tuple(jax.ShapeDtypeStruct((N, E), jnp.bfloat16)
                        for _ in range(3)),
        grid=(nr,),
        in_specs=[pl.BlockSpec((tr, E), lambda i: (i, 0)),
                  pl.BlockSpec((nrp, 1, 1), lambda i: (0, 0, 0)),
                  pl.BlockSpec((tr, E), lambda i: (i, 0)),
                  pl.BlockSpec((E, E), lambda i: (0, 0)),
                  pl.BlockSpec((E, 2 * E), lambda i: (0, 0)),
                  pl.BlockSpec((1, E), lambda i: (0, 0)),
                  pl.BlockSpec((1, 2 * E), lambda i: (0, 0))],
        out_specs=tuple(pl.BlockSpec((tr, E), lambda i: (i, 0))
                        for _ in range(3)),
        compiler_params=_parallel(1),
    )(y2, amax3, prev2, p['w_q_t'], p['w_kv_t'], p['b_q'], p['b_kv'])

    hd = E // num_heads
    ctx, attnw = pl.pallas_call(
        functools.partial(attn_core_kernel, num_heads=num_heads,
                          scale=1.0 / (hd ** 0.5)),
        out_shape=(jax.ShapeDtypeStruct((B, S, E), jnp.bfloat16),
                   jax.ShapeDtypeStruct((B, S, S), jnp.float32)),
        grid=(B,),
        in_specs=[pl.BlockSpec((1, S, E), lambda b: (b, 0, 0))] * 3,
        out_specs=(pl.BlockSpec((1, S, E), lambda b: (b, 0, 0)),
                   pl.BlockSpec((1, S, S), lambda b: (b, 0, 0))),
        compiler_params=_parallel(1),
    )(q.reshape(B, S, E), k.reshape(B, S, E), v.reshape(B, S, E))

    out = pl.pallas_call(
        outproj_residual_kernel,
        out_shape=jax.ShapeDtypeStruct((N, E), jnp.float32),
        grid=(nr,),
        in_specs=[pl.BlockSpec((tr, E), lambda i: (i, 0)),
                  pl.BlockSpec((tr, E), lambda i: (i, 0)),
                  pl.BlockSpec((E, E), lambda i: (0, 0)),
                  pl.BlockSpec((1, E), lambda i: (0, 0))],
        out_specs=pl.BlockSpec((tr, E), lambda i: (i, 0)),
        compiler_params=_parallel(1),
    )(ctx.reshape(N, E), prev2, p['w_o_t'], p['b_o'])

    return out.reshape(B, S, E), attnw


def vocab_linear(x, p):
    B, S, E = x.shape
    N = B * S
    V = p['w_out_t'].shape[1]
    tr = _row_tile(N)
    tcv = V if V <= 1024 else 1024
    assert V % tcv == 0
    # Vocab-column axis OUTER, row axis inner -> the (E,V) weight block index is
    # constant across the inner axis and streams from HBM exactly once.
    out = pl.pallas_call(
        vocab_linear_kernel,
        out_shape=jax.ShapeDtypeStruct((N, V), jnp.float32),
        grid=(V // tcv, N // tr),
        in_specs=[pl.BlockSpec((tr, E), lambda j, i: (i, 0)),
                  pl.BlockSpec((E, tcv), lambda j, i: (0, j)),
                  pl.BlockSpec((1, tcv), lambda j, i: (0, j))],
        out_specs=pl.BlockSpec((tr, tcv), lambda j, i: (i, j)),
        compiler_params=_parallel(2),
    )(x.reshape(N, E), p['w_out_t'], p['b_out2'])
    return out.reshape(B, S, V)


def node_forward(p, x, prev, is_final, num_heads):
    """MatMulFreeLanguageModel.forward"""
    if x.ndim == 2:
        h = p['emb'][x]                                       # embedding gather (glue)
    else:
        h = x
    B, S, D = h.shape
    N = B * S
    y2, amax3 = node_backbone(h, p)                           # bf16 (N,D) + partials
    attn_w = None
    if prev is not None:
        # TODO(synk): src_mask / attn_mask path not implemented (mask=None here).
        output, attn_w = cross_attention(y2, amax3, prev, p, num_heads, B, S)
    else:
        tr = _row_tile(N)
        nr = N // tr
        nrp = amax3.shape[0]
        xq = pl.pallas_call(
            quant_out_kernel,
            out_shape=jax.ShapeDtypeStruct((N, D), jnp.float32),
            grid=(nr,),
            in_specs=[pl.BlockSpec((tr, D), lambda i: (i, 0)),
                      pl.BlockSpec((nrp, 1, 1), lambda i: (0, 0, 0))],
            out_specs=pl.BlockSpec((tr, D), lambda i: (i, 0)),
            compiler_params=_parallel(1),
        )(y2, amax3)
        output = xq.reshape(B, S, D)
    if is_final:
        output = vocab_linear(output, p)                      # bias already doubled
    return output, attn_w


def cascade_forward(params_list, input_ids, num_heads):
    """CascadeTransformer.forward"""
    prev = None
    attn_all = []
    x = input_ids
    n = len(params_list)
    for i, p in enumerate(params_list):
        x, aw = node_forward(p, x, prev, is_final=(i == n - 1),
                             num_heads=num_heads)
        prev = x
        attn_all.append(aw)
    return x, attn_all


# ------------------------------ parameter setup --------------------------------

def init_node_params(key, vocab, embed, hidden):
    ks = jax.random.split(key, 18)
    s = 0.1
    f32 = jnp.float32
    return {
        'emb': (jax.random.normal(ks[0], (vocab, embed)) * s).astype(f32),
        'W_f': (jax.random.normal(ks[1], (embed, hidden)) * s).astype(f32),
        'W_c': (jax.random.normal(ks[2], (embed, hidden)) * s).astype(f32),
        'W_g': (jax.random.normal(ks[3], (embed, hidden)) * s).astype(f32),
        'b_f': (jax.random.normal(ks[4], (hidden,)) * s).astype(f32),
        'b_c': (jax.random.normal(ks[5], (hidden,)) * s).astype(f32),
        'b_g': (jax.random.normal(ks[6], (hidden,)) * s).astype(f32),
        'Wg': (jax.random.normal(ks[7], (hidden, hidden)) * s).astype(f32),
        'Wu': (jax.random.normal(ks[8], (hidden, hidden)) * s).astype(f32),
        'Wd': (jax.random.normal(ks[9], (hidden, hidden)) * s).astype(f32),
        'bg': (jax.random.normal(ks[10], (hidden,)) * s).astype(f32),
        'bu': (jax.random.normal(ks[11], (hidden,)) * s).astype(f32),
        'bd': (jax.random.normal(ks[12], (hidden,)) * s).astype(f32),
        'out_w': (jax.random.normal(ks[13], (vocab, hidden)) * s).astype(f32),
        'out_b': (jax.random.normal(ks[14], (vocab,)) * s).astype(f32),
        'in_w': (jax.random.normal(ks[15], (3 * embed, embed)) * s).astype(f32),
        'in_b': (jax.random.normal(ks[16], (3 * embed,)) * s).astype(f32),
        'out_proj_w': (jax.random.normal(ks[17], (embed, embed)) * s).astype(f32),
        'out_proj_b': jnp.zeros((embed,), f32),
    }


def prepare_node_params(p):
    """Pre-ternarize / pre-transpose weights once (sign(W).T as bf16, fused);
    attention / vocab weights stored pre-transposed in bf16 for the MXU."""
    bf16 = jnp.bfloat16
    D = p['W_f'].shape[0]
    E = p['out_proj_w'].shape[0]
    sign_t = lambda w: jnp.sign(w).T
    return {
        'emb': p['emb'],
        # MLGRU fused gate weights / biases
        'sW_gates_t': jnp.concatenate(
            [sign_t(p['W_f']), sign_t(p['W_c']), sign_t(p['W_g'])],
            axis=1).astype(bf16),
        'b_gates': jnp.concatenate([p['b_f'], p['b_c'], p['b_g']]).reshape(1, 3 * D),
        # GLU fused up/gate + down weights
        'sW_gu_t': jnp.concatenate([sign_t(p['Wg']), sign_t(p['Wu'])],
                                   axis=1).astype(bf16),
        'b_gu': jnp.concatenate([p['bg'], p['bu']]).reshape(1, 2 * D),
        'sW_d_t': sign_t(p['Wd']).astype(bf16),
        'b_d': p['bd'].reshape(1, D),
        # attention (bf16 operands, f32 accumulation on the MXU)
        'w_q_t': p['in_w'][:E].T.astype(bf16),
        'w_kv_t': p['in_w'][E:].T.astype(bf16),
        'b_q': p['in_b'][:E].reshape(1, E),
        'b_kv': p['in_b'][E:].reshape(1, 2 * E),
        'w_o_t': p['out_proj_w'].T.astype(bf16),
        'b_o': p['out_proj_b'].reshape(1, E),
        # output layer; reference adds its bias twice: output_layer(x) + bias
        'w_out_t': p['out_w'].T.astype(bf16),
        'b_out2': (2.0 * p['out_b']).reshape(1, -1),
    }


# ----------------------------------- main ---------------------------------------

if __name__ == "__main__":
    num_nodes = 2
    vocab_size = 16
    embed_size = 32     # embed_size == hidden_size (required by the reference
    hidden_size = 32    # module's matmul_free_linear shape conventions)
    num_heads = 4
    B, S = 2, 8
    assert embed_size == hidden_size

    key = jax.random.PRNGKey(0)
    k_ids, k_par = jax.random.split(key)
    input_ids = jax.random.randint(k_ids, (B, S), 0, vocab_size, dtype=jnp.int32)

    node_keys = jax.random.split(k_par, num_nodes)
    params_list = [prepare_node_params(
        init_node_params(k, vocab_size, embed_size, hidden_size))
        for k in node_keys]

    fwd = jax.jit(functools.partial(cascade_forward, num_heads=num_heads))
    logits, attn_all = fwd(params_list, input_ids)
    jax.block_until_ready(logits)

    assert logits.shape == (B, S, vocab_size)
    assert attn_all[0] is None and attn_all[1].shape == (B, S, S)
    assert bool(jnp.isfinite(logits).all())
    print("KERNEL_OK")
</pallas_src>

<mosaic_0001>
module attributes {stable_mosaic.version = 11 : i64} {
  func.func @glu_up_kernel(%arg0: i32, %arg1: memref<16x32xbf16, #tpu.memory_space<vmem>>, %arg2: memref<1x1xf32, #tpu.memory_space<vmem>>, %arg3: memref<32x64xbf16, #tpu.memory_space<vmem>>, %arg4: memref<1x64xf32, #tpu.memory_space<vmem>>, %arg5: memref<16x32xbf16, #tpu.memory_space<vmem>>, %arg6: memref<1x1x1xf32, #tpu.memory_space<vmem>>) attributes {dimension_semantics = [#tpu.dimension_semantics<parallel>], iteration_bounds = array<i64: 1>, scalar_prefetch = 0 : i64, scratch_operands = 0 : i64, tpu.core_type = #tpu.core_type<tc>, window_params = [{transform_indices = @transform_0, window_bounds = array<i64: 16, 32>}, {pipeline_mode = #tpu.pipeline_mode<synchronous>, transform_indices = @transform_1, window_bounds = array<i64: 1, 1>}, {pipeline_mode = #tpu.pipeline_mode<synchronous>, transform_indices = @transform_2, window_bounds = array<i64: 32, 64>}, {pipeline_mode = #tpu.pipeline_mode<synchronous>, transform_indices = @transform_3, window_bounds = array<i64: 1, 64>}, {transform_indices = @transform_4, window_bounds = array<i64: 16, 32>}, {transform_indices = @transform_5, window_bounds = array<i64: 1, 1, 1>}]} {
    %c0 = arith.constant 0 : index
    %c0_0 = arith.constant 0 : index
    %0 = vector.load %arg2[%c0, %c0_0] : memref<1x1xf32, #tpu.memory_space<vmem>>, vector<1x1xf32>
    %c0_1 = arith.constant 0 : index
    %c0_2 = arith.constant 0 : index
    %1 = vector.load %arg1[%c0_1, %c0_2] : memref<16x32xbf16, #tpu.memory_space<vmem>>, vector<16x32xbf16>
    %2 = arith.extf %1 : vector<16x32xbf16> to vector<16x32xf32>
    %3 = vector.broadcast %0 : vector<1x1xf32> to vector<16x32xf32>
    %4 = arith.divf %2, %3 : vector<16x32xf32>
    %5 = math.roundeven %4 : vector<16x32xf32>
    %cst = arith.constant -1.280000e+02 : f32
    %cst_3 = arith.constant 1.270000e+02 : f32
    %6 = vector.broadcast %cst : f32 to vector<16x32xf32>
    %7 = arith.maximumf %6, %5 : vector<16x32xf32>
    %8 = vector.broadcast %cst_3 : f32 to vector<16x32xf32>
    %9 = arith.minimumf %8, %7 : vector<16x32xf32>
    %10 = arith.truncf %9 : vector<16x32xf32> to vector<16x32xbf16>
    %c0_4 = arith.constant 0 : index
    %c0_5 = arith.constant 0 : index
    %11 = vector.load %arg3[%c0_4, %c0_5] : memref<32x64xbf16, #tpu.memory_space<vmem>>, vector<32x64xbf16>
    %cst_6 = arith.constant dense<0.000000e+00> : vector<16x64xf32>
    %12 = tpu.matmul %10, %11, %cst_6 {dimension_numbers = #tpu.dot_dimension_numbers<[1], [0], [0], [1], [0, 0, 1, 1], [], []>} : vector<16x32xbf16>, vector<32x64xbf16>, vector<16x64xf32> -> vector<16x64xf32>
    %13 = vector.broadcast %0 : vector<1x1xf32> to vector<16x64xf32>
    %14 = arith.mulf %12, %13 : vector<16x64xf32>
    %c0_7 = arith.constant 0 : index
    %c0_8 = arith.constant 0 : index
    %15 = vector.load %arg4[%c0_7, %c0_8] : memref<1x64xf32, #tpu.memory_space<vmem>>, vector<1x64xf32>
    %16 = vector.broadcast %15 : vector<1x64xf32> to vector<16x64xf32>
    %17 = arith.addf %14, %16 : vector<16x64xf32>
    %18 = vector.extract_strided_slice %17 {offsets = [0, 0], sizes = [16, 32], strides = [1, 1]} : vector<16x64xf32> to vector<16x32xf32>
    %19 = vector.extract_strided_slice %17 {offsets = [0, 32], sizes = [16, 32], strides = [1, 1]} : vector<16x64xf32> to vector<16x32xf32>
    %20 = arith.negf %18 : vector<16x32xf32>
    %21 = math.exp %20 : vector<16x32xf32>
    %cst_9 = arith.constant 1.000000e+00 : f32
    %22 = vector.broadcast %cst_9 : f32 to vector<16x32xf32>
    %23 = arith.addf %22, %21 : vector<16x32xf32>
    %24 = arith.divf %22, %23 : vector<16x32xf32>
    %25 = arith.mulf %18, %24 : vector<16x32xf32>
    %26 = arith.mulf %25, %19 : vector<16x32xf32>
    %27 = arith.truncf %26 : vector<16x32xf32> to vector<16x32xbf16>
    %c0_10 = arith.constant 0 : index
    %c0_11 = arith.constant 0 : index
    %28 = vector.load %arg5[%c0_10, %c0_11] : memref<16x32xbf16, #tpu.memory_space<vmem>>, vector<16x32xbf16>
    tpu.vector_store %arg5[%c0_10, %c0_11], %27 {strides = array<i32>} : memref<16x32xbf16, #tpu.memory_space<vmem>>, vector<16x32xbf16>,
    %29 = arith.extf %27 : vector<16x32xbf16> to vector<16x32xf32>
    %30 = math.absf %29 : vector<16x32xf32>
    %cst_12 = arith.constant dense<0xFF800000> : vector<16xf32>
    %31 = vector.multi_reduction <maximumf>, %30, %cst_12 [1] : vector<16x32xf32> to vector<16xf32>
    %32 = vector.shape_cast %31 : vector<16xf32> to vector<16x1xf32>
    %cst_13 = arith.constant dense<0xFF800000> : vector<1xf32>
    %33 = vector.multi_reduction <maximumf>, %32, %cst_13 [0] : vector<16x1xf32> to vector<1xf32>
    %34 = vector.shape_cast %33 : vector<1xf32> to vector<1x1xf32>
    %35 = vector.shape_cast %34 : vector<1x1xf32> to vector<1x1x1xf32>
    %c0_14 = arith.constant 0 : index
    %c0_15 = arith.constant 0 : index
    %c0_16 = arith.constant 0 : index
    %36 = vector.load %arg6[%c0_14, %c0_15, %c0_16] : memref<1x1x1xf32, #tpu.memory_space<vmem>>, vector<1x1x1xf32>
    tpu.vector_store %arg6[%c0_14, %c0_15, %c0_16], %35 {strides = array<i32>} : memref<1x1x1xf32, #tpu.memory_space<vmem>>, vector<1x1x1xf32>,
    return
  }
  func.func @transform_0(%arg0: i32) -> (i32, i32) {
    %c0_i32 = arith.constant 0 : i32
    %c0_i32_0 = arith.constant 0 : i32
    return %arg0, %c0_i32 : i32, i32
  }
  func.func @transform_1(%arg0: i32) -> (i32, i32) {
    %c0_i32 = arith.constant 0 : i32
    %c0_i32_0 = arith.constant 0 : i32
    %c0_i32_1 = arith.constant 0 : i32
    return %c0_i32, %c0_i32_0 : i32, i32
  }
  func.func @transform_2(%arg0: i32) -> (i32, i32) {
    %c0_i32 = arith.constant 0 : i32
    %c0_i32_0 = arith.constant 0 : i32
    %c0_i32_1 = arith.constant 0 : i32
    return %c0_i32, %c0_i32_0 : i32, i32
  }
  func.func @transform_3(%arg0: i32) -> (i32, i32) {
    %c0_i32 = arith.constant 0 : i32
    %c0_i32_0 = arith.constant 0 : i32
    %c0_i32_1 = arith.constant 0 : i32
    return %c0_i32, %c0_i32_0 : i32, i32
  }
  func.func @transform_4(%arg0: i32) -> (i32, i32) {
    %c0_i32 = arith.constant 0 : i32
    %c0_i32_0 = arith.constant 0 : i32
    return %arg0, %c0_i32 : i32, i32
  }
  func.func @transform_5(%arg0: i32) -> (i32, i32, i32) {
    %c0_i32 = arith.constant 0 : i32
    %c0_i32_0 = arith.constant 0 : i32
    %c0_i32_1 = arith.constant 0 : i32
    return %arg0, %c0_i32, %c0_i32_0 : i32, i32, i32
  }
}

module attributes {stable_mosaic.version = 11 : i64} {
  func.func @quant_out_kernel(%arg0: i32, %arg1: memref<16x32xbf16, #tpu.memory_space<vmem>>, %arg2: memref<1x1x1xf32, #tpu.memory_space<vmem>>, %arg3: memref<16x32xf32, #tpu.memory_space<vmem>>) attributes {dimension_semantics = [#tpu.dimension_semantics<parallel>], iteration_bounds = array<i64: 1>, scalar_prefetch = 0 : i64, scratch_operands = 0 : i64, tpu.core_type = #tpu.core_type<tc>, window_params = [{transform_indices = @transform_0, window_bounds = array<i64: 16, 32>}, {pipeline_mode = #tpu.pipeline_mode<synchronous>, transform_indices = @transform_1, window_bounds = array<i64: 1, 1, 1>}, {transform_indices = @transform_2, window_bounds = array<i64: 16, 32>}]} {
    %c0 = arith.constant 0 : index
    %c0_0 = arith.constant 0 : index
    %c0_1 = arith.constant 0 : index
    %0 = vector.load %arg2[%c0, %c0_0, %c0_1] : memref<1x1x1xf32, #tpu.memory_space<vmem>>, vector<1x1x1xf32>
    %cst = arith.constant dense<0xFF800000> : vector<1x1xf32>
    %1 = vector.multi_reduction <maximumf>, %0, %cst [0] : vector<1x1x1xf32> to vector<1x1xf32>
    %cst_2 = arith.constant 0.000000e+00 : f32
    %2 = vector.broadcast %cst_2 : f32 to vector<1x1xf32>
    %3 = arith.cmpf oeq, %1, %2 : vector<1x1xf32>
    %cst_3 = arith.constant 1.270000e+02 : f32
    %4 = vector.broadcast %cst_3 : f32 to vector<1x1xf32>
    %5 = arith.divf %1, %4 : vector<1x1xf32>
    %cst_4 = arith.constant 1.000000e+00 : f32
    %6 = vector.broadcast %cst_4 : f32 to vector<1x1xf32>
    %7 = arith.select %3, %6, %5 : vector<1x1xi1>, vector<1x1xf32>
    %c0_5 = arith.constant 0 : index
    %c0_6 = arith.constant 0 : index
    %8 = vector.load %arg1[%c0_5, %c0_6] : memref<16x32xbf16, #tpu.memory_space<vmem>>, vector<16x32xbf16>
    %9 = arith.extf %8 : vector<16x32xbf16> to vector<16x32xf32>
    %10 = vector.broadcast %7 : vector<1x1xf32> to vector<16x32xf32>
    %11 = arith.divf %9, %10 : vector<16x32xf32>
    %12 = math.roundeven %11 : vector<16x32xf32>
    %cst_7 = arith.constant -1.280000e+02 : f32
    %cst_8 = arith.constant 1.270000e+02 : f32
    %13 = vector.broadcast %cst_7 : f32 to vector<16x32xf32>
    %14 = arith.maximumf %13, %12 : vector<16x32xf32>
    %15 = vector.broadcast %cst_8 : f32 to vector<16x32xf32>
    %16 = arith.minimumf %15, %14 : vector<16x32xf32>
    %17 = vector.broadcast %7 : vector<1x1xf32> to vector<16x32xf32>
    %18 = arith.mulf %16, %17 : vector<16x32xf32>
    %c0_9 = arith.constant 0 : index
    %c0_10 = arith.constant 0 : index
    %19 = vector.load %arg3[%c0_9, %c0_10] : memref<16x32xf32, #tpu.memory_space<vmem>>, vector<16x32xf32>
    tpu.vector_store %arg3[%c0_9, %c0_10], %18 {strides = array<i32>} : memref<16x32xf32, #tpu.memory_space<vmem>>, vector<16x32xf32>,
    return
  }
  func.func @transform_0(%arg0: i32) -> (i32, i32) {
    %c0_i32 = arith.constant 0 : i32
    %c0_i32_0 = arith.constant 0 : i32
    return %arg0, %c0_i32 : i32, i32
  }
  func.func @transform_1(%arg0: i32) -> (i32, i32, i32) {
    %c0_i32 = arith.constant 0 : i32
    %c0_i32_0 = arith.constant 0 : i32
    %c0_i32_1 = arith.constant 0 : i32
    %c0_i32_2 = arith.constant 0 : i32
    return %c0_i32, %c0_i32_0, %c0_i32_1 : i32, i32, i32
  }
  func.func @transform_2(%arg0: i32) -> (i32, i32) {
    %c0_i32 = arith.constant 0 : i32
    %c0_i32_0 = arith.constant 0 : i32
    return %arg0, %c0_i32 : i32, i32
  }
}

module attributes {stable_mosaic.version = 11 : i64} {
  func.func @glu_down_kernel(%arg0: i32, %arg1: memref<16x32xbf16, #tpu.memory_space<vmem>>, %arg2: memref<1x1x1xf32, #tpu.memory_space<vmem>>, %arg3: memref<32x32xbf16, #tpu.memory_space<vmem>>, %arg4: memref<1x32xf32, #tpu.memory_space<vmem>>, %arg5: memref<16x32xbf16, #tpu.memory_space<vmem>>, %arg6: memref<1x1x1xf32, #tpu.memory_space<vmem>>) attributes {dimension_semantics = [#tpu.dimension_semantics<parallel>], iteration_bounds = array<i64: 1>, scalar_prefetch = 0 : i64, scratch_operands = 0 : i64, tpu.core_type = #tpu.core_type<tc>, window_params = [{transform_indices = @transform_0, window_bounds = array<i64: 16, 32>}, {pipeline_mode = #tpu.pipeline_mode<synchronous>, transform_indices = @transform_1, window_bounds = array<i64: 1, 1, 1>}, {pipeline_mode = #tpu.pipeline_mode<synchronous>, transform_indices = @transform_2, window_bounds = array<i64: 32, 32>}, {pipeline_mode = #tpu.pipeline_mode<synchronous>, transform_indices = @transform_3, window_bounds = array<i64: 1, 32>}, {transform_indices = @transform_4, window_bounds = array<i64: 16, 32>}, {transform_indices = @transform_5, window_bounds = array<i64: 1, 1, 1>}]} {
    %c0 = arith.constant 0 : index
    %c0_0 = arith.constant 0 : index
    %c0_1 = arith.constant 0 : index
    %0 = vector.load %arg2[%c0, %c0_0, %c0_1] : memref<1x1x1xf32, #tpu.memory_space<vmem>>, vector<1x1x1xf32>
    %cst = arith.constant dense<0xFF800000> : vector<1x1xf32>
    %1 = vector.multi_reduction <maximumf>, %0, %cst [0] : vector<1x1x1xf32> to vector<1x1xf32>
    %cst_2 = arith.constant 0.000000e+00 : f32
    %2 = vector.broadcast %cst_2 : f32 to vector<1x1xf32>
    %3 = arith.cmpf oeq, %1, %2 : vector<1x1xf32>
    %cst_3 = arith.constant 1.270000e+02 : f32
    %4 = vector.broadcast %cst_3 : f32 to vector<1x1xf32>
    %5 = arith.divf %1, %4 : vector<1x1xf32>
    %cst_4 = arith.constant 1.000000e+00 : f32
    %6 = vector.broadcast %cst_4 : f32 to vector<1x1xf32>
    %7 = arith.select %3, %6, %5 : vector<1x1xi1>, vector<1x1xf32>
    %c0_5 = arith.constant 0 : index
    %c0_6 = arith.constant 0 : index
    %8 = vector.load %arg1[%c0_5, %c0_6] : memref<16x32xbf16, #tpu.memory_space<vmem>>, vector<16x32xbf16>
    %9 = arith.extf %8 : vector<16x32xbf16> to vector<16x32xf32>
    %10 = vector.broadcast %7 : vector<1x1xf32> to vector<16x32xf32>
    %11 = arith.divf %9, %10 : vector<16x32xf32>
    %12 = math.roundeven %11 : vector<16x32xf32>
    %cst_7 = arith.constant -1.280000e+02 : f32
    %cst_8 = arith.constant 1.270000e+02 : f32
    %13 = vector.broadcast %cst_7 : f32 to vector<16x32xf32>
    %14 = arith.maximumf %13, %12 : vector<16x32xf32>
    %15 = vector.broadcast %cst_8 : f32 to vector<16x32xf32>
    %16 = arith.minimumf %15, %14 : vector<16x32xf32>
    %17 = arith.truncf %16 : vector<16x32xf32> to vector<16x32xbf16>
    %c0_9 = arith.constant 0 : index
    %c0_10 = arith.constant 0 : index
    %18 = vector.load %arg3[%c0_9, %c0_10] : memref<32x32xbf16, #tpu.memory_space<vmem>>, vector<32x32xbf16>
    %cst_11 = arith.constant dense<0.000000e+00> : vector<16x32xf32>
    %19 = tpu.matmul %17, %18, %cst_11 {dimension_numbers = #tpu.dot_dimension_numbers<[1], [0], [0], [1], [0, 0, 1, 1], [], []>} : vector<16x32xbf16>, vector<32x32xbf16>, vector<16x32xf32> -> vector<16x32xf32>
    %20 = vector.broadcast %7 : vector<1x1xf32> to vector<16x32xf32>
    %21 = arith.mulf %19, %20 : vector<16x32xf32>
    %c0_12 = arith.constant 0 : index
    %c0_13 = arith.constant 0 : index
    %22 = vector.load %arg4[%c0_12, %c0_13] : memref<1x32xf32, #tpu.memory_space<vmem>>, vector<1x32xf32>
    %23 = vector.broadcast %22 : vector<1x32xf32> to vector<16x32xf32>
    %24 = arith.addf %21, %23 : vector<16x32xf32>
    %cst_14 = arith.constant dense<0.000000e+00> : vector<16xf32>
    %25 = vector.multi_reduction <add>, %24, %cst_14 [1] : vector<16x32xf32> to vector<16xf32>
    %26 = vector.shape_cast %25 : vector<16xf32> to vector<16x1xf32>
    %cst_15 = arith.constant 3.200000e+01 : f32
    %27 = vector.broadcast %cst_15 : f32 to vector<16x1xf32>
    %28 = arith.divf %26, %27 : vector<16x1xf32>
    %29 = vector.broadcast %28 : vector<16x1xf32> to vector<16x32xf32>
    %30 = arith.subf %24, %29 : vector<16x32xf32>
    %31 = arith.mulf %30, %30 : vector<16x32xf32>
    %cst_16 = arith.constant dense<0.000000e+00> : vector<16xf32>
    %32 = vector.multi_reduction <add>, %31, %cst_16 [1] : vector<16x32xf32> to vector<16xf32>
    %33 = vector.shape_cast %32 : vector<16xf32> to vector<16x1xf32>
    %cst_17 = arith.constant 3.200000e+01 : f32
    %34 = vector.broadcast %cst_17 : f32 to vector<16x1xf32>
    %35 = arith.divf %33, %34 : vector<16x1xf32>
    %cst_18 = arith.constant 9.99999993E-9 : f32
    %36 = vector.broadcast %cst_18 : f32 to vector<16x1xf32>
    %37 = arith.addf %35, %36 : vector<16x1xf32>
    %cst_19 = arith.constant 1.000000e-10 : f32
    %38 = vector.broadcast %cst_19 : f32 to vector<16x1xf32>
    %39 = arith.maximumf %37, %38 : vector<16x1xf32>
    %40 = math.rsqrt %39 : vector<16x1xf32>
    %41 = vector.broadcast %28 : vector<16x1xf32> to vector<16x32xf32>
    %42 = arith.subf %24, %41 : vector<16x32xf32>
    %43 = vector.broadcast %40 : vector<16x1xf32> to vector<16x32xf32>
    %44 = arith.mulf %43, %42 : vector<16x32xf32>
    %45 = arith.truncf %44 : vector<16x32xf32> to vector<16x32xbf16>
    %c0_20 = arith.constant 0 : index
    %c0_21 = arith.constant 0 : index
    %46 = vector.load %arg5[%c0_20, %c0_21] : memref<16x32xbf16, #tpu.memory_space<vmem>>, vector<16x32xbf16>
    tpu.vector_store %arg5[%c0_20, %c0_21], %45 {strides = array<i32>} : memref<16x32xbf16, #tpu.memory_space<vmem>>, vector<16x32xbf16>,
    %47 = arith.extf %45 : vector<16x32xbf16> to vector<16x32xf32>
    %48 = math.absf %47 : vector<16x32xf32>
    %cst_22 = arith.constant dense<0xFF800000> : vector<16xf32>
    %49 = vector.multi_reduction <maximumf>, %48, %cst_22 [1] : vector<16x32xf32> to vector<16xf32>
    %50 = vector.shape_cast %49 : vector<16xf32> to vector<16x1xf32>
    %cst_23 = arith.constant dense<0xFF800000> : vector<1xf32>
    %51 = vector.multi_reduction <maximumf>, %50, %cst_23 [0] : vector<16x1xf32> to vector<1xf32>
    %52 = vector.shape_cast %51 : vector<1xf32> to vector<1x1xf32>
    %53 = vector.shape_cast %52 : vector<1x1xf32> to vector<1x1x1xf32>
    %c0_24 = arith.constant 0 : index
    %c0_25 = arith.constant 0 : index
    %c0_26 = arith.constant 0 : index
    %54 = vector.load %arg6[%c0_24, %c0_25, %c0_26] : memref<1x1x1xf32, #tpu.memory_space<vmem>>, vector<1x1x1xf32>
    tpu.vector_store %arg6[%c0_24, %c0_25, %c0_26], %53 {strides = array<i32>} : memref<1x1x1xf32, #tpu.memory_space<vmem>>, vector<1x1x1xf32>,
    return
  }
  func.func @transform_0(%arg0: i32) -> (i32, i32) {
    %c0_i32 = arith.constant 0 : i32
    %c0_i32_0 = arith.constant 0 : i32
    return %arg0, %c0_i32 : i32, i32
  }
  func.func @transform_1(%arg0: i32) -> (i32, i32, i32) {
    %c0_i32 = arith.constant 0 : i32
    %c0_i32_0 = arith.constant 0 : i32
    %c0_i32_1 = arith.constant 0 : i32
    %c0_i32_2 = arith.constant 0 : i32
    return %c0_i32, %c0_i32_0, %c0_i32_1 : i32, i32, i32
  }
  func.func @transform_2(%arg0: i32) -> (i32, i32) {
    %c0_i32 = arith.constant 0 : i32
    %c0_i32_0 = arith.constant 0 : i32
    %c0_i32_1 = arith.constant 0 : i32
    return %c0_i32, %c0_i32_0 : i32, i32
  }
  func.func @transform_3(%arg0: i32) -> (i32, i32) {
    %c0_i32 = arith.constant 0 : i32
    %c0_i32_0 = arith.constant 0 : i32
    %c0_i32_1 = arith.constant 0 : i32
    return %c0_i32, %c0_i32_0 : i32, i32
  }
  func.func @transform_4(%arg0: i32) -> (i32, i32) {
    %c0_i32 = arith.constant 0 : i32
    %c0_i32_0 = arith.constant 0 : i32
    return %arg0, %c0_i32 : i32, i32
  }
  func.func @transform_5(%arg0: i32) -> (i32, i32, i32) {
    %c0_i32 = arith.constant 0 : i32
    %c0_i32_0 = arith.constant 0 : i32
    %c0_i32_1 = arith.constant 0 : i32
    return %arg0, %c0_i32, %c0_i32_0 : i32, i32, i32
  }
}

module attributes {stable_mosaic.version = 11 : i64} {
  func.func @mlgru_fused_kernel(%arg0: i32, %arg1: memref<8x2x32xf32, #tpu.memory_space<vmem>>, %arg2: memref<32x96xbf16, #tpu.memory_space<vmem>>, %arg3: memref<1x96xf32, #tpu.memory_space<vmem>>, %arg4: memref<8x2x32xbf16, #tpu.memory_space<vmem>>, %arg5: memref<1x1xf32, #tpu.memory_space<vmem>>, %arg6: memref<2x32xf32, #tpu.memory_space<vmem>>, %arg7: memref<8x2x32xf32, #tpu.memory_space<vmem>>, %arg8: memref<8x2x32xf32, #tpu.memory_space<vmem>>, %arg9: memref<8x2x32xf32, #tpu.memory_space<vmem>>, %arg10: memref<1x1xf32, #tpu.memory_space<vmem>>) attributes {dimension_semantics = [#tpu.dimension_semantics<arbitrary>], iteration_bounds = array<i64: 1>, scalar_prefetch = 0 : i64, scratch_operands = 5 : i64, tpu.core_type = #tpu.core_type<tc>, window_params = [{transform_indices = @transform_0, window_bounds = array<i64: 8, 2, 32>}, {pipeline_mode = #tpu.pipeline_mode<synchronous>, transform_indices = @transform_1, window_bounds = array<i64: 32, 96>}, {pipeline_mode = #tpu.pipeline_mode<synchronous>, transform_indices = @transform_2, window_bounds = array<i64: 1, 96>}, {transform_indices = @transform_3, window_bounds = array<i64: 8, 2, 32>}, {pipeline_mode = #tpu.pipeline_mode<synchronous>, transform_indices = @transform_4, window_bounds = array<i64: 1, 1>}]} {
    %c0_i32 = arith.constant 0 : i32
    %0 = arith.cmpi eq, %arg0, %c0_i32 : i32
    %1 = arith.extui %0 : i1 to i32
    %c0_i32_0 = arith.constant 0 : i32
    %2 = arith.cmpi ne, %1, %c0_i32_0 : i32
    scf.if %2 {
      %cst_182 = arith.constant 0.000000e+00 : f32
      %462 = vector.broadcast %cst_182 : f32 to vector<2x32xf32>
      %c0_183 = arith.constant 0 : index
      %c0_184 = arith.constant 0 : index
      %463 = vector.load %arg6[%c0_183, %c0_184] : memref<2x32xf32, #tpu.memory_space<vmem>>, vector<2x32xf32>
      tpu.vector_store %arg6[%c0_183, %c0_184], %462 {strides = array<i32>} : memref<2x32xf32, #tpu.memory_space<vmem>>, vector<2x32xf32>,
      %cst_185 = arith.constant 0.000000e+00 : f32
      %464 = vector.broadcast %cst_185 : f32 to vector<1x1xf32>
      %c0_186 = arith.constant 0 : index
      %c0_187 = arith.constant 0 : index
      %465 = vector.load %arg10[%c0_186, %c0_187] : memref<1x1xf32, #tpu.memory_space<vmem>>, vector<1x1xf32>
      tpu.vector_store %arg10[%c0_186, %c0_187], %464 {strides = array<i32>} : memref<1x1xf32, #tpu.memory_space<vmem>>, vector<1x1xf32>,
    } else {
    }
    %c0 = arith.constant 0 : index
    %c0_1 = arith.constant 0 : index
    %c0_2 = arith.constant 0 : index
    %3 = vector.load %arg1[%c0, %c0_1, %c0_2] : memref<8x2x32xf32, #tpu.memory_space<vmem>>, vector<8x2x32xf32>
    %cst = arith.constant dense<0.000000e+00> : vector<8x2xf32>
    %4 = vector.multi_reduction <add>, %3, %cst [2] : vector<8x2x32xf32> to vector<8x2xf32>
    %5 = vector.shape_cast %4 : vector<8x2xf32> to vector<8x2x1xf32>
    %cst_3 = arith.constant 3.200000e+01 : f32
    %6 = vector.broadcast %cst_3 : f32 to vector<8x2x1xf32>
    %7 = arith.divf %5, %6 : vector<8x2x1xf32>
    %8 = vector.broadcast %7 : vector<8x2x1xf32> to vector<8x2x32xf32>
    %9 = arith.subf %3, %8 : vector<8x2x32xf32>
    %10 = arith.mulf %9, %9 : vector<8x2x32xf32>
    %cst_4 = arith.constant dense<0.000000e+00> : vector<8x2xf32>
    %11 = vector.multi_reduction <add>, %10, %cst_4 [2] : vector<8x2x32xf32> to vector<8x2xf32>
    %12 = vector.shape_cast %11 : vector<8x2xf32> to vector<8x2x1xf32>
    %cst_5 = arith.constant 3.200000e+01 : f32
    %13 = vector.broadcast %cst_5 : f32 to vector<8x2x1xf32>
    %14 = arith.divf %12, %13 : vector<8x2x1xf32>
    %cst_6 = arith.constant 9.99999993E-9 : f32
    %15 = vector.broadcast %cst_6 : f32 to vector<8x2x1xf32>
    %16 = arith.addf %14, %15 : vector<8x2x1xf32>
    %cst_7 = arith.constant 1.000000e-10 : f32
    %17 = vector.broadcast %cst_7 : f32 to vector<8x2x1xf32>
    %18 = arith.maximumf %16, %17 : vector<8x2x1xf32>
    %19 = math.rsqrt %18 : vector<8x2x1xf32>
    %20 = vector.broadcast %7 : vector<8x2x1xf32> to vector<8x2x32xf32>
    %21 = arith.subf %3, %20 : vector<8x2x32xf32>
    %22 = vector.broadcast %19 : vector<8x2x1xf32> to vector<8x2x32xf32>
    %23 = arith.mulf %22, %21 : vector<8x2x32xf32>
    %24 = math.absf %23 : vector<8x2x32xf32>
    %cst_8 = arith.constant dense<0xFF800000> : vector<8x2xf32>
    %25 = vector.multi_reduction <maximumf>, %24, %cst_8 [2] : vector<8x2x32xf32> to vector<8x2xf32>
    %26 = vector.shape_cast %25 : vector<8x2xf32> to vector<8x2x1xf32>
    %cst_9 = arith.constant dense<0xFF800000> : vector<8x1xf32>
    %27 = vector.multi_reduction <maximumf>, %26, %cst_9 [1] : vector<8x2x1xf32> to vector<8x1xf32>
    %28 = vector.shape_cast %27 : vector<8x1xf32> to vector<8x1x1xf32>
    %cst_10 = arith.constant 0.000000e+00 : f32
    %29 = vector.broadcast %cst_10 : f32 to vector<8x1x1xf32>
    %30 = arith.cmpf oeq, %28, %29 : vector<8x1x1xf32>
    %cst_11 = arith.constant 1.270000e+02 : f32
    %31 = vector.broadcast %cst_11 : f32 to vector<8x1x1xf32>
    %32 = arith.divf %28, %31 : vector<8x1x1xf32>
    %cst_12 = arith.constant 1.000000e+00 : f32
    %33 = vector.broadcast %cst_12 : f32 to vector<8x1x1xf32>
    %34 = arith.select %30, %33, %32 : vector<8x1x1xi1>, vector<8x1x1xf32>
    %35 = vector.broadcast %34 : vector<8x1x1xf32> to vector<8x2x32xf32>
    %36 = arith.divf %23, %35 : vector<8x2x32xf32>
    %37 = math.roundeven %36 : vector<8x2x32xf32>
    %cst_13 = arith.constant -1.280000e+02 : f32
    %cst_14 = arith.constant 1.270000e+02 : f32
    %38 = vector.broadcast %cst_13 : f32 to vector<8x2x32xf32>
    %39 = arith.maximumf %38, %37 : vector<8x2x32xf32>
    %40 = vector.broadcast %cst_14 : f32 to vector<8x2x32xf32>
    %41 = arith.minimumf %40, %39 : vector<8x2x32xf32>
    %42 = arith.truncf %41 : vector<8x2x32xf32> to vector<8x2x32xbf16>
    %43 = vector.shape_cast %42 : vector<8x2x32xbf16> to vector<16x32xbf16>
    %c0_15 = arith.constant 0 : index
    %c0_16 = arith.constant 0 : index
    %44 = vector.load %arg2[%c0_15, %c0_16] : memref<32x96xbf16, #tpu.memory_space<vmem>>, vector<32x96xbf16>
    %cst_17 = arith.constant dense<0.000000e+00> : vector<16x96xf32>
    %45 = tpu.matmul %43, %44, %cst_17 {dimension_numbers = #tpu.dot_dimension_numbers<[1], [0], [0], [1], [0, 0, 1, 1], [], []>} : vector<16x32xbf16>, vector<32x96xbf16>, vector<16x96xf32> -> vector<16x96xf32>
    %46 = vector.shape_cast %45 : vector<16x96xf32> to vector<8x2x96xf32>
    %47 = vector.broadcast %34 : vector<8x1x1xf32> to vector<8x2x96xf32>
    %48 = arith.mulf %46, %47 : vector<8x2x96xf32>
    %c0_18 = arith.constant 0 : index
    %c0_19 = arith.constant 0 : index
    %49 = vector.load %arg3[%c0_18, %c0_19] : memref<1x96xf32, #tpu.memory_space<vmem>>, vector<1x96xf32>
    %50 = vector.shape_cast %49 : vector<1x96xf32> to vector<1x1x96xf32>
    %51 = vector.broadcast %50 : vector<1x1x96xf32> to vector<8x2x96xf32>
    %52 = arith.addf %48, %51 : vector<8x2x96xf32>
    %53 = vector.extract_strided_slice %52 {offsets = [0, 0, 0], sizes = [8, 2, 32], strides = [1, 1, 1]} : vector<8x2x96xf32> to vector<8x2x32xf32>
    %54 = arith.negf %53 : vector<8x2x32xf32>
    %55 = math.exp %54 : vector<8x2x32xf32>
    %cst_20 = arith.constant 1.000000e+00 : f32
    %56 = vector.broadcast %cst_20 : f32 to vector<8x2x32xf32>
    %57 = arith.addf %56, %55 : vector<8x2x32xf32>
    %58 = arith.divf %56, %57 : vector<8x2x32xf32>
    %c0_21 = arith.constant 0 : index
    %c0_22 = arith.constant 0 : index
    %c0_23 = arith.constant 0 : index
    %59 = vector.load %arg7[%c0_21, %c0_22, %c0_23] : memref<8x2x32xf32, #tpu.memory_space<vmem>>, vector<8x2x32xf32>
    tpu.vector_store %arg7[%c0_21, %c0_22, %c0_23], %58 {strides = array<i32>} : memref<8x2x32xf32, #tpu.memory_space<vmem>>, vector<8x2x32xf32>,
    %60 = vector.extract_strided_slice %52 {offsets = [0, 0, 32], sizes = [8, 2, 32], strides = [1, 1, 1]} : vector<8x2x96xf32> to vector<8x2x32xf32>
    %61 = arith.negf %60 : vector<8x2x32xf32>
    %62 = math.exp %61 : vector<8x2x32xf32>
    %cst_24 = arith.constant 1.000000e+00 : f32
    %63 = vector.broadcast %cst_24 : f32 to vector<8x2x32xf32>
    %64 = arith.addf %63, %62 : vector<8x2x32xf32>
    %65 = arith.divf %63, %64 : vector<8x2x32xf32>
    %66 = arith.mulf %60, %65 : vector<8x2x32xf32>
    %c0_25 = arith.constant 0 : index
    %c0_26 = arith.constant 0 : index
    %c0_27 = arith.constant 0 : index
    %67 = vector.load %arg8[%c0_25, %c0_26, %c0_27] : memref<8x2x32xf32, #tpu.memory_space<vmem>>, vector<8x2x32xf32>
    tpu.vector_store %arg8[%c0_25, %c0_26, %c0_27], %66 {strides = array<i32>} : memref<8x2x32xf32, #tpu.memory_space<vmem>>, vector<8x2x32xf32>,
    %68 = vector.extract_strided_slice %52 {offsets = [0, 0, 64], sizes = [8, 2, 32], strides = [1, 1, 1]} : vector<8x2x96xf32> to vector<8x2x32xf32>
    %69 = arith.negf %68 : vector<8x2x32xf32>
    %70 = math.exp %69 : vector<8x2x32xf32>
    %cst_28 = arith.constant 1.000000e+00 : f32
    %71 = vector.broadcast %cst_28 : f32 to vector<8x2x32xf32>
    %72 = arith.addf %71, %70 : vector<8x2x32xf32>
    %73 = arith.divf %71, %72 : vector<8x2x32xf32>
    %c0_29 = arith.constant 0 : index
    %c0_30 = arith.constant 0 : index
    %c0_31 = arith.constant 0 : index
    %74 = vector.load %arg9[%c0_29, %c0_30, %c0_31] : memref<8x2x32xf32, #tpu.memory_space<vmem>>, vector<8x2x32xf32>
    tpu.vector_store %arg9[%c0_29, %c0_30, %c0_31], %73 {strides = array<i32>} : memref<8x2x32xf32, #tpu.memory_space<vmem>>, vector<8x2x32xf32>,
    %c0_32 = arith.constant 0 : index
    %c0_33 = arith.constant 0 : index
    %75 = vector.load %arg6[%c0_32, %c0_33] : memref<2x32xf32, #tpu.memory_space<vmem>>, vector<2x32xf32>
    %c0_34 = arith.constant 0 : index
    %c0_35 = arith.constant 0 : index
    %76 = vector.load %arg10[%c0_34, %c0_35] : memref<1x1xf32, #tpu.memory_space<vmem>>, vector<1x1xf32>
    %c0_i32_36 = arith.constant 0 : i32
    %77 = arith.index_cast %c0_i32_36 : i32 to index
    %c0_37 = arith.constant 0 : index
    %c0_38 = arith.constant 0 : index
    %78 = vector.load %arg7[%77, %c0_37, %c0_38] : memref<8x2x32xf32, #tpu.memory_space<vmem>>, vector<1x2x32xf32>
    %79 = vector.shape_cast %78 : vector<1x2x32xf32> to vector<2x32xf32>
    %80 = arith.mulf %79, %75 : vector<2x32xf32>
    %cst_39 = arith.constant 1.000000e+00 : f32
    %81 = vector.broadcast %cst_39 : f32 to vector<2x32xf32>
    %82 = arith.subf %81, %79 : vector<2x32xf32>
    %83 = arith.index_cast %c0_i32_36 : i32 to index
    %c0_40 = arith.constant 0 : index
    %c0_41 = arith.constant 0 : index
    %84 = vector.load %arg8[%83, %c0_40, %c0_41] : memref<8x2x32xf32, #tpu.memory_space<vmem>>, vector<1x2x32xf32>
    %85 = vector.shape_cast %84 : vector<1x2x32xf32> to vector<2x32xf32>
    %86 = arith.mulf %82, %85 : vector<2x32xf32>
    %87 = arith.addf %80, %86 : vector<2x32xf32>
    %88 = arith.index_cast %c0_i32_36 : i32 to index
    %c0_42 = arith.constant 0 : index
    %c0_43 = arith.constant 0 : index
    %89 = vector.load %arg9[%88, %c0_42, %c0_43] : memref<8x2x32xf32, #tpu.memory_space<vmem>>, vector<1x2x32xf32>
    %90 = vector.shape_cast %89 : vector<1x2x32xf32> to vector<2x32xf32>
    %91 = arith.mulf %87, %90 : vector<2x32xf32>
    %cst_44 = arith.constant dense<0.000000e+00> : vector<2xf32>
    %92 = vector.multi_reduction <add>, %91, %cst_44 [1] : vector<2x32xf32> to vector<2xf32>
    %93 = vector.shape_cast %92 : vector<2xf32> to vector<2x1xf32>
    %cst_45 = arith.constant 3.200000e+01 : f32
    %94 = vector.broadcast %cst_45 : f32 to vector<2x1xf32>
    %95 = arith.divf %93, %94 : vector<2x1xf32>
    %96 = vector.broadcast %95 : vector<2x1xf32> to vector<2x32xf32>
    %97 = arith.subf %91, %96 : vector<2x32xf32>
    %98 = arith.mulf %97, %97 : vector<2x32xf32>
    %cst_46 = arith.constant dense<0.000000e+00> : vector<2xf32>
    %99 = vector.multi_reduction <add>, %98, %cst_46 [1] : vector<2x32xf32> to vector<2xf32>
    %100 = vector.shape_cast %99 : vector<2xf32> to vector<2x1xf32>
    %cst_47 = arith.constant 3.200000e+01 : f32
    %101 = vector.broadcast %cst_47 : f32 to vector<2x1xf32>
    %102 = arith.divf %100, %101 : vector<2x1xf32>
    %cst_48 = arith.constant 9.99999993E-9 : f32
    %103 = vector.broadcast %cst_48 : f32 to vector<2x1xf32>
    %104 = arith.addf %102, %103 : vector<2x1xf32>
    %cst_49 = arith.constant 1.000000e-10 : f32
    %105 = vector.broadcast %cst_49 : f32 to vector<2x1xf32>
    %106 = arith.maximumf %104, %105 : vector<2x1xf32>
    %107 = math.rsqrt %106 : vector<2x1xf32>
    %108 = vector.broadcast %95 : vector<2x1xf32> to vector<2x32xf32>
    %109 = arith.subf %91, %108 : vector<2x32xf32>
    %110 = vector.broadcast %107 : vector<2x1xf32> to vector<2x32xf32>
    %111 = arith.mulf %110, %109 : vector<2x32xf32>
    %112 = arith.truncf %111 : vector<2x32xf32> to vector<2x32xbf16>
    %113 = arith.index_cast %c0_i32_36 : i32 to index
    %c0_50 = arith.constant 0 : index
    %c0_51 = arith.constant 0 : index
    %114 = vector.load %arg4[%113, %c0_50, %c0_51] : memref<8x2x32xbf16, #tpu.memory_space<vmem>>, vector<1x2x32xbf16>
    %115 = vector.shape_cast %114 : vector<1x2x32xbf16> to vector<2x32xbf16>
    %116 = vector.shape_cast %112 : vector<2x32xbf16> to vector<1x2x32xbf16>
    tpu.vector_store %arg4[%113, %c0_50, %c0_51], %116 {strides = array<i32>} : memref<8x2x32xbf16, #tpu.memory_space<vmem>>, vector<1x2x32xbf16>,
    %117 = arith.extf %112 : vector<2x32xbf16> to vector<2x32xf32>
    %118 = math.absf %117 : vector<2x32xf32>
    %cst_52 = arith.constant dense<0xFF800000> : vector<2xf32>
    %119 = vector.multi_reduction <maximumf>, %118, %cst_52 [1] : vector<2x32xf32> to vector<2xf32>
    %120 = vector.shape_cast %119 : vector<2xf32> to vector<2x1xf32>
    %cst_53 = arith.constant dense<0xFF800000> : vector<1xf32>
    %121 = vector.multi_reduction <maximumf>, %120, %cst_53 [0] : vector<2x1xf32> to vector<1xf32>
    %122 = vector.shape_cast %121 : vector<1xf32> to vector<1x1xf32>
    %123 = arith.maximumf %76, %122 : vector<1x1xf32>
    %c1_i32 = arith.constant 1 : i32
    %124 = arith.index_cast %c1_i32 : i32 to index
    %c0_54 = arith.constant 0 : index
    %c0_55 = arith.constant 0 : index
    %125 = vector.load %arg7[%124, %c0_54, %c0_55] : memref<8x2x32xf32, #tpu.memory_space<vmem>>, vector<1x2x32xf32>
    %126 = vector.shape_cast %125 : vector<1x2x32xf32> to vector<2x32xf32>
    %127 = arith.mulf %126, %87 : vector<2x32xf32>
    %cst_56 = arith.constant 1.000000e+00 : f32
    %128 = vector.broadcast %cst_56 : f32 to vector<2x32xf32>
    %129 = arith.subf %128, %126 : vector<2x32xf32>
    %130 = arith.index_cast %c1_i32 : i32 to index
    %c0_57 = arith.constant 0 : index
    %c0_58 = arith.constant 0 : index
    %131 = vector.load %arg8[%130, %c0_57, %c0_58] : memref<8x2x32xf32, #tpu.memory_space<vmem>>, vector<1x2x32xf32>
    %132 = vector.shape_cast %131 : vector<1x2x32xf32> to vector<2x32xf32>
    %133 = arith.mulf %129, %132 : vector<2x32xf32>
    %134 = arith.addf %127, %133 : vector<2x32xf32>
    %135 = arith.index_cast %c1_i32 : i32 to index
    %c0_59 = arith.constant 0 : index
    %c0_60 = arith.constant 0 : index
    %136 = vector.load %arg9[%135, %c0_59, %c0_60] : memref<8x2x32xf32, #tpu.memory_space<vmem>>, vector<1x2x32xf32>
    %137 = vector.shape_cast %136 : vector<1x2x32xf32> to vector<2x32xf32>
    %138 = arith.mulf %134, %137 : vector<2x32xf32>
    %cst_61 = arith.constant dense<0.000000e+00> : vector<2xf32>
    %139 = vector.multi_reduction <add>, %138, %cst_61 [1] : vector<2x32xf32> to vector<2xf32>
    %140 = vector.shape_cast %139 : vector<2xf32> to vector<2x1xf32>
    %cst_62 = arith.constant 3.200000e+01 : f32
    %141 = vector.broadcast %cst_62 : f32 to vector<2x1xf32>
    %142 = arith.divf %140, %141 : vector<2x1xf32>
    %143 = vector.broadcast %142 : vector<2x1xf32> to vector<2x32xf32>
    %144 = arith.subf %138, %143 : vector<2x32xf32>
    %145 = arith.mulf %144, %144 : vector<2x32xf32>
    %cst_63 = arith.constant dense<0.000000e+00> : vector<2xf32>
    %146 = vector.multi_reduction <add>, %145, %cst_63 [1] : vector<2x32xf32> to vector<2xf32>
    %147 = vector.shape_cast %146 : vector<2xf32> to vector<2x1xf32>
    %cst_64 = arith.constant 3.200000e+01 : f32
    %148 = vector.broadcast %cst_64 : f32 to vector<2x1xf32>
    %149 = arith.divf %147, %148 : vector<2x1xf32>
    %cst_65 = arith.constant 9.99999993E-9 : f32
    %150 = vector.broadcast %cst_65 : f32 to vector<2x1xf32>
    %151 = arith.addf %149, %150 : vector<2x1xf32>
    %cst_66 = arith.constant 1.000000e-10 : f32
    %152 = vector.broadcast %cst_66 : f32 to vector<2x1xf32>
    %153 = arith.maximumf %151, %152 : vector<2x1xf32>
    %154 = math.rsqrt %153 : vector<2x1xf32>
    %155 = vector.broadcast %142 : vector<2x1xf32> to vector<2x32xf32>
    %156 = arith.subf %138, %155 : vector<2x32xf32>
    %157 = vector.broadcast %154 : vector<2x1xf32> to vector<2x32xf32>
    %158 = arith.mulf %157, %156 : vector<2x32xf32>
    %159 = arith.truncf %158 : vector<2x32xf32> to vector<2x32xbf16>
    %160 = arith.index_cast %c1_i32 : i32 to index
    %c0_67 = arith.constant 0 : index
    %c0_68 = arith.constant 0 : index
    %161 = vector.load %arg4[%160, %c0_67, %c0_68] : memref<8x2x32xbf16, #tpu.memory_space<vmem>>, vector<1x2x32xbf16>
    %162 = vector.shape_cast %161 : vector<1x2x32xbf16> to vector<2x32xbf16>
    %163 = vector.shape_cast %159 : vector<2x32xbf16> to vector<1x2x32xbf16>
    tpu.vector_store %arg4[%160, %c0_67, %c0_68], %163 {strides = array<i32>} : memref<8x2x32xbf16, #tpu.memory_space<vmem>>, vector<1x2x32xbf16>,
    %164 = arith.extf %159 : vector<2x32xbf16> to vector<2x32xf32>
    %165 = math.absf %164 : vector<2x32xf32>
    %cst_69 = arith.constant dense<0xFF800000> : vector<2xf32>
    %166 = vector.multi_reduction <maximumf>, %165, %cst_69 [1] : vector<2x32xf32> to vector<2xf32>
    %167 = vector.shape_cast %166 : vector<2xf32> to vector<2x1xf32>
    %cst_70 = arith.constant dense<0xFF800000> : vector<1xf32>
    %168 = vector.multi_reduction <maximumf>, %167, %cst_70 [0] : vector<2x1xf32> to vector<1xf32>
    %169 = vector.shape_cast %168 : vector<1xf32> to vector<1x1xf32>
    %170 = arith.maximumf %123, %169 : vector<1x1xf32>
    %c2_i32 = arith.constant 2 : i32
    %171 = arith.index_cast %c2_i32 : i32 to index
    %c0_71 = arith.constant 0 : index
    %c0_72 = arith.constant 0 : index
    %172 = vector.load %arg7[%171, %c0_71, %c0_72] : memref<8x2x32xf32, #tpu.memory_space<vmem>>, vector<1x2x32xf32>
    %173 = vector.shape_cast %172 : vector<1x2x32xf32> to vector<2x32xf32>
    %174 = arith.mulf %173, %134 : vector<2x32xf32>
    %cst_73 = arith.constant 1.000000e+00 : f32
    %175 = vector.broadcast %cst_73 : f32 to vector<2x32xf32>
    %176 = arith.subf %175, %173 : vector<2x32xf32>
    %177 = arith.index_cast %c2_i32 : i32 to index
    %c0_74 = arith.constant 0 : index
    %c0_75 = arith.constant 0 : index
    %178 = vector.load %arg8[%177, %c0_74, %c0_75] : memref<8x2x32xf32, #tpu.memory_space<vmem>>, vector<1x2x32xf32>
    %179 = vector.shape_cast %178 : vector<1x2x32xf32> to vector<2x32xf32>
    %180 = arith.mulf %176, %179 : vector<2x32xf32>
    %181 = arith.addf %174, %180 : vector<2x32xf32>
    %182 = arith.index_cast %c2_i32 : i32 to index
    %c0_76 = arith.constant 0 : index
    %c0_77 = arith.constant 0 : index
    %183 = vector.load %arg9[%182, %c0_76, %c0_77] : memref<8x2x32xf32, #tpu.memory_space<vmem>>, vector<1x2x32xf32>
    %184 = vector.shape_cast %183 : vector<1x2x32xf32> to vector<2x32xf32>
    %185 = arith.mulf %181, %184 : vector<2x32xf32>
    %cst_78 = arith.constant dense<0.000000e+00> : vector<2xf32>
    %186 = vector.multi_reduction <add>, %185, %cst_78 [1] : vector<2x32xf32> to vector<2xf32>
    %187 = vector.shape_cast %186 : vector<2xf32> to vector<2x1xf32>
    %cst_79 = arith.constant 3.200000e+01 : f32
    %188 = vector.broadcast %cst_79 : f32 to vector<2x1xf32>
    %189 = arith.divf %187, %188 : vector<2x1xf32>
    %190 = vector.broadcast %189 : vector<2x1xf32> to vector<2x32xf32>
    %191 = arith.subf %185, %190 : vector<2x32xf32>
    %192 = arith.mulf %191, %191 : vector<2x32xf32>
    %cst_80 = arith.constant dense<0.000000e+00> : vector<2xf32>
    %193 = vector.multi_reduction <add>, %192, %cst_80 [1] : vector<2x32xf32> to vector<2xf32>
    %194 = vector.shape_cast %193 : vector<2xf32> to vector<2x1xf32>
    %cst_81 = arith.constant 3.200000e+01 : f32
    %195 = vector.broadcast %cst_81 : f32 to vector<2x1xf32>
    %196 = arith.divf %194, %195 : vector<2x1xf32>
    %cst_82 = arith.constant 9.99999993E-9 : f32
    %197 = vector.broadcast %cst_82 : f32 to vector<2x1xf32>
    %198 = arith.addf %196, %197 : vector<2x1xf32>
    %cst_83 = arith.constant 1.000000e-10 : f32
    %199 = vector.broadcast %cst_83 : f32 to vector<2x1xf32>
    %200 = arith.maximumf %198, %199 : vector<2x1xf32>
    %201 = math.rsqrt %200 : vector<2x1xf32>
    %202 = vector.broadcast %189 : vector<2x1xf32> to vector<2x32xf32>
    %203 = arith.subf %185, %202 : vector<2x32xf32>
    %204 = vector.broadcast %201 : vector<2x1xf32> to vector<2x32xf32>
    %205 = arith.mulf %204, %203 : vector<2x32xf32>
    %206 = arith.truncf %205 : vector<2x32xf32> to vector<2x32xbf16>
    %207 = arith.index_cast %c2_i32 : i32 to index
    %c0_84 = arith.constant 0 : index
    %c0_85 = arith.constant 0 : index
    %208 = vector.load %arg4[%207, %c0_84, %c0_85] : memref<8x2x32xbf16, #tpu.memory_space<vmem>>, vector<1x2x32xbf16>
    %209 = vector.shape_cast %208 : vector<1x2x32xbf16> to vector<2x32xbf16>
    %210 = vector.shape_cast %206 : vector<2x32xbf16> to vector<1x2x32xbf16>
    tpu.vector_store %arg4[%207, %c0_84, %c0_85], %210 {strides = array<i32>} : memref<8x2x32xbf16, #tpu.memory_space<vmem>>, vector<1x2x32xbf16>,
    %211 = arith.extf %206 : vector<2x32xbf16> to vector<2x32xf32>
    %212 = math.absf %211 : vector<2x32xf32>
    %cst_86 = arith.constant dense<0xFF800000> : vector<2xf32>
    %213 = vector.multi_reduction <maximumf>, %212, %cst_86 [1] : vector<2x32xf32> to vector<2xf32>
    %214 = vector.shape_cast %213 : vector<2xf32> to vector<2x1xf32>
    %cst_87 = arith.constant dense<0xFF800000> : vector<1xf32>
    %215 = vector.multi_reduction <maximumf>, %214, %cst_87 [0] : vector<2x1xf32> to vector<1xf32>
    %216 = vector.shape_cast %215 : vector<1xf32> to vector<1x1xf32>
    %217 = arith.maximumf %170, %216 : vector<1x1xf32>
    %c3_i32 = arith.constant 3 : i32
    %218 = arith.index_cast %c3_i32 : i32 to index
    %c0_88 = arith.constant 0 : index
    %c0_89 = arith.constant 0 : index
    %219 = vector.load %arg7[%218, %c0_88, %c0_89] : memref<8x2x32xf32, #tpu.memory_space<vmem>>, vector<1x2x32xf32>
    %220 = vector.shape_cast %219 : vector<1x2x32xf32> to vector<2x32xf32>
    %221 = arith.mulf %220, %181 : vector<2x32xf32>
    %cst_90 = arith.constant 1.000000e+00 : f32
    %222 = vector.broadcast %cst_90 : f32 to vector<2x32xf32>
    %223 = arith.subf %222, %220 : vector<2x32xf32>
    %224 = arith.index_cast %c3_i32 : i32 to index
    %c0_91 = arith.constant 0 : index
    %c0_92 = arith.constant 0 : index
    %225 = vector.load %arg8[%224, %c0_91, %c0_92] : memref<8x2x32xf32, #tpu.memory_space<vmem>>, vector<1x2x32xf32>
    %226 = vector.shape_cast %225 : vector<1x2x32xf32> to vector<2x32xf32>
    %227 = arith.mulf %223, %226 : vector<2x32xf32>
    %228 = arith.addf %221, %227 : vector<2x32xf32>
    %229 = arith.index_cast %c3_i32 : i32 to index
    %c0_93 = arith.constant 0 : index
    %c0_94 = arith.constant 0 : index
    %230 = vector.load %arg9[%229, %c0_93, %c0_94] : memref<8x2x32xf32, #tpu.memory_space<vmem>>, vector<1x2x32xf32>
    %231 = vector.shape_cast %230 : vector<1x2x32xf32> to vector<2x32xf32>
    %232 = arith.mulf %228, %231 : vector<2x32xf32>
    %cst_95 = arith.constant dense<0.000000e+00> : vector<2xf32>
    %233 = vector.multi_reduction <add>, %232, %cst_95 [1] : vector<2x32xf32> to vector<2xf32>
    %234 = vector.shape_cast %233 : vector<2xf32> to vector<2x1xf32>
    %cst_96 = arith.constant 3.200000e+01 : f32
    %235 = vector.broadcast %cst_96 : f32 to vector<2x1xf32>
    %236 = arith.divf %234, %235 : vector<2x1xf32>
    %237 = vector.broadcast %236 : vector<2x1xf32> to vector<2x32xf32>
    %238 = arith.subf %232, %237 : vector<2x32xf32>
    %239 = arith.mulf %238, %238 : vector<2x32xf32>
    %cst_97 = arith.constant dense<0.000000e+00> : vector<2xf32>
    %240 = vector.multi_reduction <add>, %239, %cst_97 [1] : vector<2x32xf32> to vector<2xf32>
    %241 = vector.shape_cast %240 : vector<2xf32> to vector<2x1xf32>
    %cst_98 = arith.constant 3.200000e+01 : f32
    %242 = vector.broadcast %cst_98 : f32 to vector<2x1xf32>
    %243 = arith.divf %241, %242 : vector<2x1xf32>
    %cst_99 = arith.constant 9.99999993E-9 : f32
    %244 = vector.broadcast %cst_99 : f32 to vector<2x1xf32>
    %245 = arith.addf %243, %244 : vector<2x1xf32>
    %cst_100 = arith.constant 1.000000e-10 : f32
    %246 = vector.broadcast %cst_100 : f32 to vector<2x1xf32>
    %247 = arith.maximumf %245, %246 : vector<2x1xf32>
    %248 = math.rsqrt %247 : vector<2x1xf32>
    %249 = vector.broadcast %236 : vector<2x1xf32> to vector<2x32xf32>
    %250 = arith.subf %232, %249 : vector<2x32xf32>
    %251 = vector.broadcast %248 : vector<2x1xf32> to vector<2x32xf32>
    %252 = arith.mulf %251, %250 : vector<2x32xf32>
    %253 = arith.truncf %252 : vector<2x32xf32> to vector<2x32xbf16>
    %254 = arith.index_cast %c3_i32 : i32 to index
    %c0_101 = arith.constant 0 : index
    %c0_102 = arith.constant 0 : index
    %255 = vector.load %arg4[%254, %c0_101, %c0_102] : memref<8x2x32xbf16, #tpu.memory_space<vmem>>, vector<1x2x32xbf16>
    %256 = vector.shape_cast %255 : vector<1x2x32xbf16> to vector<2x32xbf16>
    %257 = vector.shape_cast %253 : vector<2x32xbf16> to vector<1x2x32xbf16>
    tpu.vector_store %arg4[%254, %c0_101, %c0_102], %257 {strides = array<i32>} : memref<8x2x32xbf16, #tpu.memory_space<vmem>>, vector<1x2x32xbf16>,
    %258 = arith.extf %253 : vector<2x32xbf16> to vector<2x32xf32>
    %259 = math.absf %258 : vector<2x32xf32>
    %cst_103 = arith.constant dense<0xFF800000> : vector<2xf32>
    %260 = vector.multi_reduction <maximumf>, %259, %cst_103 [1] : vector<2x32xf32> to vector<2xf32>
    %261 = vector.shape_cast %260 : vector<2xf32> to vector<2x1xf32>
    %cst_104 = arith.constant dense<0xFF800000> : vector<1xf32>
    %262 = vector.multi_reduction <maximumf>, %261, %cst_104 [0] : vector<2x1xf32> to vector<1xf32>
    %263 = vector.shape_cast %262 : vector<1xf32> to vector<1x1xf32>
    %264 = arith.maximumf %217, %263 : vector<1x1xf32>
    %c4_i32 = arith.constant 4 : i32
    %265 = arith.index_cast %c4_i32 : i32 to index
    %c0_105 = arith.constant 0 : index
    %c0_106 = arith.constant 0 : index
    %266 = vector.load %arg7[%265, %c0_105, %c0_106] : memref<8x2x32xf32, #tpu.memory_space<vmem>>, vector<1x2x32xf32>
    %267 = vector.shape_cast %266 : vector<1x2x32xf32> to vector<2x32xf32>
    %268 = arith.mulf %267, %228 : vector<2x32xf32>
    %cst_107 = arith.constant 1.000000e+00 : f32
    %269 = vector.broadcast %cst_107 : f32 to vector<2x32xf32>
    %270 = arith.subf %269, %267 : vector<2x32xf32>
    %271 = arith.index_cast %c4_i32 : i32 to index
    %c0_108 = arith.constant 0 : index
    %c0_109 = arith.constant 0 : index
    %272 = vector.load %arg8[%271, %c0_108, %c0_109] : memref<8x2x32xf32, #tpu.memory_space<vmem>>, vector<1x2x32xf32>
    %273 = vector.shape_cast %272 : vector<1x2x32xf32> to vector<2x32xf32>
    %274 = arith.mulf %270, %273 : vector<2x32xf32>
    %275 = arith.addf %268, %274 : vector<2x32xf32>
    %276 = arith.index_cast %c4_i32 : i32 to index
    %c0_110 = arith.constant 0 : index
    %c0_111 = arith.constant 0 : index
    %277 = vector.load %arg9[%276, %c0_110, %c0_111] : memref<8x2x32xf32, #tpu.memory_space<vmem>>, vector<1x2x32xf32>
    %278 = vector.shape_cast %277 : vector<1x2x32xf32> to vector<2x32xf32>
    %279 = arith.mulf %275, %278 : vector<2x32xf32>
    %cst_112 = arith.constant dense<0.000000e+00> : vector<2xf32>
    %280 = vector.multi_reduction <add>, %279, %cst_112 [1] : vector<2x32xf32> to vector<2xf32>
    %281 = vector.shape_cast %280 : vector<2xf32> to vector<2x1xf32>
    %cst_113 = arith.constant 3.200000e+01 : f32
    %282 = vector.broadcast %cst_113 : f32 to vector<2x1xf32>
    %283 = arith.divf %281, %282 : vector<2x1xf32>
    %284 = vector.broadcast %283 : vector<2x1xf32> to vector<2x32xf32>
    %285 = arith.subf %279, %284 : vector<2x32xf32>
    %286 = arith.mulf %285, %285 : vector<2x32xf32>
    %cst_114 = arith.constant dense<0.000000e+00> : vector<2xf32>
    %287 = vector.multi_reduction <add>, %286, %cst_114 [1] : vector<2x32xf32> to vector<2xf32>
    %288 = vector.shape_cast %287 : vector<2xf32> to vector<2x1xf32>
    %cst_115 = arith.constant 3.200000e+01 : f32
    %289 = vector.broadcast %cst_115 : f32 to vector<2x1xf32>
    %290 = arith.divf %288, %289 : vector<2x1xf32>
    %cst_116 = arith.constant 9.99999993E-9 : f32
    %291 = vector.broadcast %cst_116 : f32 to vector<2x1xf32>
    %292 = arith.addf %290, %291 : vector<2x1xf32>
    %cst_117 = arith.constant 1.000000e-10 : f32
    %293 = vector.broadcast %cst_117 : f32 to vector<2x1xf32>
    %294 = arith.maximumf %292, %293 : vector<2x1xf32>
    %295 = math.rsqrt %294 : vector<2x1xf32>
    %296 = vector.broadcast %283 : vector<2x1xf32> to vector<2x32xf32>
    %297 = arith.subf %279, %296 : vector<2x32xf32>
    %298 = vector.broadcast %295 : vector<2x1xf32> to vector<2x32xf32>
    %299 = arith.mulf %298, %297 : vector<2x32xf32>
    %300 = arith.truncf %299 : vector<2x32xf32> to vector<2x32xbf16>
    %301 = arith.index_cast %c4_i32 : i32 to index
    %c0_118 = arith.constant 0 : index
    %c0_119 = arith.constant 0 : index
    %302 = vector.load %arg4[%301, %c0_118, %c0_119] : memref<8x2x32xbf16, #tpu.memory_space<vmem>>, vector<1x2x32xbf16>
    %303 = vector.shape_cast %302 : vector<1x2x32xbf16> to vector<2x32xbf16>
    %304 = vector.shape_cast %300 : vector<2x32xbf16> to vector<1x2x32xbf16>
    tpu.vector_store %arg4[%301, %c0_118, %c0_119], %304 {strides = array<i32>} : memref<8x2x32xbf16, #tpu.memory_space<vmem>>, vector<1x2x32xbf16>,
    %305 = arith.extf %300 : vector<2x32xbf16> to vector<2x32xf32>
    %306 = math.absf %305 : vector<2x32xf32>
    %cst_120 = arith.constant dense<0xFF800000> : vector<2xf32>
    %307 = vector.multi_reduction <maximumf>, %306, %cst_120 [1] : vector<2x32xf32> to vector<2xf32>
    %308 = vector.shape_cast %307 : vector<2xf32> to vector<2x1xf32>
    %cst_121 = arith.constant dense<0xFF800000> : vector<1xf32>
    %309 = vector.multi_reduction <maximumf>, %308, %cst_121 [0] : vector<2x1xf32> to vector<1xf32>
    %310 = vector.shape_cast %309 : vector<1xf32> to vector<1x1xf32>
    %311 = arith.maximumf %264, %310 : vector<1x1xf32>
    %c5_i32 = arith.constant 5 : i32
    %312 = arith.index_cast %c5_i32 : i32 to index
    %c0_122 = arith.constant 0 : index
    %c0_123 = arith.constant 0 : index
    %313 = vector.load %arg7[%312, %c0_122, %c0_123] : memref<8x2x32xf32, #tpu.memory_space<vmem>>, vector<1x2x32xf32>
    %314 = vector.shape_cast %313 : vector<1x2x32xf32> to vector<2x32xf32>
    %315 = arith.mulf %314, %275 : vector<2x32xf32>
    %cst_124 = arith.constant 1.000000e+00 : f32
    %316 = vector.broadcast %cst_124 : f32 to vector<2x32xf32>
    %317 = arith.subf %316, %314 : vector<2x32xf32>
    %318 = arith.index_cast %c5_i32 : i32 to index
    %c0_125 = arith.constant 0 : index
    %c0_126 = arith.constant 0 : index
    %319 = vector.load %arg8[%318, %c0_125, %c0_126] : memref<8x2x32xf32, #tpu.memory_space<vmem>>, vector<1x2x32xf32>
    %320 = vector.shape_cast %319 : vector<1x2x32xf32> to vector<2x32xf32>
    %321 = arith.mulf %317, %320 : vector<2x32xf32>
    %322 = arith.addf %315, %321 : vector<2x32xf32>
    %323 = arith.index_cast %c5_i32 : i32 to index
    %c0_127 = arith.constant 0 : index
    %c0_128 = arith.constant 0 : index
    %324 = vector.load %arg9[%323, %c0_127, %c0_128] : memref<8x2x32xf32, #tpu.memory_space<vmem>>, vector<1x2x32xf32>
    %325 = vector.shape_cast %324 : vector<1x2x32xf32> to vector<2x32xf32>
    %326 = arith.mulf %322, %325 : vector<2x32xf32>
    %cst_129 = arith.constant dense<0.000000e+00> : vector<2xf32>
    %327 = vector.multi_reduction <add>, %326, %cst_129 [1] : vector<2x32xf32> to vector<2xf32>
    %328 = vector.shape_cast %327 : vector<2xf32> to vector<2x1xf32>
    %cst_130 = arith.constant 3.200000e+01 : f32
    %329 = vector.broadcast %cst_130 : f32 to vector<2x1xf32>
    %330 = arith.divf %328, %329 : vector<2x1xf32>
    %331 = vector.broadcast %330 : vector<2x1xf32> to vector<2x32xf32>
    %332 = arith.subf %326, %331 : vector<2x32xf32>
    %333 = arith.mulf %332, %332 : vector<2x32xf32>
    %cst_131 = arith.constant dense<0.000000e+00> : vector<2xf32>
    %334 = vector.multi_reduction <add>, %333, %cst_131 [1] : vector<2x32xf32> to vector<2xf32>
    %335 = vector.shape_cast %334 : vector<2xf32> to vector<2x1xf32>
    %cst_132 = arith.constant 3.200000e+01 : f32
    %336 = vector.broadcast %cst_132 : f32 to vector<2x1xf32>
    %337 = arith.divf %335, %336 : vector<2x1xf32>
    %cst_133 = arith.constant 9.99999993E-9 : f32
    %338 = vector.broadcast %cst_133 : f32 to vector<2x1xf32>
    %339 = arith.addf %337, %338 : vector<2x1xf32>
    %cst_134 = arith.constant 1.000000e-10 : f32
    %340 = vector.broadcast %cst_134 : f32 to vector<2x1xf32>
    %341 = arith.maximumf %339, %340 : vector<2x1xf32>
    %342 = math.rsqrt %341 : vector<2x1xf32>
    %343 = vector.broadcast %330 : vector<2x1xf32> to vector<2x32xf32>
    %344 = arith.subf %326, %343 : vector<2x32xf32>
    %345 = vector.broadcast %342 : vector<2x1xf32> to vector<2x32xf32>
    %346 = arith.mulf %345, %344 : vector<2x32xf32>
    %347 = arith.truncf %346 : vector<2x32xf32> to vector<2x32xbf16>
    %348 = arith.index_cast %c5_i32 : i32 to index
    %c0_135 = arith.constant 0 : index
    %c0_136 = arith.constant 0 : index
    %349 = vector.load %arg4[%348, %c0_135, %c0_136] : memref<8x2x32xbf16, #tpu.memory_space<vmem>>, vector<1x2x32xbf16>
    %350 = vector.shape_cast %349 : vector<1x2x32xbf16> to vector<2x32xbf16>
    %351 = vector.shape_cast %347 : vector<2x32xbf16> to vector<1x2x32xbf16>
    tpu.vector_store %arg4[%348, %c0_135, %c0_136], %351 {strides = array<i32>} : memref<8x2x32xbf16, #tpu.memory_space<vmem>>, vector<1x2x32xbf16>,
    %352 = arith.extf %347 : vector<2x32xbf16> to vector<2x32xf32>
    %353 = math.absf %352 : vector<2x32xf32>
    %cst_137 = arith.constant dense<0xFF800000> : vector<2xf32>
    %354 = vector.multi_reduction <maximumf>, %353, %cst_137 [1] : vector<2x32xf32> to vector<2xf32>
    %355 = vector.shape_cast %354 : vector<2xf32> to vector<2x1xf32>
    %cst_138 = arith.constant dense<0xFF800000> : vector<1xf32>
    %356 = vector.multi_reduction <maximumf>, %355, %cst_138 [0] : vector<2x1xf32> to vector<1xf32>
    %357 = vector.shape_cast %356 : vector<1xf32> to vector<1x1xf32>
    %358 = arith.maximumf %311, %357 : vector<1x1xf32>
    %c6_i32 = arith.constant 6 : i32
    %359 = arith.index_cast %c6_i32 : i32 to index
    %c0_139 = arith.constant 0 : index
    %c0_140 = arith.constant 0 : index
    %360 = vector.load %arg7[%359, %c0_139, %c0_140] : memref<8x2x32xf32, #tpu.memory_space<vmem>>, vector<1x2x32xf32>
    %361 = vector.shape_cast %360 : vector<1x2x32xf32> to vector<2x32xf32>
    %362 = arith.mulf %361, %322 : vector<2x32xf32>
    %cst_141 = arith.constant 1.000000e+00 : f32
    %363 = vector.broadcast %cst_141 : f32 to vector<2x32xf32>
    %364 = arith.subf %363, %361 : vector<2x32xf32>
    %365 = arith.index_cast %c6_i32 : i32 to index
    %c0_142 = arith.constant 0 : index
    %c0_143 = arith.constant 0 : index
    %366 = vector.load %arg8[%365, %c0_142, %c0_143] : memref<8x2x32xf32, #tpu.memory_space<vmem>>, vector<1x2x32xf32>
    %367 = vector.shape_cast %366 : vector<1x2x32xf32> to vector<2x32xf32>
    %368 = arith.mulf %364, %367 : vector<2x32xf32>
    %369 = arith.addf %362, %368 : vector<2x32xf32>
    %370 = arith.index_cast %c6_i32 : i32 to index
    %c0_144 = arith.constant 0 : index
    %c0_145 = arith.constant 0 : index
    %371 = vector.load %arg9[%370, %c0_144, %c0_145] : memref<8x2x32xf32, #tpu.memory_space<vmem>>, vector<1x2x32xf32>
    %372 = vector.shape_cast %371 : vector<1x2x32xf32> to vector<2x32xf32>
    %373 = arith.mulf %369, %372 : vector<2x32xf32>
    %cst_146 = arith.constant dense<0.000000e+00> : vector<2xf32>
    %374 = vector.multi_reduction <add>, %373, %cst_146 [1] : vector<2x32xf32> to vector<2xf32>
    %375 = vector.shape_cast %374 : vector<2xf32> to vector<2x1xf32>
    %cst_147 = arith.constant 3.200000e+01 : f32
    %376 = vector.broadcast %cst_147 : f32 to vector<2x1xf32>
    %377 = arith.divf %375, %376 : vector<2x1xf32>
    %378 = vector.broadcast %377 : vector<2x1xf32> to vector<2x32xf32>
    %379 = arith.subf %373, %378 : vector<2x32xf32>
    %380 = arith.mulf %379, %379 : vector<2x32xf32>
    %cst_148 = arith.constant dense<0.000000e+00> : vector<2xf32>
    %381 = vector.multi_reduction <add>, %380, %cst_148 [1] : vector<2x32xf32> to vector<2xf32>
    %382 = vector.shape_cast %381 : vector<2xf32> to vector<2x1xf32>
    %cst_149 = arith.constant 3.200000e+01 : f32
    %383 = vector.broadcast %cst_149 : f32 to vector<2x1xf32>
    %384 = arith.divf %382, %383 : vector<2x1xf32>
    %cst_150 = arith.constant 9.99999993E-9 : f32
    %385 = vector.broadcast %cst_150 : f32 to vector<2x1xf32>
    %386 = arith.addf %384, %385 : vector<2x1xf32>
    %cst_151 = arith.constant 1.000000e-10 : f32
    %387 = vector.broadcast %cst_151 : f32 to vector<2x1xf32>
    %388 = arith.maximumf %386, %387 : vector<2x1xf32>
    %389 = math.rsqrt %388 : vector<2x1xf32>
    %390 = vector.broadcast %377 : vector<2x1xf32> to vector<2x32xf32>
    %391 = arith.subf %373, %390 : vector<2x32xf32>
    %392 = vector.broadcast %389 : vector<2x1xf32> to vector<2x32xf32>
    %393 = arith.mulf %392, %391 : vector<2x32xf32>
    %394 = arith.truncf %393 : vector<2x32xf32> to vector<2x32xbf16>
    %395 = arith.index_cast %c6_i32 : i32 to index
    %c0_152 = arith.constant 0 : index
    %c0_153 = arith.constant 0 : index
    %396 = vector.load %arg4[%395, %c0_152, %c0_153] : memref<8x2x32xbf16, #tpu.memory_space<vmem>>, vector<1x2x32xbf16>
    %397 = vector.shape_cast %396 : vector<1x2x32xbf16> to vector<2x32xbf16>
    %398 = vector.shape_cast %394 : vector<2x32xbf16> to vector<1x2x32xbf16>
    tpu.vector_store %arg4[%395, %c0_152, %c0_153], %398 {strides = array<i32>} : memref<8x2x32xbf16, #tpu.memory_space<vmem>>, vector<1x2x32xbf16>,
    %399 = arith.extf %394 : vector<2x32xbf16> to vector<2x32xf32>
    %400 = math.absf %399 : vector<2x32xf32>
    %cst_154 = arith.constant dense<0xFF800000> : vector<2xf32>
    %401 = vector.multi_reduction <maximumf>, %400, %cst_154 [1] : vector<2x32xf32> to vector<2xf32>
    %402 = vector.shape_cast %401 : vector<2xf32> to vector<2x1xf32>
    %cst_155 = arith.constant dense<0xFF800000> : vector<1xf32>
    %403 = vector.multi_reduction <maximumf>, %402, %cst_155 [0] : vector<2x1xf32> to vector<1xf32>
    %404 = vector.shape_cast %403 : vector<1xf32> to vector<1x1xf32>
    %405 = arith.maximumf %358, %404 : vector<1x1xf32>
    %c7_i32 = arith.constant 7 : i32
    %406 = arith.index_cast %c7_i32 : i32 to index
    %c0_156 = arith.constant 0 : index
    %c0_157 = arith.constant 0 : index
    %407 = vector.load %arg7[%406, %c0_156, %c0_157] : memref<8x2x32xf32, #tpu.memory_space<vmem>>, vector<1x2x32xf32>
    %408 = vector.shape_cast %407 : vector<1x2x32xf32> to vector<2x32xf32>
    %409 = arith.mulf %408, %369 : vector<2x32xf32>
    %cst_158 = arith.constant 1.000000e+00 : f32
    %410 = vector.broadcast %cst_158 : f32 to vector<2x32xf32>
    %411 = arith.subf %410, %408 : vector<2x32xf32>
    %412 = arith.index_cast %c7_i32 : i32 to index
    %c0_159 = arith.constant 0 : index
    %c0_160 = arith.constant 0 : index
    %413 = vector.load %arg8[%412, %c0_159, %c0_160] : memref<8x2x32xf32, #tpu.memory_space<vmem>>, vector<1x2x32xf32>
    %414 = vector.shape_cast %413 : vector<1x2x32xf32> to vector<2x32xf32>
    %415 = arith.mulf %411, %414 : vector<2x32xf32>
    %416 = arith.addf %409, %415 : vector<2x32xf32>
    %417 = arith.index_cast %c7_i32 : i32 to index
    %c0_161 = arith.constant 0 : index
    %c0_162 = arith.constant 0 : index
    %418 = vector.load %arg9[%417, %c0_161, %c0_162] : memref<8x2x32xf32, #tpu.memory_space<vmem>>, vector<1x2x32xf32>
    %419 = vector.shape_cast %418 : vector<1x2x32xf32> to vector<2x32xf32>
    %420 = arith.mulf %416, %419 : vector<2x32xf32>
    %cst_163 = arith.constant dense<0.000000e+00> : vector<2xf32>
    %421 = vector.multi_reduction <add>, %420, %cst_163 [1] : vector<2x32xf32> to vector<2xf32>
    %422 = vector.shape_cast %421 : vector<2xf32> to vector<2x1xf32>
    %cst_164 = arith.constant 3.200000e+01 : f32
    %423 = vector.broadcast %cst_164 : f32 to vector<2x1xf32>
    %424 = arith.divf %422, %423 : vector<2x1xf32>
    %425 = vector.broadcast %424 : vector<2x1xf32> to vector<2x32xf32>
    %426 = arith.subf %420, %425 : vector<2x32xf32>
    %427 = arith.mulf %426, %426 : vector<2x32xf32>
    %cst_165 = arith.constant dense<0.000000e+00> : vector<2xf32>
    %428 = vector.multi_reduction <add>, %427, %cst_165 [1] : vector<2x32xf32> to vector<2xf32>
    %429 = vector.shape_cast %428 : vector<2xf32> to vector<2x1xf32>
    %cst_166 = arith.constant 3.200000e+01 : f32
    %430 = vector.broadcast %cst_166 : f32 to vector<2x1xf32>
    %431 = arith.divf %429, %430 : vector<2x1xf32>
    %cst_167 = arith.constant 9.99999993E-9 : f32
    %432 = vector.broadcast %cst_167 : f32 to vector<2x1xf32>
    %433 = arith.addf %431, %432 : vector<2x1xf32>
    %cst_168 = arith.constant 1.000000e-10 : f32
    %434 = vector.broadcast %cst_168 : f32 to vector<2x1xf32>
    %435 = arith.maximumf %433, %434 : vector<2x1xf32>
    %436 = math.rsqrt %435 : vector<2x1xf32>
    %437 = vector.broadcast %424 : vector<2x1xf32> to vector<2x32xf32>
    %438 = arith.subf %420, %437 : vector<2x32xf32>
    %439 = vector.broadcast %436 : vector<2x1xf32> to vector<2x32xf32>
    %440 = arith.mulf %439, %438 : vector<2x32xf32>
    %441 = arith.truncf %440 : vector<2x32xf32> to vector<2x32xbf16>
    %442 = arith.index_cast %c7_i32 : i32 to index
    %c0_169 = arith.constant 0 : index
    %c0_170 = arith.constant 0 : index
    %443 = vector.load %arg4[%442, %c0_169, %c0_170] : memref<8x2x32xbf16, #tpu.memory_space<vmem>>, vector<1x2x32xbf16>
    %444 = vector.shape_cast %443 : vector<1x2x32xbf16> to vector<2x32xbf16>
    %445 = vector.shape_cast %441 : vector<2x32xbf16> to vector<1x2x32xbf16>
    tpu.vector_store %arg4[%442, %c0_169, %c0_170], %445 {strides = array<i32>} : memref<8x2x32xbf16, #tpu.memory_space<vmem>>, vector<1x2x32xbf16>,
    %446 = arith.extf %441 : vector<2x32xbf16> to vector<2x32xf32>
    %447 = math.absf %446 : vector<2x32xf32>
    %cst_171 = arith.constant dense<0xFF800000> : vector<2xf32>
    %448 = vector.multi_reduction <maximumf>, %447, %cst_171 [1] : vector<2x32xf32> to vector<2xf32>
    %449 = vector.shape_cast %448 : vector<2xf32> to vector<2x1xf32>
    %cst_172 = arith.constant dense<0xFF800000> : vector<1xf32>
    %450 = vector.multi_reduction <maximumf>, %449, %cst_172 [0] : vector<2x1xf32> to vector<1xf32>
    %451 = vector.shape_cast %450 : vector<1xf32> to vector<1x1xf32>
    %452 = arith.maximumf %405, %451 : vector<1x1xf32>
    %c8_i32 = arith.constant 8 : i32
    %c0_173 = arith.constant 0 : index
    %c0_174 = arith.constant 0 : index
    %453 = vector.load %arg6[%c0_173, %c0_174] : memref<2x32xf32, #tpu.memory_space<vmem>>, vector<2x32xf32>
    tpu.vector_store %arg6[%c0_173, %c0_174], %416 {strides = array<i32>} : memref<2x32xf32, #tpu.memory_space<vmem>>, vector<2x32xf32>,
    %c0_175 = arith.constant 0 : index
    %c0_176 = arith.constant 0 : index
    %454 = vector.load %arg10[%c0_175, %c0_176] : memref<1x1xf32, #tpu.memory_space<vmem>>, vector<1x1xf32>
    tpu.vector_store %arg10[%c0_175, %c0_176], %452 {strides = array<i32>} : memref<1x1xf32, #tpu.memory_space<vmem>>, vector<1x1xf32>,
    %cst_177 = arith.constant 0.000000e+00 : f32
    %455 = vector.broadcast %cst_177 : f32 to vector<1x1xf32>
    %456 = arith.cmpf oeq, %452, %455 : vector<1x1xf32>
    %cst_178 = arith.constant 1.270000e+02 : f32
    %457 = vector.broadcast %cst_178 : f32 to vector<1x1xf32>
    %458 = arith.divf %452, %457 : vector<1x1xf32>
    %cst_179 = arith.constant 1.000000e+00 : f32
    %459 = vector.broadcast %cst_179 : f32 to vector<1x1xf32>
    %460 = arith.select %456, %459, %458 : vector<1x1xi1>, vector<1x1xf32>
    %c0_180 = arith.constant 0 : index
    %c0_181 = arith.constant 0 : index
    %461 = vector.load %arg5[%c0_180, %c0_181] : memref<1x1xf32, #tpu.memory_space<vmem>>, vector<1x1xf32>
    tpu.vector_store %arg5[%c0_180, %c0_181], %460 {strides = array<i32>} : memref<1x1xf32, #tpu.memory_space<vmem>>, vector<1x1xf32>,
    return
  }
  func.func @transform_0(%arg0: i32) -> (i32, i32, i32) {
    %c0_i32 = arith.constant 0 : i32
    %c0_i32_0 = arith.constant 0 : i32
    %c0_i32_1 = arith.constant 0 : i32
    return %arg0, %c0_i32, %c0_i32_0 : i32, i32, i32
  }
  func.func @transform_1(%arg0: i32) -> (i32, i32) {
    %c0_i32 = arith.constant 0 : i32
    %c0_i32_0 = arith.constant 0 : i32
    %c0_i32_1 = arith.constant 0 : i32
    return %c0_i32, %c0_i32_0 : i32, i32
  }
  func.func @transform_2(%arg0: i32) -> (i32, i32) {
    %c0_i32 = arith.constant 0 : i32
    %c0_i32_0 = arith.constant 0 : i32
    %c0_i32_1 = arith.constant 0 : i32
    return %c0_i32, %c0_i32_0 : i32, i32
  }
  func.func @transform_3(%arg0: i32) -> (i32, i32, i32) {
    %c0_i32 = arith.constant 0 : i32
    %c0_i32_0 = arith.constant 0 : i32
    %c0_i32_1 = arith.constant 0 : i32
    return %arg0, %c0_i32, %c0_i32_0 : i32, i32, i32
  }
  func.func @transform_4(%arg0: i32) -> (i32, i32) {
    %c0_i32 = arith.constant 0 : i32
    %c0_i32_0 = arith.constant 0 : i32
    %c0_i32_1 = arith.constant 0 : i32
    return %c0_i32, %c0_i32_0 : i32, i32
  }
}

module attributes {stable_mosaic.version = 11 : i64} {
  func.func @quant_qkv_kernel(%arg0: i32, %arg1: memref<16x32xbf16, #tpu.memory_space<vmem>>, %arg2: memref<1x1x1xf32, #tpu.memory_space<vmem>>, %arg3: memref<16x32xf32, #tpu.memory_space<vmem>>, %arg4: memref<32x32xbf16, #tpu.memory_space<vmem>>, %arg5: memref<32x64xbf16, #tpu.memory_space<vmem>>, %arg6: memref<1x32xf32, #tpu.memory_space<vmem>>, %arg7: memref<1x64xf32, #tpu.memory_space<vmem>>, %arg8: memref<16x32xbf16, #tpu.memory_space<vmem>>, %arg9: memref<16x32xbf16, #tpu.memory_space<vmem>>, %arg10: memref<16x32xbf16, #tpu.memory_space<vmem>>) attributes {dimension_semantics = [#tpu.dimension_semantics<parallel>], iteration_bounds = array<i64: 1>, scalar_prefetch = 0 : i64, scratch_operands = 0 : i64, tpu.core_type = #tpu.core_type<tc>, window_params = [{transform_indices = @transform_0, window_bounds = array<i64: 16, 32>}, {pipeline_mode = #tpu.pipeline_mode<synchronous>, transform_indices = @transform_1, window_bounds = array<i64: 1, 1, 1>}, {transform_indices = @transform_2, window_bounds = array<i64: 16, 32>}, {pipeline_mode = #tpu.pipeline_mode<synchronous>, transform_indices = @transform_3, window_bounds = array<i64: 32, 32>}, {pipeline_mode = #tpu.pipeline_mode<synchronous>, transform_indices = @transform_4, window_bounds = array<i64: 32, 64>}, {pipeline_mode = #tpu.pipeline_mode<synchronous>, transform_indices = @transform_5, window_bounds = array<i64: 1, 32>}, {pipeline_mode = #tpu.pipeline_mode<synchronous>, transform_indices = @transform_6, window_bounds = array<i64: 1, 64>}, {transform_indices = @transform_7, window_bounds = array<i64: 16, 32>}, {transform_indices = @transform_8, window_bounds = array<i64: 16, 32>}, {transform_indices = @transform_9, window_bounds = array<i64: 16, 32>}]} {
    %c0 = arith.constant 0 : index
    %c0_0 = arith.constant 0 : index
    %c0_1 = arith.constant 0 : index
    %0 = vector.load %arg2[%c0, %c0_0, %c0_1] : memref<1x1x1xf32, #tpu.memory_space<vmem>>, vector<1x1x1xf32>
    %cst = arith.constant dense<0xFF800000> : vector<1x1xf32>
    %1 = vector.multi_reduction <maximumf>, %0, %cst [0] : vector<1x1x1xf32> to vector<1x1xf32>
    %cst_2 = arith.constant 0.000000e+00 : f32
    %2 = vector.broadcast %cst_2 : f32 to vector<1x1xf32>
    %3 = arith.cmpf oeq, %1, %2 : vector<1x1xf32>
    %cst_3 = arith.constant 1.270000e+02 : f32
    %4 = vector.broadcast %cst_3 : f32 to vector<1x1xf32>
    %5 = arith.divf %1, %4 : vector<1x1xf32>
    %cst_4 = arith.constant 1.000000e+00 : f32
    %6 = vector.broadcast %cst_4 : f32 to vector<1x1xf32>
    %7 = arith.select %3, %6, %5 : vector<1x1xi1>, vector<1x1xf32>
    %c0_5 = arith.constant 0 : index
    %c0_6 = arith.constant 0 : index
    %8 = vector.load %arg1[%c0_5, %c0_6] : memref<16x32xbf16, #tpu.memory_space<vmem>>, vector<16x32xbf16>
    %9 = arith.extf %8 : vector<16x32xbf16> to vector<16x32xf32>
    %10 = vector.broadcast %7 : vector<1x1xf32> to vector<16x32xf32>
    %11 = arith.divf %9, %10 : vector<16x32xf32>
    %12 = math.roundeven %11 : vector<16x32xf32>
    %cst_7 = arith.constant -1.280000e+02 : f32
    %cst_8 = arith.constant 1.270000e+02 : f32
    %13 = vector.broadcast %cst_7 : f32 to vector<16x32xf32>
    %14 = arith.maximumf %13, %12 : vector<16x32xf32>
    %15 = vector.broadcast %cst_8 : f32 to vector<16x32xf32>
    %16 = arith.minimumf %15, %14 : vector<16x32xf32>
    %17 = vector.broadcast %7 : vector<1x1xf32> to vector<16x32xf32>
    %18 = arith.mulf %16, %17 : vector<16x32xf32>
    %19 = arith.truncf %18 : vector<16x32xf32> to vector<16x32xbf16>
    %c0_9 = arith.constant 0 : index
    %c0_10 = arith.constant 0 : index
    %20 = vector.load %arg4[%c0_9, %c0_10] : memref<32x32xbf16, #tpu.memory_space<vmem>>, vector<32x32xbf16>
    %cst_11 = arith.constant dense<0.000000e+00> : vector<16x32xf32>
    %21 = tpu.matmul %19, %20, %cst_11 {dimension_numbers = #tpu.dot_dimension_numbers<[1], [0], [0], [1], [0, 0, 1, 1], [], []>} : vector<16x32xbf16>, vector<32x32xbf16>, vector<16x32xf32> -> vector<16x32xf32>
    %c0_12 = arith.constant 0 : index
    %c0_13 = arith.constant 0 : index
    %22 = vector.load %arg6[%c0_12, %c0_13] : memref<1x32xf32, #tpu.memory_space<vmem>>, vector<1x32xf32>
    %23 = vector.broadcast %22 : vector<1x32xf32> to vector<16x32xf32>
    %24 = arith.addf %21, %23 : vector<16x32xf32>
    %c0_14 = arith.constant 0 : index
    %c0_15 = arith.constant 0 : index
    %25 = vector.load %arg3[%c0_14, %c0_15] : memref<16x32xf32, #tpu.memory_space<vmem>>, vector<16x32xf32>
    %26 = arith.truncf %25 : vector<16x32xf32> to vector<16x32xbf16>
    %c0_16 = arith.constant 0 : index
    %c0_17 = arith.constant 0 : index
    %27 = vector.load %arg5[%c0_16, %c0_17] : memref<32x64xbf16, #tpu.memory_space<vmem>>, vector<32x64xbf16>
    %cst_18 = arith.constant dense<0.000000e+00> : vector<16x64xf32>
    %28 = tpu.matmul %26, %27, %cst_18 {dimension_numbers = #tpu.dot_dimension_numbers<[1], [0], [0], [1], [0, 0, 1, 1], [], []>} : vector<16x32xbf16>, vector<32x64xbf16>, vector<16x64xf32> -> vector<16x64xf32>
    %c0_19 = arith.constant 0 : index
    %c0_20 = arith.constant 0 : index
    %29 = vector.load %arg7[%c0_19, %c0_20] : memref<1x64xf32, #tpu.memory_space<vmem>>, vector<1x64xf32>
    %30 = vector.broadcast %29 : vector<1x64xf32> to vector<16x64xf32>
    %31 = arith.addf %28, %30 : vector<16x64xf32>
    %32 = arith.truncf %24 : vector<16x32xf32> to vector<16x32xbf16>
    %c0_21 = arith.constant 0 : index
    %c0_22 = arith.constant 0 : index
    %33 = vector.load %arg8[%c0_21, %c0_22] : memref<16x32xbf16, #tpu.memory_space<vmem>>, vector<16x32xbf16>
    tpu.vector_store %arg8[%c0_21, %c0_22], %32 {strides = array<i32>} : memref<16x32xbf16, #tpu.memory_space<vmem>>, vector<16x32xbf16>,
    %34 = vector.extract_strided_slice %31 {offsets = [0, 0], sizes = [16, 32], strides = [1, 1]} : vector<16x64xf32> to vector<16x32xf32>
    %35 = arith.truncf %34 : vector<16x32xf32> to vector<16x32xbf16>
    %c0_23 = arith.constant 0 : index
    %c0_24 = arith.constant 0 : index
    %36 = vector.load %arg9[%c0_23, %c0_24] : memref<16x32xbf16, #tpu.memory_space<vmem>>, vector<16x32xbf16>
    tpu.vector_store %arg9[%c0_23, %c0_24], %35 {strides = array<i32>} : memref<16x32xbf16, #tpu.memory_space<vmem>>, vector<16x32xbf16>,
    %37 = vector.extract_strided_slice %31 {offsets = [0, 32], sizes = [16, 32], strides = [1, 1]} : vector<16x64xf32> to vector<16x32xf32>
    %38 = arith.truncf %37 : vector<16x32xf32> to vector<16x32xbf16>
    %c0_25 = arith.constant 0 : index
    %c0_26 = arith.constant 0 : index
    %39 = vector.load %arg10[%c0_25, %c0_26] : memref<16x32xbf16, #tpu.memory_space<vmem>>, vector<16x32xbf16>
    tpu.vector_store %arg10[%c0_25, %c0_26], %38 {strides = array<i32>} : memref<16x32xbf16, #tpu.memory_space<vmem>>, vector<16x32xbf16>,
    return
  }
  func.func @transform_0(%arg0: i32) -> (i32, i32) {
    %c0_i32 = arith.constant 0 : i32
    %c0_i32_0 = arith.constant 0 : i32
    return %arg0, %c0_i32 : i32, i32
  }
  func.func @transform_1(%arg0: i32) -> (i32, i32, i32) {
    %c0_i32 = arith.constant 0 : i32
    %c0_i32_0 = arith.constant 0 : i32
    %c0_i32_1 = arith.constant 0 : i32
    %c0_i32_2 = arith.constant 0 : i32
    return %c0_i32, %c0_i32_0, %c0_i32_1 : i32, i32, i32
  }
  func.func @transform_2(%arg0: i32) -> (i32, i32) {
    %c0_i32 = arith.constant 0 : i32
    %c0_i32_0 = arith.constant 0 : i32
    return %arg0, %c0_i32 : i32, i32
  }
  func.func @transform_3(%arg0: i32) -> (i32, i32) {
    %c0_i32 = arith.constant 0 : i32
    %c0_i32_0 = arith.constant 0 : i32
    %c0_i32_1 = arith.constant 0 : i32
    return %c0_i32, %c0_i32_0 : i32, i32
  }
  func.func @transform_4(%arg0: i32) -> (i32, i32) {
    %c0_i32 = arith.constant 0 : i32
    %c0_i32_0 = arith.constant 0 : i32
    %c0_i32_1 = arith.constant 0 : i32
    return %c0_i32, %c0_i32_0 : i32, i32
  }
  func.func @transform_5(%arg0: i32) -> (i32, i32) {
    %c0_i32 = arith.constant 0 : i32
    %c0_i32_0 = arith.constant 0 : i32
    %c0_i32_1 = arith.constant 0 : i32
    return %c0_i32, %c0_i32_0 : i32, i32
  }
  func.func @transform_6(%arg0: i32) -> (i32, i32) {
    %c0_i32 = arith.constant 0 : i32
    %c0_i32_0 = arith.constant 0 : i32
    %c0_i32_1 = arith.constant 0 : i32
    return %c0_i32, %c0_i32_0 : i32, i32
  }
  func.func @transform_7(%arg0: i32) -> (i32, i32) {
    %c0_i32 = arith.constant 0 : i32
    %c0_i32_0 = arith.constant 0 : i32
    return %arg0, %c0_i32 : i32, i32
  }
  func.func @transform_8(%arg0: i32) -> (i32, i32) {
    %c0_i32 = arith.constant 0 : i32
    %c0_i32_0 = arith.constant 0 : i32
    return %arg0, %c0_i32 : i32, i32
  }
  func.func @transform_9(%arg0: i32) -> (i32, i32) {
    %c0_i32 = arith.constant 0 : i32
    %c0_i32_0 = arith.constant 0 : i32
    return %arg0, %c0_i32 : i32, i32
  }
}

module attributes {stable_mosaic.version = 11 : i64} {
  func.func @outproj_residual_kernel(%arg0: i32, %arg1: memref<16x32xbf16, #tpu.memory_space<vmem>>, %arg2: memref<16x32xf32, #tpu.memory_space<vmem>>, %arg3: memref<32x32xbf16, #tpu.memory_space<vmem>>, %arg4: memref<1x32xf32, #tpu.memory_space<vmem>>, %arg5: memref<16x32xf32, #tpu.memory_space<vmem>>) attributes {dimension_semantics = [#tpu.dimension_semantics<parallel>], iteration_bounds = array<i64: 1>, scalar_prefetch = 0 : i64, scratch_operands = 0 : i64, tpu.core_type = #tpu.core_type<tc>, window_params = [{transform_indices = @transform_0, window_bounds = array<i64: 16, 32>}, {transform_indices = @transform_1, window_bounds = array<i64: 16, 32>}, {pipeline_mode = #tpu.pipeline_mode<synchronous>, transform_indices = @transform_2, window_bounds = array<i64: 32, 32>}, {pipeline_mode = #tpu.pipeline_mode<synchronous>, transform_indices = @transform_3, window_bounds = array<i64: 1, 32>}, {transform_indices = @transform_4, window_bounds = array<i64: 16, 32>}]} {
    %c0 = arith.constant 0 : index
    %c0_0 = arith.constant 0 : index
    %0 = vector.load %arg1[%c0, %c0_0] : memref<16x32xbf16, #tpu.memory_space<vmem>>, vector<16x32xbf16>
    %c0_1 = arith.constant 0 : index
    %c0_2 = arith.constant 0 : index
    %1 = vector.load %arg3[%c0_1, %c0_2] : memref<32x32xbf16, #tpu.memory_space<vmem>>, vector<32x32xbf16>
    %cst = arith.constant dense<0.000000e+00> : vector<16x32xf32>
    %2 = tpu.matmul %0, %1, %cst {dimension_numbers = #tpu.dot_dimension_numbers<[1], [0], [0], [1], [0, 0, 1, 1], [], []>} : vector<16x32xbf16>, vector<32x32xbf16>, vector<16x32xf32> -> vector<16x32xf32>
    %c0_3 = arith.constant 0 : index
    %c0_4 = arith.constant 0 : index
    %3 = vector.load %arg4[%c0_3, %c0_4] : memref<1x32xf32, #tpu.memory_space<vmem>>, vector<1x32xf32>
    %4 = vector.broadcast %3 : vector<1x32xf32> to vector<16x32xf32>
    %5 = arith.addf %2, %4 : vector<16x32xf32>
    %c0_5 = arith.constant 0 : index
    %c0_6 = arith.constant 0 : index
    %6 = vector.load %arg2[%c0_5, %c0_6] : memref<16x32xf32, #tpu.memory_space<vmem>>, vector<16x32xf32>
    %7 = arith.addf %5, %6 : vector<16x32xf32>
    %c0_7 = arith.constant 0 : index
    %c0_8 = arith.constant 0 : index
    %8 = vector.load %arg5[%c0_7, %c0_8] : memref<16x32xf32, #tpu.memory_space<vmem>>, vector<16x32xf32>
    tpu.vector_store %arg5[%c0_7, %c0_8], %7 {strides = array<i32>} : memref<16x32xf32, #tpu.memory_space<vmem>>, vector<16x32xf32>,
    return
  }
  func.func @transform_0(%arg0: i32) -> (i32, i32) {
    %c0_i32 = arith.constant 0 : i32
    %c0_i32_0 = arith.constant 0 : i32
    return %arg0, %c0_i32 : i32, i32
  }
  func.func @transform_1(%arg0: i32) -> (i32, i32) {
    %c0_i32 = arith.constant 0 : i32
    %c0_i32_0 = arith.constant 0 : i32
    return %arg0, %c0_i32 : i32, i32
  }
  func.func @transform_2(%arg0: i32) -> (i32, i32) {
    %c0_i32 = arith.constant 0 : i32
    %c0_i32_0 = arith.constant 0 : i32
    %c0_i32_1 = arith.constant 0 : i32
    return %c0_i32, %c0_i32_0 : i32, i32
  }
  func.func @transform_3(%arg0: i32) -> (i32, i32) {
    %c0_i32 = arith.constant 0 : i32
    %c0_i32_0 = arith.constant 0 : i32
    %c0_i32_1 = arith.constant 0 : i32
    return %c0_i32, %c0_i32_0 : i32, i32
  }
  func.func @transform_4(%arg0: i32) -> (i32, i32) {
    %c0_i32 = arith.constant 0 : i32
    %c0_i32_0 = arith.constant 0 : i32
    return %arg0, %c0_i32 : i32, i32
  }
}

module attributes {stable_mosaic.version = 11 : i64} {
  func.func @attn_core_kernel(%arg0: i32, %arg1: memref<1x8x32xbf16, #tpu.memory_space<vmem>>, %arg2: memref<1x8x32xbf16, #tpu.memory_space<vmem>>, %arg3: memref<1x8x32xbf16, #tpu.memory_space<vmem>>, %arg4: memref<1x8x32xbf16, #tpu.memory_space<vmem>>, %arg5: memref<1x8x8xf32, #tpu.memory_space<vmem>>) attributes {dimension_semantics = [#tpu.dimension_semantics<parallel>], iteration_bounds = array<i64: 2>, scalar_prefetch = 0 : i64, scratch_operands = 0 : i64, tpu.core_type = #tpu.core_type<tc>, window_params = [{transform_indices = @transform_0, window_bounds = array<i64: 1, 8, 32>}, {transform_indices = @transform_1, window_bounds = array<i64: 1, 8, 32>}, {transform_indices = @transform_2, window_bounds = array<i64: 1, 8, 32>}, {transform_indices = @transform_3, window_bounds = array<i64: 1, 8, 32>}, {transform_indices = @transform_4, window_bounds = array<i64: 1, 8, 8>}]} {
    %c0 = arith.constant 0 : index
    %c0_0 = arith.constant 0 : index
    %c0_1 = arith.constant 0 : index
    %0 = vector.load %arg1[%c0, %c0_0, %c0_1] : memref<1x8x32xbf16, #tpu.memory_space<vmem>>, vector<1x8x32xbf16>
    %1 = vector.shape_cast %0 : vector<1x8x32xbf16> to vector<8x32xbf16>
    %c0_2 = arith.constant 0 : index
    %c0_3 = arith.constant 0 : index
    %c0_4 = arith.constant 0 : index
    %2 = vector.load %arg2[%c0_2, %c0_3, %c0_4] : memref<1x8x32xbf16, #tpu.memory_space<vmem>>, vector<1x8x32xbf16>
    %3 = vector.shape_cast %2 : vector<1x8x32xbf16> to vector<8x32xbf16>
    %c0_5 = arith.constant 0 : index
    %c0_6 = arith.constant 0 : index
    %c0_7 = arith.constant 0 : index
    %4 = vector.load %arg3[%c0_5, %c0_6, %c0_7] : memref<1x8x32xbf16, #tpu.memory_space<vmem>>, vector<1x8x32xbf16>
    %5 = vector.shape_cast %4 : vector<1x8x32xbf16> to vector<8x32xbf16>
    %cst = arith.constant 0.000000e+00 : f32
    %6 = vector.broadcast %cst : f32 to vector<8x8xf32>
    %7 = vector.extract_strided_slice %1 {offsets = [0, 0], sizes = [8, 8], strides = [1, 1]} : vector<8x32xbf16> to vector<8x8xbf16>
    %8 = vector.extract_strided_slice %3 {offsets = [0, 0], sizes = [8, 8], strides = [1, 1]} : vector<8x32xbf16> to vector<8x8xbf16>
    "tpu.trace_start"() <{level = 10 : i32, message = "qd,kd->qk"}> : () -> ()
    %cst_8 = arith.constant dense<0.000000e+00> : vector<8x8xf32>
    %9 = tpu.matmul %7, %8, %cst_8 {dimension_numbers = #tpu.dot_dimension_numbers<[1], [1], [0], [0], [0, 0, 1, 0], [], []>} : vector<8x8xbf16>, vector<8x8xbf16>, vector<8x8xf32> -> vector<8x8xf32>
    "tpu.trace_stop"() : () -> ()
    %cst_9 = arith.constant 0.353553385 : f32
    %10 = vector.broadcast %cst_9 : f32 to vector<8x8xf32>
    %11 = arith.mulf %9, %10 : vector<8x8xf32>
    %cst_10 = arith.constant dense<0xFF800000> : vector<8xf32>
    %12 = vector.multi_reduction <maximumf>, %11, %cst_10 [1] : vector<8x8xf32> to vector<8xf32>
    %13 = vector.shape_cast %12 : vector<8xf32> to vector<8x1xf32>
    %14 = vector.broadcast %13 : vector<8x1xf32> to vector<8x8xf32>
    %15 = arith.subf %11, %14 : vector<8x8xf32>
    %16 = math.exp %15 : vector<8x8xf32>
    %cst_11 = arith.constant dense<0.000000e+00> : vector<8xf32>
    %17 = vector.multi_reduction <add>, %16, %cst_11 [1] : vector<8x8xf32> to vector<8xf32>
    %18 = vector.shape_cast %17 : vector<8xf32> to vector<8x1xf32>
    %19 = vector.broadcast %18 : vector<8x1xf32> to vector<8x8xf32>
    %20 = arith.divf %16, %19 : vector<8x8xf32>
    %21 = arith.truncf %20 : vector<8x8xf32> to vector<8x8xbf16>
    %22 = vector.extract_strided_slice %5 {offsets = [0, 0], sizes = [8, 8], strides = [1, 1]} : vector<8x32xbf16> to vector<8x8xbf16>
    %cst_12 = arith.constant dense<0.000000e+00> : vector<8x8xf32>
    %23 = tpu.matmul %21, %22, %cst_12 {dimension_numbers = #tpu.dot_dimension_numbers<[1], [0], [0], [1], [0, 0, 1, 1], [], []>} : vector<8x8xbf16>, vector<8x8xbf16>, vector<8x8xf32> -> vector<8x8xf32>
    %24 = arith.truncf %23 : vector<8x8xf32> to vector<8x8xbf16>
    %c0_13 = arith.constant 0 : index
    %c0_14 = arith.constant 0 : index
    %c0_15 = arith.constant 0 : index
    %25 = vector.load %arg4[%c0_13, %c0_14, %c0_15] : memref<1x8x32xbf16, #tpu.memory_space<vmem>>, vector<1x8x8xbf16>
    %26 = vector.shape_cast %25 : vector<1x8x8xbf16> to vector<8x8xbf16>
    %27 = vector.shape_cast %24 : vector<8x8xbf16> to vector<1x8x8xbf16>
    tpu.vector_store %arg4[%c0_13, %c0_14, %c0_15], %27 {strides = array<i32>} : memref<1x8x32xbf16, #tpu.memory_space<vmem>>, vector<1x8x8xbf16>,
    %28 = arith.addf %6, %20 : vector<8x8xf32>
    %29 = vector.extract_strided_slice %1 {offsets = [0, 8], sizes = [8, 8], strides = [1, 1]} : vector<8x32xbf16> to vector<8x8xbf16>
    %30 = vector.extract_strided_slice %3 {offsets = [0, 8], sizes = [8, 8], strides = [1, 1]} : vector<8x32xbf16> to vector<8x8xbf16>
    "tpu.trace_start"() <{level = 10 : i32, message = "qd,kd->qk"}> : () -> ()
    %cst_16 = arith.constant dense<0.000000e+00> : vector<8x8xf32>
    %31 = tpu.matmul %29, %30, %cst_16 {dimension_numbers = #tpu.dot_dimension_numbers<[1], [1], [0], [0], [0, 0, 1, 0], [], []>} : vector<8x8xbf16>, vector<8x8xbf16>, vector<8x8xf32> -> vector<8x8xf32>
    "tpu.trace_stop"() : () -> ()
    %cst_17 = arith.constant 0.353553385 : f32
    %32 = vector.broadcast %cst_17 : f32 to vector<8x8xf32>
    %33 = arith.mulf %31, %32 : vector<8x8xf32>
    %cst_18 = arith.constant dense<0xFF800000> : vector<8xf32>
    %34 = vector.multi_reduction <maximumf>, %33, %cst_18 [1] : vector<8x8xf32> to vector<8xf32>
    %35 = vector.shape_cast %34 : vector<8xf32> to vector<8x1xf32>
    %36 = vector.broadcast %35 : vector<8x1xf32> to vector<8x8xf32>
    %37 = arith.subf %33, %36 : vector<8x8xf32>
    %38 = math.exp %37 : vector<8x8xf32>
    %cst_19 = arith.constant dense<0.000000e+00> : vector<8xf32>
    %39 = vector.multi_reduction <add>, %38, %cst_19 [1] : vector<8x8xf32> to vector<8xf32>
    %40 = vector.shape_cast %39 : vector<8xf32> to vector<8x1xf32>
    %41 = vector.broadcast %40 : vector<8x1xf32> to vector<8x8xf32>
    %42 = arith.divf %38, %41 : vector<8x8xf32>
    %43 = arith.truncf %42 : vector<8x8xf32> to vector<8x8xbf16>
    %44 = vector.extract_strided_slice %5 {offsets = [0, 8], sizes = [8, 8], strides = [1, 1]} : vector<8x32xbf16> to vector<8x8xbf16>
    %cst_20 = arith.constant dense<0.000000e+00> : vector<8x8xf32>
    %45 = tpu.matmul %43, %44, %cst_20 {dimension_numbers = #tpu.dot_dimension_numbers<[1], [0], [0], [1], [0, 0, 1, 1], [], []>} : vector<8x8xbf16>, vector<8x8xbf16>, vector<8x8xf32> -> vector<8x8xf32>
    %46 = arith.truncf %45 : vector<8x8xf32> to vector<8x8xbf16>
    %c0_21 = arith.constant 0 : index
    %c0_22 = arith.constant 0 : index
    %c8 = arith.constant 8 : index
    %47 = vector.load %arg4[%c0_21, %c0_22, %c8] : memref<1x8x32xbf16, #tpu.memory_space<vmem>>, vector<1x8x8xbf16>
    %48 = vector.shape_cast %47 : vector<1x8x8xbf16> to vector<8x8xbf16>
    %49 = vector.shape_cast %46 : vector<8x8xbf16> to vector<1x8x8xbf16>
    tpu.vector_store %arg4[%c0_21, %c0_22, %c8], %49 {strides = array<i32>} : memref<1x8x32xbf16, #tpu.memory_space<vmem>>, vector<1x8x8xbf16>,
    %50 = arith.addf %28, %42 : vector<8x8xf32>
    %51 = vector.extract_strided_slice %1 {offsets = [0, 16], sizes = [8, 8], strides = [1, 1]} : vector<8x32xbf16> to vector<8x8xbf16>
    %52 = vector.extract_strided_slice %3 {offsets = [0, 16], sizes = [8, 8], strides = [1, 1]} : vector<8x32xbf16> to vector<8x8xbf16>
    "tpu.trace_start"() <{level = 10 : i32, message = "qd,kd->qk"}> : () -> ()
    %cst_23 = arith.constant dense<0.000000e+00> : vector<8x8xf32>
    %53 = tpu.matmul %51, %52, %cst_23 {dimension_numbers = #tpu.dot_dimension_numbers<[1], [1], [0], [0], [0, 0, 1, 0], [], []>} : vector<8x8xbf16>, vector<8x8xbf16>, vector<8x8xf32> -> vector<8x8xf32>
    "tpu.trace_stop"() : () -> ()
    %cst_24 = arith.constant 0.353553385 : f32
    %54 = vector.broadcast %cst_24 : f32 to vector<8x8xf32>
    %55 = arith.mulf %53, %54 : vector<8x8xf32>
    %cst_25 = arith.constant dense<0xFF800000> : vector<8xf32>
    %56 = vector.multi_reduction <maximumf>, %55, %cst_25 [1] : vector<8x8xf32> to vector<8xf32>
    %57 = vector.shape_cast %56 : vector<8xf32> to vector<8x1xf32>
    %58 = vector.broadcast %57 : vector<8x1xf32> to vector<8x8xf32>
    %59 = arith.subf %55, %58 : vector<8x8xf32>
    %60 = math.exp %59 : vector<8x8xf32>
    %cst_26 = arith.constant dense<0.000000e+00> : vector<8xf32>
    %61 = vector.multi_reduction <add>, %60, %cst_26 [1] : vector<8x8xf32> to vector<8xf32>
    %62 = vector.shape_cast %61 : vector<8xf32> to vector<8x1xf32>
    %63 = vector.broadcast %62 : vector<8x1xf32> to vector<8x8xf32>
    %64 = arith.divf %60, %63 : vector<8x8xf32>
    %65 = arith.truncf %64 : vector<8x8xf32> to vector<8x8xbf16>
    %66 = vector.extract_strided_slice %5 {offsets = [0, 16], sizes = [8, 8], strides = [1, 1]} : vector<8x32xbf16> to vector<8x8xbf16>
    %cst_27 = arith.constant dense<0.000000e+00> : vector<8x8xf32>
    %67 = tpu.matmul %65, %66, %cst_27 {dimension_numbers = #tpu.dot_dimension_numbers<[1], [0], [0], [1], [0, 0, 1, 1], [], []>} : vector<8x8xbf16>, vector<8x8xbf16>, vector<8x8xf32> -> vector<8x8xf32>
    %68 = arith.truncf %67 : vector<8x8xf32> to vector<8x8xbf16>
    %c0_28 = arith.constant 0 : index
    %c0_29 = arith.constant 0 : index
    %c16 = arith.constant 16 : index
    %69 = vector.load %arg4[%c0_28, %c0_29, %c16] : memref<1x8x32xbf16, #tpu.memory_space<vmem>>, vector<1x8x8xbf16>
    %70 = vector.shape_cast %69 : vector<1x8x8xbf16> to vector<8x8xbf16>
    %71 = vector.shape_cast %68 : vector<8x8xbf16> to vector<1x8x8xbf16>
    tpu.vector_store %arg4[%c0_28, %c0_29, %c16], %71 {strides = array<i32>} : memref<1x8x32xbf16, #tpu.memory_space<vmem>>, vector<1x8x8xbf16>,
    %72 = arith.addf %50, %64 : vector<8x8xf32>
    %73 = vector.extract_strided_slice %1 {offsets = [0, 24], sizes = [8, 8], strides = [1, 1]} : vector<8x32xbf16> to vector<8x8xbf16>
    %74 = vector.extract_strided_slice %3 {offsets = [0, 24], sizes = [8, 8], strides = [1, 1]} : vector<8x32xbf16> to vector<8x8xbf16>
    "tpu.trace_start"() <{level = 10 : i32, message = "qd,kd->qk"}> : () -> ()
    %cst_30 = arith.constant dense<0.000000e+00> : vector<8x8xf32>
    %75 = tpu.matmul %73, %74, %cst_30 {dimension_numbers = #tpu.dot_dimension_numbers<[1], [1], [0], [0], [0, 0, 1, 0], [], []>} : vector<8x8xbf16>, vector<8x8xbf16>, vector<8x8xf32> -> vector<8x8xf32>
    "tpu.trace_stop"() : () -> ()
    %cst_31 = arith.constant 0.353553385 : f32
    %76 = vector.broadcast %cst_31 : f32 to vector<8x8xf32>
    %77 = arith.mulf %75, %76 : vector<8x8xf32>
    %cst_32 = arith.constant dense<0xFF800000> : vector<8xf32>
    %78 = vector.multi_reduction <maximumf>, %77, %cst_32 [1] : vector<8x8xf32> to vector<8xf32>
    %79 = vector.shape_cast %78 : vector<8xf32> to vector<8x1xf32>
    %80 = vector.broadcast %79 : vector<8x1xf32> to vector<8x8xf32>
    %81 = arith.subf %77, %80 : vector<8x8xf32>
    %82 = math.exp %81 : vector<8x8xf32>
    %cst_33 = arith.constant dense<0.000000e+00> : vector<8xf32>
    %83 = vector.multi_reduction <add>, %82, %cst_33 [1] : vector<8x8xf32> to vector<8xf32>
    %84 = vector.shape_cast %83 : vector<8xf32> to vector<8x1xf32>
    %85 = vector.broadcast %84 : vector<8x1xf32> to vector<8x8xf32>
    %86 = arith.divf %82, %85 : vector<8x8xf32>
    %87 = arith.truncf %86 : vector<8x8xf32> to vector<8x8xbf16>
    %88 = vector.extract_strided_slice %5 {offsets = [0, 24], sizes = [8, 8], strides = [1, 1]} : vector<8x32xbf16> to vector<8x8xbf16>
    %cst_34 = arith.constant dense<0.000000e+00> : vector<8x8xf32>
    %89 = tpu.matmul %87, %88, %cst_34 {dimension_numbers = #tpu.dot_dimension_numbers<[1], [0], [0], [1], [0, 0, 1, 1], [], []>} : vector<8x8xbf16>, vector<8x8xbf16>, vector<8x8xf32> -> vector<8x8xf32>
    %90 = arith.truncf %89 : vector<8x8xf32> to vector<8x8xbf16>
    %c0_35 = arith.constant 0 : index
    %c0_36 = arith.constant 0 : index
    %c24 = arith.constant 24 : index
    %91 = vector.load %arg4[%c0_35, %c0_36, %c24] : memref<1x8x32xbf16, #tpu.memory_space<vmem>>, vector<1x8x8xbf16>
    %92 = vector.shape_cast %91 : vector<1x8x8xbf16> to vector<8x8xbf16>
    %93 = vector.shape_cast %90 : vector<8x8xbf16> to vector<1x8x8xbf16>
    tpu.vector_store %arg4[%c0_35, %c0_36, %c24], %93 {strides = array<i32>} : memref<1x8x32xbf16, #tpu.memory_space<vmem>>, vector<1x8x8xbf16>,
    %94 = arith.addf %72, %86 : vector<8x8xf32>
    %cst_37 = arith.constant 2.500000e-01 : f32
    %95 = vector.broadcast %cst_37 : f32 to vector<8x8xf32>
    %96 = arith.mulf %94, %95 : vector<8x8xf32>
    %c0_38 = arith.constant 0 : index
    %c0_39 = arith.constant 0 : index
    %c0_40 = arith.constant 0 : index
    %97 = vector.load %arg5[%c0_38, %c0_39, %c0_40] : memref<1x8x8xf32, #tpu.memory_space<vmem>>, vector<1x8x8xf32>
    %98 = vector.shape_cast %97 : vector<1x8x8xf32> to vector<8x8xf32>
    %99 = vector.shape_cast %96 : vector<8x8xf32> to vector<1x8x8xf32>
    tpu.vector_store %arg5[%c0_38, %c0_39, %c0_40], %99 {strides = array<i32>} : memref<1x8x8xf32, #tpu.memory_space<vmem>>, vector<1x8x8xf32>,
    return
  }
  func.func @transform_0(%arg0: i32) -> (i32, i32, i32) {
    %c0_i32 = arith.constant 0 : i32
    %c0_i32_0 = arith.constant 0 : i32
    %c0_i32_1 = arith.constant 0 : i32
    return %arg0, %c0_i32, %c0_i32_0 : i32, i32, i32
  }
  func.func @transform_1(%arg0: i32) -> (i32, i32, i32) {
    %c0_i32 = arith.constant 0 : i32
    %c0_i32_0 = arith.constant 0 : i32
    %c0_i32_1 = arith.constant 0 : i32
    return %arg0, %c0_i32, %c0_i32_0 : i32, i32, i32
  }
  func.func @transform_2(%arg0: i32) -> (i32, i32, i32) {
    %c0_i32 = arith.constant 0 : i32
    %c0_i32_0 = arith.constant 0 : i32
    %c0_i32_1 = arith.constant 0 : i32
    return %arg0, %c0_i32, %c0_i32_0 : i32, i32, i32
  }
  func.func @transform_3(%arg0: i32) -> (i32, i32, i32) {
    %c0_i32 = arith.constant 0 : i32
    %c0_i32_0 = arith.constant 0 : i32
    %c0_i32_1 = arith.constant 0 : i32
    return %arg0, %c0_i32, %c0_i32_0 : i32, i32, i32
  }
  func.func @transform_4(%arg0: i32) -> (i32, i32, i32) {
    %c0_i32 = arith.constant 0 : i32
    %c0_i32_0 = arith.constant 0 : i32
    %c0_i32_1 = arith.constant 0 : i32
    return %arg0, %c0_i32, %c0_i32_0 : i32, i32, i32
  }
}

module attributes {stable_mosaic.version = 11 : i64} {
  func.func @vocab_linear_kernel(%arg0: i32, %arg1: i32, %arg2: memref<16x32xf32, #tpu.memory_space<vmem>>, %arg3: memref<32x16xbf16, #tpu.memory_space<vmem>>, %arg4: memref<1x16xf32, #tpu.memory_space<vmem>>, %arg5: memref<16x16xf32, #tpu.memory_space<vmem>>) attributes {dimension_semantics = [#tpu.dimension_semantics<parallel>, #tpu.dimension_semantics<parallel>], iteration_bounds = array<i64: 1, 1>, scalar_prefetch = 0 : i64, scratch_operands = 0 : i64, tpu.core_type = #tpu.core_type<tc>, window_params = [{transform_indices = @transform_0, window_bounds = array<i64: 16, 32>}, {transform_indices = @transform_1, window_bounds = array<i64: 32, 16>}, {transform_indices = @transform_2, window_bounds = array<i64: 1, 16>}, {transform_indices = @transform_3, window_bounds = array<i64: 16, 16>}]} {
    %c0 = arith.constant 0 : index
    %c0_0 = arith.constant 0 : index
    %0 = vector.load %arg2[%c0, %c0_0] : memref<16x32xf32, #tpu.memory_space<vmem>>, vector<16x32xf32>
    %1 = arith.truncf %0 : vector<16x32xf32> to vector<16x32xbf16>
    %c0_1 = arith.constant 0 : index
    %c0_2 = arith.constant 0 : index
    %2 = vector.load %arg3[%c0_1, %c0_2] : memref<32x16xbf16, #tpu.memory_space<vmem>>, vector<32x16xbf16>
    %cst = arith.constant dense<0.000000e+00> : vector<16x16xf32>
    %3 = tpu.matmul %1, %2, %cst {dimension_numbers = #tpu.dot_dimension_numbers<[1], [0], [0], [1], [0, 0, 1, 1], [], []>} : vector<16x32xbf16>, vector<32x16xbf16>, vector<16x16xf32> -> vector<16x16xf32>
    %c0_3 = arith.constant 0 : index
    %c0_4 = arith.constant 0 : index
    %4 = vector.load %arg4[%c0_3, %c0_4] : memref<1x16xf32, #tpu.memory_space<vmem>>, vector<1x16xf32>
    %5 = vector.broadcast %4 : vector<1x16xf32> to vector<16x16xf32>
    %6 = arith.addf %3, %5 : vector<16x16xf32>
    %c0_5 = arith.constant 0 : index
    %c0_6 = arith.constant 0 : index
    %7 = vector.load %arg5[%c0_5, %c0_6] : memref<16x16xf32, #tpu.memory_space<vmem>>, vector<16x16xf32>
    tpu.vector_store %arg5[%c0_5, %c0_6], %6 {strides = array<i32>} : memref<16x16xf32, #tpu.memory_space<vmem>>, vector<16x16xf32>,
    return
  }
  func.func @transform_0(%arg0: i32, %arg1: i32) -> (i32, i32) {
    %c0_i32 = arith.constant 0 : i32
    %c0_i32_0 = arith.constant 0 : i32
    return %arg1, %c0_i32 : i32, i32
  }
  func.func @transform_1(%arg0: i32, %arg1: i32) -> (i32, i32) {
    %c0_i32 = arith.constant 0 : i32
    %c0_i32_0 = arith.constant 0 : i32
    return %c0_i32, %arg0 : i32, i32
  }
  func.func @transform_2(%arg0: i32, %arg1: i32) -> (i32, i32) {
    %c0_i32 = arith.constant 0 : i32
    %c0_i32_0 = arith.constant 0 : i32
    return %c0_i32, %arg0 : i32, i32
  }
  func.func @transform_3(%arg0: i32, %arg1: i32) -> (i32, i32) {
    %c0_i32 = arith.constant 0 : i32
    return %arg1, %arg0 : i32, i32
  }
}

</mosaic_0001>

<bundles_post_ra>
// kernel: cascade_forward.12
= control target key start
LH: loop header
LB: loop body
LE: loop exit
PB: predicated region body
PF: predicated region fallthrough
CT: control target
= control target key end

     0   :  { %s332_s0 = inlined_call_operand.vmem [shape: bf16[16,32], index: 0, kind: input, shape index: {}]   ;;  %s333_s1 = inlined_call_operand.<no memory space> [shape: f32[1,1], index: 1, kind: input, shape index: {}]   ;;  %s334_s2 = inlined_call_operand.vmem [shape: bf16[32,64], index: 2, kind: input, shape index: {}]   ;;  %s335_s3 = inlined_call_operand.vmem [shape: f32[1,64], index: 3, kind: input, shape index: {}]   ;;  %s336_s4 = inlined_call_operand.vmem [shape: bf16[16,32], index: 4, kind: output, shape index: {0}]   ;;  %s337_s5 = inlined_call_operand.hbm [shape: f32[1,1,1], index: 5, kind: output, shape index: {1}]  }
   0x1   :  { %v11_v0 = vstv %s333_s1 }
   0x2   :  { %12 = vst [vmem:[#allocation2] sm:$0x1] %v11_v0 }
   0x3   :  { %v261_v2 = vmov 0   ;;  %v225_v3 = vld [vmem:[%s334_s2] sm:$0xff]   ;;  %v262_v4 = vmov 0.0   ;;  %vm263_vm0 = vmmov 0  }
   0x4   :  { %224 = vset.pattern.permute.xlu0 %v261_v2  ;;  %209 = vmatprep.subr.bf16.mxu0 %v262_v4 }
   0x5   :  { %213 = vmatprep.mubr.msk.bf16.mxu0 %vm263_vm0, %v262_v4 }
   0x9   :  { %v191_v1 = vld [vmem:[#allocation2] ss:$0 sm:$0xff] }
   0xa   :  { %34 = vperm.xlu0 %224, %v191_v1  }
   0xb   :  { %13 = vsyncpa [#allocation4], 0  ;;  %210 = vmatpush3.bf16.msra.mxu0 %v225_v3  ;;  %v226_v5 = vld [vmem:[%s334_s2 + $0x8] sm:$0xff]   ;;  %v203_v7 = vld [vmem:[%s332_s0] sm:$0xff]   ;;  %vm63_vm1 = vcmask 261120   ;;  %s264_s0 = smov 96  }
   0xc   :  { %211 = vmatprep.subr.bf16.mxu0 %v262_v4  ;;  %v204_v8 = vunpack.c.l.bf16 %v203_v7  ;;  %v205_v9 = vunpack.c.h.bf16 %v203_v7  ;;  %v195_v21 = vld [vmem:[%s335_s3] ss:$0 sm:$0xff]  ;;  %vm151_vm2 = vcmask 257024   ;;  %s265_s29 = smov [#allocation3]   ;;  %vm171_vm3 = vcmask 0  }
   0xd   :  { %s181_s30 = sshll.u32 %s265_s29, 4  ;;  %s182_s30 = int_to_ptr.vmem [resolvable:$true] %s181_s30 }
   0xe   :  { %s241_s6 = scalar_lea.vmem %s182_s30, 32  ;;  %p242_p1 = scmp.lt.s32.totalorder %s182_s30, %s182_s30 }
   0xf   :  { %212 = vmatpush3.bf16.msra.mxu0 %v226_v5 }
  0x89   :  { %v35_v6 = vpop.permute.xlu0 %34 }
  0x8a   :  { %227 = vrcp.f32 %v35_v6 }
  0x94   :  { %v228_v10 = vpop.eup %227 }
  0x95   :  { %v38_v11 = vmul.f32 %v228_v10, %v204_v8  ;;  %v39_v12 = vmul.f32 %v228_v10, %v205_v9 }
  0x97   :  { %v217_v13 = vround.rtne.f32 %v38_v11  ;;  %v218_v14 = vround.rtne.f32 %v39_v12 }
  0x99   :  { %v42_v15 = vmax.f32 %v217_v13, -128.0  ;;  %v43_v16 = vmax.f32 %v218_v14, -128.0 }
  0x9b   :  { %v44_v17 = vmin.f32 %v42_v15, 127.0  ;;  %v45_v18 = vmin.f32 %v43_v16, 127.0 }
  0x9d   :  { %v46_v19 = vpack.c.bf16 %v45_v18, %v44_v17 }
  0x9f   :  { %214 = vmatmul.mubr.msk.bf16.vlgmr.msra.gmra.mrb[0].mxu0 %vm63_vm1, %v46_v19 }
 0x172   :  { %v101_v20 = vpop.f32.mrb[0].mxu0 }
 0x173   :  { %v108_v22 = vmul.f32 %v101_v20, %v35_v6  ;;  %v215_v23 = vpop.f32.mrb[1].mxu0 }
 0x174   :  { %v104_v24 = vpop.f32.mrb[2].mxu0 }
 0x175   :  { %v117_v25 = vadd.f32 %v195_v21, %v108_v22  ;;  %v109_v26 = vmul.f32 %v104_v24, %v35_v6  ;;  %v216_v27 = vpop.f32.mrb[3].mxu0 }
 0x177   :  { %v118_v28 = vadd.f32 %v195_v21, %v109_v26  ;;  %135 = vrot.lane.b32.xlu0 %v117_v25, %s264_s0  ;;  %v196_v29 = vmul.f32 -1.442695, %v117_v25 }
 0x179   :  { %137 = vrot.lane.b32.xlu1 %v118_v28, %s264_s0  ;;  %v197_v30 = vmul.f32 -1.442695, %v118_v28  ;;  %229 = vpow2.f32 %v196_v29 }
 0x17b   :  { %231 = vpow2.f32 %v197_v30 }
 0x183   :  { %v230_v31 = vpop.eup %229 }
 0x184   :  { %v125_v33 = vadd.f32 1.0, %v230_v31 }
 0x185   :  { %v232_v32 = vpop.eup %231 }
 0x186   :  { %v126_v34 = vadd.f32 1.0, %v232_v32  ;;  %233 = vrcp.f32 %v125_v33 }
 0x188   :  { %235 = vrcp.f32 %v126_v34 }
 0x190   :  { %v234_v35 = vpop.eup %233 }
 0x191   :  { %v131_v37 = vmul.f32 %v234_v35, %v117_v25 }
 0x192   :  { %v236_v36 = vpop.eup %235 }
 0x193   :  { %v132_v40 = vmul.f32 %v236_v36, %v118_v28 }
 0x1e9   :  { %v136_v38 = vpop.permute.xlu0 %135 }
 0x1ea   :  { %v141_v39 = vmul.f32 %v136_v38, %v131_v37 }
 0x1eb   :  { %v138_v41 = vpop.permute.xlu1 %137 }
 0x1ec   :  { %v200_v42 = vpack.c.bf16 %v141_v39, %v141_v39  ;;  %v142_v43 = vmul.f32 %v138_v41, %v132_v40 }
 0x1ee   :  { %152 = vst.msk [vmem:[%s336_s4] sm:$0xf] %vm151_vm2, %v200_v42  ;;  %v143_v44 = vpack.c.bf16 %v142_v43, %v141_v39  ;;  %v201_v45 = vpack.c.bf16 %v142_v43, %v142_v43 }
 0x1f0   :  { %153 = vst.msk [vmem:[%s336_s4 + $0x4] sm:$0xf] %vm151_vm2, %v201_v45  ;;  %v155_v46 = vunpack.c.h.bf16 %v143_v44  ;;  %v154_v47 = vunpack.c.l.bf16 %v143_v44  ;;  %s237_s4 = scalar_lea.vmem %s182_s30, 16 }
 0x1f1   :  { %p238_p0 = scmp.ne.s32.totalorder %s182_s30, %s237_s4  ;;  %p243_p2 = scmp.lt.s32.totalorder %s241_s6, %s237_s4 }
 0x1f2   :  { %v157_v48 = vand.u32 2147483647, %v155_v46  ;;  %v156_v49 = vand.u32 2147483647, %v154_v47 }
 0x1f3   :  { %p244_p3 = por %p243_p2, %p242_p1 }
 0x1f4   :  { %v161_v50 = vsel %vm63_vm1, %v157_v48, -inf  ;;  %v158_v51 = vsel %vm63_vm1, %v156_v49, -inf }
 0x1f5   :  { %162 = vmax.xlane.f32.xlu0 %v161_v50  ;;  %159 = vmax.xlane.f32.xlu1 %v158_v51  ;;  %p245_p4 = pnand %p244_p3, %p238_p0 }
 0x282   :  { %v163_v52 = vpop.xlane.xlu0 %162  ;;  %v160_v53 = vpop.xlane.xlu1 %159 }
 0x283   :  { %v164_v54 = vmax.f32 %v160_v53, %v163_v52 }
 0x285   :  { %v165_v55 = vrot.slane %v164_v54, 4 }
 0x287   :  { %v166_v56 = vmax.f32 %v164_v54, %v165_v55 }
 0x289   :  { %v167_v57 = vrot.slane %v166_v56, 2 }
 0x28b   :  { %v168_v58 = vmax.f32 %v166_v56, %v167_v57 }
 0x28d   :  { %v169_v59 = vrot.slane %v168_v58, 1 }
 0x28f   :  { %v170_v60 = vmax.f32 %v168_v58, %v169_v59 }
 0x291   :  { %172 = vst.msk [vmem:[#allocation3] sm:$0x1] %vm171_vm3, %v170_v60 }
 0x292   :  { %248 = shalt.err (!%p245_p4)
}
 0x293   :  { %s249_s9 = scalar_lea.hbm %s337_s5, 16 }
 0x294   :  { %p250_p5 = scmp.ne.s32.totalorder %s337_s5, %s249_s9  ;;  %p253_p6 = scmp.lt.u32.totalorder %s249_s9, %s337_s5 }
 0x296   :  { %p255_p7 = pnand %p253_p6, %p250_p5 }
 0x298   :  { %258 = shalt.err (!%p255_p7)
}
 0x299   :  { %184 = dma.vmem_to_hbm [thread:$0]  %s182_s30, 16, %s337_s5, [#allocation4]  }
 0x29a   :  { %259 = dma.done.wait [#allocation4], 16  }
 0x29b   :  { %260 = vsyncadd [#allocation4], 4294967280 }
 0x29c   :  { %190 = vsyncpa [#allocation4], 1 }

// kernel: cascade_forward.14
= control target key start
LH: loop header
LB: loop body
LE: loop exit
PB: predicated region body
PF: predicated region fallthrough
CT: control target
= control target key end

     0   :  { %v59_v0 = vmov 0   ;;  %v23_v2 = vlaneseq  ;;  %vm42_vm1 = vcmask 261120   ;;  %s87_s1 = inlined_call_operand.<no memory space> [shape: f32[1,1,1], index: 1, kind: input, shape index: {}]   ;;  %s88_s0 = inlined_call_operand.vmem [shape: bf16[16,32], index: 0, kind: input, shape index: {}]   ;;  %s89_s2 = inlined_call_operand.vmem [shape: f32[16,32], index: 2, kind: output, shape index: {}]  }
   0x1   :  { %56 = vset.pattern.permute.xlu0 %v59_v0  ;;  %v7_v1 = vstv %s87_s1  ;;  %v50_v10 = vld [vmem:[%s88_s0] sm:$0xff]  }
   0x2   :  { %8 = vst [vmem:[#allocation2] sm:$0x1] %v7_v1  ;;  %v24_v3 = vshrl.u32 %v23_v2, 7  ;;  %v51_v11 = vunpack.c.l.bf16 %v50_v10  ;;  %v52_v12 = vunpack.c.h.bf16 %v50_v10 }
   0x4   :  { %v25_v5 = vsub.s32 0, %v24_v3 }
   0x9   :  { %v13_v4 = vld [vmem:[#allocation2] sm:$0x1] }
   0xa   :  { %vm14_vm0 = vcmp.eq.f32.partialorder %v13_v4, 0.0  ;;  %v16_v6 = vmul.f32 0.007874016, %v13_v4 }
   0xc   :  { %v17_v7 = vsel %vm14_vm0, 1.0, %v16_v6 }
   0xd   :  { %v26_v8 = vrot.slane %v17_v7, %v25_v5 }
   0xf   :  { %28 = vperm.xlu0 %56, %v26_v8  }
  0x8e   :  { %v29_v9 = vpop.permute.xlu0 %28 }
  0x8f   :  { %57 = vrcp.f32 %v29_v9 }
  0x99   :  { %v58_v13 = vpop.eup %57 }
  0x9a   :  { %v32_v14 = vmul.f32 %v58_v13, %v51_v11  ;;  %v33_v15 = vmul.f32 %v58_v13, %v52_v12 }
  0x9c   :  { %v53_v16 = vround.rtne.f32 %v32_v14  ;;  %v54_v17 = vround.rtne.f32 %v33_v15 }
  0x9e   :  { %v36_v18 = vmax.f32 %v53_v16, -128.0  ;;  %v37_v19 = vmax.f32 %v54_v17, -128.0 }
  0xa0   :  { %v38_v20 = vmin.f32 %v36_v18, 127.0  ;;  %v39_v21 = vmin.f32 %v37_v19, 127.0 }
  0xa2   :  { %v40_v22 = vmul.f32 %v38_v20, %v29_v9  ;;  %v41_v23 = vmul.f32 %v39_v21, %v29_v9 }
  0xa4   :  { %43 = vst.msk [vmem:[%s89_s2] sm:$0xff] %vm42_vm1, %v40_v22  ;;  %44 = vst.msk [vmem:[%s89_s2 + $0x8] sm:$0xff] %vm42_vm1, %v41_v23 }

// kernel: cascade_forward.13
= control target key start
LH: loop header
LB: loop body
LE: loop exit
PB: predicated region body
PF: predicated region fallthrough
CT: control target
= control target key end

     0   :  { %s336_s0 = inlined_call_operand.vmem [shape: bf16[16,32], index: 0, kind: input, shape index: {}]   ;;  %s337_s1 = inlined_call_operand.<no memory space> [shape: f32[1,1,1], index: 1, kind: input, shape index: {}]   ;;  %s338_s2 = inlined_call_operand.vmem [shape: bf16[32,32], index: 2, kind: input, shape index: {}]   ;;  %s339_s3 = inlined_call_operand.vmem [shape: f32[1,32], index: 3, kind: input, shape index: {}]   ;;  %s340_s4 = inlined_call_operand.vmem [shape: bf16[16,32], index: 4, kind: output, shape index: {0}]   ;;  %s341_s5 = inlined_call_operand.hbm [shape: f32[1,1,1], index: 5, kind: output, shape index: {1}]  }
   0x1   :  { %v11_v0 = vstv %s337_s1 }
   0x2   :  { %12 = vst [vmem:[#allocation2] sm:$0x1] %v11_v0 }
   0x3   :  { %v33_v2 = vlaneseq  ;;  %v262_v3 = vmov 0  }
   0x4   :  { %229 = vset.pattern.permute.xlu0 %v262_v3 }
   0x5   :  { %v34_v5 = vshrl.u32 %v33_v2, 7 }
   0x9   :  { %v23_v1 = vld [vmem:[#allocation2] sm:$0x1] }
   0xa   :  { %vm24_vm0 = vcmp.eq.f32.partialorder %v23_v1, 0.0  ;;  %v26_v4 = vmul.f32 0.007874016, %v23_v1 }
   0xc   :  { %v27_v6 = vsel %vm24_vm0, 1.0, %v26_v4 }
   0xd   :  { %13 = vsyncpa [#allocation4], 0  ;;  %v35_v7 = vsub.s32 0, %v34_v5  ;;  %v230_v9 = vld [vmem:[%s338_s2] sm:$0xff]   ;;  %v263_v10 = vmov 0.0   ;;  %vm264_vm1 = vmmov 0  }
   0xe   :  { %215 = vmatprep.subr.bf16.mxu0 %v263_v10  ;;  %219 = vmatprep.mubr.msk.bf16.mxu0 %vm264_vm1, %v263_v10  ;;  %v231_v11 = vld [vmem:[%s338_s2 + $0x8] sm:$0xff]   ;;  %v209_v13 = vld [vmem:[%s336_s0] sm:$0xff]   ;;  %vm67_vm2 = vcmask 261120   ;;  %vm160_vm3 = vcmask 257024   ;;  %s265_s28 = smov [#allocation3]   ;;  %vm180_vm4 = vcmask 0  }
   0xf   :  { %v36_v8 = vrot.slane %v27_v6, %v35_v7  ;;  %216 = vmatpush3.bf16.msra.mxu0 %v230_v9  ;;  %v210_v14 = vunpack.c.l.bf16 %v209_v13  ;;  %v211_v15 = vunpack.c.h.bf16 %v209_v13  ;;  %v203_v27 = vld [vmem:[%s339_s3] ss:$0 sm:$0xff]  ;;  %s190_s29 = sshll.u32 %s265_s28, 4  ;;  %s191_s29 = int_to_ptr.vmem [resolvable:$true] %s190_s29 }
  0x10   :  { %217 = vmatprep.subr.bf16.mxu0 %v263_v10  ;;  %s242_s30 = scalar_lea.vmem %s191_s29, 32  ;;  %p243_p1 = scmp.lt.s32.totalorder %s191_s29, %s191_s29 }
  0x11   :  { %38 = vperm.xlu0 %229, %v36_v8  }
  0x13   :  { %218 = vmatpush3.bf16.msra.mxu0 %v231_v11 }
  0x90   :  { %v39_v12 = vpop.permute.xlu0 %38 }
  0x91   :  { %232 = vrcp.f32 %v39_v12 }
  0x9b   :  { %v233_v16 = vpop.eup %232 }
  0x9c   :  { %v42_v17 = vmul.f32 %v233_v16, %v210_v14  ;;  %v43_v18 = vmul.f32 %v233_v16, %v211_v15 }
  0x9e   :  { %v223_v19 = vround.rtne.f32 %v42_v17  ;;  %v224_v20 = vround.rtne.f32 %v43_v18 }
  0xa0   :  { %v46_v21 = vmax.f32 %v223_v19, -128.0  ;;  %v47_v22 = vmax.f32 %v224_v20, -128.0 }
  0xa2   :  { %v48_v23 = vmin.f32 %v46_v21, 127.0  ;;  %v49_v24 = vmin.f32 %v47_v22, 127.0 }
  0xa4   :  { %v50_v25 = vpack.c.bf16 %v49_v24, %v48_v23 }
  0xa6   :  { %220 = vmatmul.mubr.msk.bf16.vlgmr.msra.gmra.mrb[0].mxu0 %vm67_vm2, %v50_v25 }
 0x179   :  { %v105_v26 = vpop.f32.mrb[0].mxu0 }
 0x17a   :  { %v112_v28 = vmul.f32 %v105_v26, %v39_v12  ;;  %v221_v29 = vpop.f32.mrb[1].mxu0 }
 0x17b   :  { %v108_v30 = vpop.f32.mrb[2].mxu0 }
 0x17c   :  { %v113_v31 = vmul.f32 %v108_v30, %v39_v12  ;;  %v222_v32 = vpop.f32.mrb[3].mxu0  ;;  %v121_v33 = vadd.f32 %v203_v27, %v112_v28 }
 0x17e   :  { %v123_v34 = vsel %vm67_vm2, %v121_v33, 0.0  ;;  %v122_v35 = vadd.f32 %v203_v27, %v113_v31 }
 0x17f   :  { %124 = vadd.xlane.f32.xlu0 %v123_v34 }
 0x180   :  { %v126_v36 = vsel %vm67_vm2, %v122_v35, 0.0 }
 0x181   :  { %127 = vadd.xlane.f32.xlu1 %v126_v36 }
 0x20c   :  { %v125_v37 = vpop.xlane.xlu0 %124 }
 0x20d   :  { %v130_v38 = vmul.f32 0.03125, %v125_v37 }
 0x20e   :  { %v128_v39 = vpop.xlane.xlu1 %127 }
 0x20f   :  { %v132_v40 = vsub.f32 %v121_v33, %v130_v38  ;;  %v131_v41 = vmul.f32 0.03125, %v128_v39 }
 0x211   :  { %v133_v42 = vsub.f32 %v122_v35, %v131_v41  ;;  %v134_v43 = vmul.f32 %v132_v40, %v132_v40 }
 0x213   :  { %v136_v44 = vsel %vm67_vm2, %v134_v43, 0.0  ;;  %v135_v45 = vmul.f32 %v133_v42, %v133_v42 }
 0x214   :  { %137 = vadd.xlane.f32.xlu1 %v136_v44 }
 0x215   :  { %v139_v46 = vsel %vm67_vm2, %v135_v45, 0.0 }
 0x218   :  { %140 = vadd.xlane.f32.xlu1 %v139_v46 }
 0x2a1   :  { %v138_v47 = vpop.xlane.xlu1 %137 }
 0x2a2   :  { %v142_v48 = vmul.f32 0.03125, %v138_v47 }
 0x2a4   :  { %v144_v49 = vadd.f32 1e-08, %v142_v48 }
 0x2a5   :  { %v141_v50 = vpop.xlane.xlu1 %140 }
 0x2a6   :  { %v146_v51 = vmax.f32 %v144_v49, 1e-10  ;;  %v143_v52 = vmul.f32 0.03125, %v141_v50 }
 0x2a8   :  { %234 = vrsqrt.f32 %v146_v51  ;;  %v145_v53 = vadd.f32 1e-08, %v143_v52 }
 0x2aa   :  { %v147_v54 = vmax.f32 %v145_v53, 1e-10 }
 0x2ac   :  { %236 = vrsqrt.f32 %v147_v54 }
 0x2b2   :  { %v235_v55 = vpop.eup %234 }
 0x2b3   :  { %v150_v56 = vmul.f32 %v235_v55, %v132_v40 }
 0x2b5   :  { %v206_v57 = vpack.c.bf16 %v150_v56, %v150_v56 }
 0x2b6   :  { %v237_v58 = vpop.eup %236 }
 0x2b7   :  { %v151_v59 = vmul.f32 %v237_v58, %v133_v42  ;;  %161 = vst.msk [vmem:[%s340_s4] sm:$0xf] %vm160_vm3, %v206_v57 }
 0x2b9   :  { %v152_v60 = vpack.c.bf16 %v151_v59, %v150_v56  ;;  %v207_v61 = vpack.c.bf16 %v151_v59, %v151_v59 }
 0x2bb   :  { %162 = vst.msk [vmem:[%s340_s4 + $0x4] sm:$0xf] %vm160_vm3, %v207_v61  ;;  %v163_v62 = vunpack.c.l.bf16 %v152_v60  ;;  %v164_v63 = vunpack.c.h.bf16 %v152_v60  ;;  %s238_s4 = scalar_lea.vmem %s191_s29, 16 }
 0x2bc   :  { %p239_p0 = scmp.ne.s32.totalorder %s191_s29, %s238_s4  ;;  %p244_p2 = scmp.lt.s32.totalorder %s242_s30, %s238_s4 }
 0x2bd   :  { %v165_v0 = vand.u32 2147483647, %v163_v62  ;;  %v166_v2 = vand.u32 2147483647, %v164_v63 }
 0x2be   :  { %p245_p3 = por %p244_p2, %p243_p1 }
 0x2bf   :  { %v167_v1 = vsel %vm67_vm2, %v165_v0, -inf  ;;  %v170_v3 = vsel %vm67_vm2, %v166_v2, -inf }
 0x2c0   :  { %168 = vmax.xlane.f32.xlu1 %v167_v1  ;;  %p246_p4 = pnand %p245_p3, %p239_p0 }
 0x2c4   :  { %171 = vmax.xlane.f32.xlu1 %v170_v3 }
 0x34d   :  { %v169_v4 = vpop.xlane.xlu1 %168 }
 0x351   :  { %v172_v5 = vpop.xlane.xlu1 %171 }
 0x352   :  { %v173_v6 = vmax.f32 %v169_v4, %v172_v5 }
 0x354   :  { %v174_v7 = vrot.slane %v173_v6, 4 }
 0x356   :  { %v175_v8 = vmax.f32 %v173_v6, %v174_v7 }
 0x358   :  { %v176_v9 = vrot.slane %v175_v8, 2 }
 0x35a   :  { %v177_v10 = vmax.f32 %v175_v8, %v176_v9 }
 0x35c   :  { %v178_v11 = vrot.slane %v177_v10, 1 }
 0x35e   :  { %v179_v12 = vmax.f32 %v177_v10, %v178_v11 }
 0x360   :  { %181 = vst.msk [vmem:[#allocation3] sm:$0x1] %vm180_vm4, %v179_v12 }
 0x361   :  { %249 = shalt.err (!%p246_p4)
}
 0x362   :  { %s250_s8 = scalar_lea.hbm %s341_s5, 16 }
 0x363   :  { %p251_p5 = scmp.ne.s32.totalorder %s341_s5, %s250_s8  ;;  %p254_p6 = scmp.lt.u32.totalorder %s250_s8, %s341_s5 }
 0x365   :  { %p256_p7 = pnand %p254_p6, %p251_p5 }
 0x367   :  { %259 = shalt.err (!%p256_p7)
}
 0x368   :  { %193 = dma.vmem_to_hbm [thread:$0]  %s191_s29, 16, %s341_s5, [#allocation4]  }
 0x369   :  { %260 = dma.done.wait [#allocation4], 16  }
 0x36a   :  { %261 = vsyncadd [#allocation4], 4294967280 }
 0x36b   :  { %199 = vsyncpa [#allocation4], 1 }

// kernel: cascade_forward.20
= control target key start
LH: loop header
LB: loop body
LE: loop exit
PB: predicated region body
PF: predicated region fallthrough
CT: control target
= control target key end

     0   :  { %v124_v0 = vmov 0.0   ;;  %vm125_vm0 = vmmov 0   ;;  %vm48_vm1 = vcmask 261120   ;;  %s178_s2 = inlined_call_operand.vmem [shape: bf16[32,32], index: 2, kind: input, shape index: {}]   ;;  %s179_s0 = inlined_call_operand.vmem [shape: bf16[16,32], index: 0, kind: input, shape index: {}]   ;;  %s180_s3 = inlined_call_operand.vmem [shape: f32[1,32], index: 3, kind: input, shape index: {}]   ;;  %s181_s1 = inlined_call_operand.vmem [shape: f32[16,32], index: 1, kind: input, shape index: {}]   ;;  %s182_s4 = inlined_call_operand.vmem [shape: f32[16,32], index: 4, kind: output, shape index: {}]  }
   0x1   :  { %111 = vmatprep.subr.bf16.mxu0 %v124_v0  ;;  %v121_v1 = vld [vmem:[%s178_s2] sm:$0xff]   ;;  %115 = vmatprep.mubr.msk.bf16.mxu0 %vm125_vm0, %v124_v0  ;;  %v122_v2 = vld [vmem:[%s178_s2 + $0x8] sm:$0xff]  }
   0x2   :  { %112 = vmatpush3.bf16.msra.mxu0 %v121_v1  ;;  %v123_v3 = vld [vmem:[%s179_s0] sm:$0xff]   ;;  %v94_v10 = vld [vmem:[%s181_s1 + $0x8] sm:$0xff] }
   0x3   :  { %113 = vmatprep.subr.bf16.mxu0 %v124_v0  ;;  %v103_v4 = vld [vmem:[%s180_s3] ss:$0 sm:$0xff] }
   0x4   :  { %v93_v6 = vld [vmem:[%s181_s1] sm:$0xff] }
   0x6   :  { %114 = vmatpush3.bf16.msra.mxu0 %v122_v2 }
   0x9   :  { %116 = vmatmul.mubr.msk.bf16.vlgmr.msra.gmra.mrb[0].mxu0 %vm48_vm1, %v123_v3 }
  0xdc   :  { %v86_v5 = vpop.f32.mrb[0].mxu0 }
  0xdd   :  { %v87_v7 = vadd.f32 %v103_v4, %v86_v5  ;;  %v117_v8 = vpop.f32.mrb[1].mxu0 }
  0xde   :  { %v89_v9 = vpop.f32.mrb[2].mxu0 }
  0xdf   :  { %v95_v11 = vadd.f32 %v93_v6, %v87_v7  ;;  %v90_v12 = vadd.f32 %v103_v4, %v89_v9  ;;  %v118_v13 = vpop.f32.mrb[3].mxu0 }
  0xe1   :  { %97 = vst.msk [vmem:[%s182_s4] sm:$0xff] %vm48_vm1, %v95_v11  ;;  %v96_v14 = vadd.f32 %v94_v10, %v90_v12 }
  0xe3   :  { %98 = vst.msk [vmem:[%s182_s4 + $0x8] sm:$0xff] %vm48_vm1, %v96_v14 }

// kernel: cascade_forward.11
= control target key start
LH: loop header
LB: loop body
LE: loop exit
PB: predicated region body
PF: predicated region fallthrough
CT: control target
= control target key end

     0   :  { %vm22_vm0 = vcmask 254976   ;;  %s1683_s0 = inlined_call_operand.vmem [shape: f32[8,2,32], index: 0, kind: input, shape index: {}]   ;;  %s1684_s1 = inlined_call_operand.vmem [shape: bf16[32,96], index: 1, kind: input, shape index: {}]   ;;  %s1685_s2 = inlined_call_operand.vmem [shape: f32[1,96], index: 2, kind: input, shape index: {}]   ;;  %s1686_s3 = inlined_call_operand.vmem [shape: bf16[8,2,32], index: 3, kind: output, shape index: {0}]   ;;  %s1687_s4 = inlined_call_operand.hbm [shape: f32[1,1], index: 4, kind: output, shape index: {1}]  }
   0x1   :  { %v26_v0 = vld [vmem:[%s1683_s0] sm:$0x3]  ;;  %v28_v1 = vld [vmem:[%s1683_s0 + $0x4] sm:$0x3]  ;;  %v27_v4 = vld [vmem:[%s1683_s0 + $0x2] sm:$0x3] }
   0x2   :  { %v35_v2 = vsel %vm22_vm0, %v26_v0, 0.0  ;;  %v41_v3 = vsel %vm22_vm0, %v28_v1, 0.0  ;;  %v29_v5 = vld [vmem:[%s1683_s0 + $0x6] sm:$0x3]  ;;  %v38_v6 = vsel %vm22_vm0, %v27_v4, 0.0 }
   0x3   :  { %36 = vadd.xlane.f32.xlu0 %v35_v2  ;;  %42 = vadd.xlane.f32.xlu1 %v41_v3  ;;  %v44_v7 = vsel %vm22_vm0, %v29_v5, 0.0  ;;  %v30_v8 = vld [vmem:[%s1683_s0 + $0x8] sm:$0x3]  ;;  %v31_v9 = vld [vmem:[%s1683_s0 + $0xa] sm:$0x3] }
   0x4   :  { %10 = vsyncpa [#allocation8], 0  ;;  %v47_v10 = vsel %vm22_vm0, %v30_v8, 0.0  ;;  %v50_v11 = vsel %vm22_vm0, %v31_v9, 0.0  ;;  %v32_v12 = vld [vmem:[%s1683_s0 + $0xc] sm:$0x3] }
   0x5   :  { %v33_v13 = vld [vmem:[%s1683_s0 + $0xe] sm:$0x3]  ;;  %v53_v14 = vsel %vm22_vm0, %v32_v12, 0.0  ;;  %vm1259_vm1 = vmmov 0   ;;  %vm180_vm2 = vcmask 1041408   ;;  %vm383_vm11 = vcmask 261120  }
   0x6   :  { %v56_v15 = vsel %vm22_vm0, %v33_v13, 0.0  ;;  %s1263_s9 = smov 96   ;;  %vm776_vm12 = vcmask 253952   ;;  %vm24_vm13 = vcmask 0  }
   0x7   :  { %39 = vadd.xlane.f32.xlu0 %v38_v6  ;;  %45 = vadd.xlane.f32.xlu1 %v44_v7 }
   0xb   :  { %48 = vadd.xlane.f32.xlu0 %v47_v10  ;;  %51 = vadd.xlane.f32.xlu1 %v50_v11 }
   0xf   :  { %54 = vadd.xlane.f32.xlu0 %v53_v14  ;;  %57 = vadd.xlane.f32.xlu1 %v56_v15 }
  0x90   :  { %v37_v16 = vpop.xlane.xlu0 %36  ;;  %v43_v17 = vpop.xlane.xlu1 %42 }
  0x91   :  { %v60_v18 = vmul.f32 0.03125, %v37_v16  ;;  %v62_v19 = vmul.f32 0.03125, %v43_v17 }
  0x93   :  { %v1322_v20 = vsub.f32 %v26_v0, %v60_v18  ;;  %v1324_v21 = vsub.f32 %v28_v1, %v62_v19 }
  0x94   :  { %v40_v22 = vpop.xlane.xlu0 %39  ;;  %v46_v23 = vpop.xlane.xlu1 %45 }
  0x95   :  { %v61_v24 = vmul.f32 0.03125, %v40_v22  ;;  %v63_v25 = vmul.f32 0.03125, %v46_v23  ;;  %v76_v26 = vmul.f32 %v1322_v20, %v1322_v20  ;;  %v78_v27 = vmul.f32 %v1324_v21, %v1324_v21 }
  0x97   :  { %v1330_v28 = vsub.f32 %v27_v4, %v61_v24  ;;  %v1332_v29 = vsub.f32 %v29_v5, %v63_v25  ;;  %v84_v30 = vsel %vm22_vm0, %v76_v26, 0.0  ;;  %v90_v33 = vsel %vm22_vm0, %v78_v27, 0.0 }
  0x98   :  { %85 = vadd.xlane.f32.xlu0 %v84_v30  ;;  %v49_v31 = vpop.xlane.xlu0 %48  ;;  %v52_v32 = vpop.xlane.xlu1 %51 }
  0x99   :  { %v64_v34 = vmul.f32 0.03125, %v49_v31  ;;  %v65_v35 = vmul.f32 0.03125, %v52_v32  ;;  %v77_v36 = vmul.f32 %v1330_v28, %v1330_v28  ;;  %v79_v37 = vmul.f32 %v1332_v29, %v1332_v29 }
  0x9b   :  { %v1340_v38 = vsub.f32 %v30_v8, %v64_v34  ;;  %v1342_v39 = vsub.f32 %v31_v9, %v65_v35  ;;  %v87_v40 = vsel %vm22_vm0, %v77_v36, 0.0  ;;  %v93_v43 = vsel %vm22_vm0, %v79_v37, 0.0 }
  0x9c   :  { %91 = vadd.xlane.f32.xlu0 %v90_v33  ;;  %88 = vadd.xlane.f32.xlu1 %v87_v40  ;;  %v55_v41 = vpop.xlane.xlu0 %54  ;;  %v58_v42 = vpop.xlane.xlu1 %57 }
  0x9d   :  { %v66_v44 = vmul.f32 0.03125, %v55_v41  ;;  %v67_v45 = vmul.f32 0.03125, %v58_v42  ;;  %v80_v46 = vmul.f32 %v1340_v38, %v1340_v38  ;;  %v81_v47 = vmul.f32 %v1342_v39, %v1342_v39 }
  0x9f   :  { %v1350_v48 = vsub.f32 %v32_v12, %v66_v44  ;;  %v1352_v49 = vsub.f32 %v33_v13, %v67_v45  ;;  %v96_v50 = vsel %vm22_vm0, %v80_v46, 0.0  ;;  %v99_v51 = vsel %vm22_vm0, %v81_v47, 0.0 }
  0xa0   :  { %94 = vadd.xlane.f32.xlu1 %v93_v43  ;;  %97 = vadd.xlane.f32.xlu0 %v96_v50 }
  0xa1   :  { %v82_v52 = vmul.f32 %v1350_v48, %v1350_v48  ;;  %v83_v53 = vmul.f32 %v1352_v49, %v1352_v49 }
  0xa3   :  { %v102_v54 = vsel %vm22_vm0, %v82_v52, 0.0  ;;  %v105_v55 = vsel %vm22_vm0, %v83_v53, 0.0 }
  0xa4   :  { %100 = vadd.xlane.f32.xlu1 %v99_v51  ;;  %103 = vadd.xlane.f32.xlu0 %v102_v54 }
  0xa8   :  { %106 = vadd.xlane.f32.xlu1 %v105_v55 }
 0x125   :  { %v86_v56 = vpop.xlane.xlu0 %85 }
 0x126   :  { %v108_v57 = vmul.f32 0.03125, %v86_v56 }
 0x128   :  { %v116_v58 = vadd.f32 1e-08, %v108_v57  ;;  %v1152_v57 = vld [vmem:[%s1684_s1] sm:$0xff]  }
 0x129   :  { %v89_v59 = vpop.xlane.xlu1 %88  ;;  %v92_v60 = vpop.xlane.xlu0 %91 }
 0x12a   :  { %v124_v61 = vmax.f32 %v116_v58, 1e-10  ;;  %v109_v62 = vmul.f32 0.03125, %v89_v59  ;;  %v110_v63 = vmul.f32 0.03125, %v92_v60  ;;  %v1258_v58 = vmov 0.0  }
 0x12b   :  { %23 = vst.msk [vmem:[#allocation2] sm:$0x3] %vm22_vm0, %v1258_v58  ;;  %1129 = vmatprep.subr.bf16.mxu0 %v1258_v58  ;;  %1133 = vmatprep.mubr.msk.bf16.mxu0 %vm1259_vm1, %v1258_v58 }
 0x12c   :  { %1154 = vrsqrt.f32 %v124_v61  ;;  %v117_v0 = vadd.f32 1e-08, %v109_v62  ;;  %v118_v1 = vadd.f32 1e-08, %v110_v63  ;;  %1130 = vmatpush3.bf16.msra.mxu0 %v1152_v57  ;;  %25 = vst.msk [vmem:[#allocation6] sm:$0x1] %vm24_vm13, %v1258_v58 }
 0x12d   :  { %v95_v2 = vpop.xlane.xlu1 %94  ;;  %v98_v3 = vpop.xlane.xlu0 %97  ;;  %1131 = vmatprep.subr.bf16.mxu0 %v1258_v58 }
 0x12e   :  { %v125_v4 = vmax.f32 %v117_v0, 1e-10  ;;  %v126_v5 = vmax.f32 %v118_v1, 1e-10  ;;  %v111_v6 = vmul.f32 0.03125, %v95_v2  ;;  %v112_v7 = vmul.f32 0.03125, %v98_v3 }
 0x130   :  { %1156 = vrsqrt.f32 %v125_v4  ;;  %v119_v8 = vadd.f32 1e-08, %v111_v6  ;;  %v120_v9 = vadd.f32 1e-08, %v112_v7 }
 0x131   :  { %1158 = vrsqrt.f32 %v126_v5  ;;  %v101_v10 = vpop.xlane.xlu1 %100  ;;  %v104_v11 = vpop.xlane.xlu0 %103 }
 0x132   :  { %v127_v12 = vmax.f32 %v119_v8, 1e-10  ;;  %v128_v13 = vmax.f32 %v120_v9, 1e-10  ;;  %v113_v14 = vmul.f32 0.03125, %v101_v10  ;;  %v114_v15 = vmul.f32 0.03125, %v104_v11 }
 0x134   :  { %1160 = vrsqrt.f32 %v127_v12  ;;  %v121_v16 = vadd.f32 1e-08, %v113_v14  ;;  %v122_v17 = vadd.f32 1e-08, %v114_v15 }
 0x135   :  { %1162 = vrsqrt.f32 %v128_v13  ;;  %v107_v18 = vpop.xlane.xlu1 %106 }
 0x136   :  { %v1155_v19 = vpop.eup %1154  ;;  %v129_v22 = vmax.f32 %v121_v16, 1e-10  ;;  %v130_v23 = vmax.f32 %v122_v17, 1e-10  ;;  %v115_v24 = vmul.f32 0.03125, %v107_v18 }
 0x137   :  { %v1363_v25 = vmul.f32 %v1155_v19, %v1322_v20 }
 0x138   :  { %1164 = vrsqrt.f32 %v129_v22  ;;  %v123_v26 = vadd.f32 1e-08, %v115_v24 }
 0x139   :  { %1166 = vrsqrt.f32 %v130_v23  ;;  %v148_v27 = vand.u32 2147483647, %v1363_v25 }
 0x13a   :  { %v1157_v30 = vpop.eup %1156  ;;  %v131_v31 = vmax.f32 %v123_v26, 1e-10 }
 0x13b   :  { %v1159_v32 = vpop.eup %1158  ;;  %v156_v33 = vsel %vm22_vm0, %v148_v27, -inf  ;;  %v1368_v34 = vmul.f32 %v1157_v30, %v1330_v28 }
 0x13c   :  { %1168 = vrsqrt.f32 %v131_v31  ;;  %157 = vmax.xlane.f32.xlu0 %v156_v33  ;;  %v1371_v35 = vmul.f32 %v1159_v32, %v1324_v21 }
 0x13d   :  { %v149_v20 = vand.u32 2147483647, %v1368_v34 }
 0x13e   :  { %v1161_v36 = vpop.eup %1160  ;;  %v150_v37 = vand.u32 2147483647, %v1371_v35 }
 0x13f   :  { %v1163_v40 = vpop.eup %1162  ;;  %v159_v41 = vsel %vm22_vm0, %v149_v20, -inf  ;;  %v1377_v42 = vmul.f32 %v1161_v36, %v1332_v29 }
 0x140   :  { %160 = vmax.xlane.f32.xlu1 %v159_v41  ;;  %v162_v28 = vsel %vm22_vm0, %v150_v37, -inf  ;;  %v1381_v43 = vmul.f32 %v1163_v40, %v1340_v38 }
 0x141   :  { %163 = vmax.xlane.f32.xlu0 %v162_v28  ;;  %v151_v21 = vand.u32 2147483647, %v1377_v42 }
 0x142   :  { %v1165_v44 = vpop.eup %1164  ;;  %v152_v45 = vand.u32 2147483647, %v1381_v43 }
 0x143   :  { %v1167_v46 = vpop.eup %1166  ;;  %v165_v47 = vsel %vm22_vm0, %v151_v21, -inf  ;;  %v1387_v50 = vmul.f32 %v1165_v44, %v1342_v39 }
 0x144   :  { %166 = vmax.xlane.f32.xlu1 %v165_v47  ;;  %v168_v29 = vsel %vm22_vm0, %v152_v45, -inf  ;;  %v1391_v51 = vmul.f32 %v1167_v46, %v1350_v48 }
 0x145   :  { %169 = vmax.xlane.f32.xlu0 %v168_v29  ;;  %v153_v38 = vand.u32 2147483647, %v1387_v50 }
 0x146   :  { %v1169_v52 = vpop.eup %1168  ;;  %v154_v53 = vand.u32 2147483647, %v1391_v51 }
 0x147   :  { %v171_v54 = vsel %vm22_vm0, %v153_v38, -inf  ;;  %v1397_v55 = vmul.f32 %v1169_v52, %v1352_v49  ;;  %v1153_v49 = vld [vmem:[%s1684_s1 + $0x8] sm:$0xff]  }
 0x148   :  { %172 = vmax.xlane.f32.xlu1 %v171_v54  ;;  %v174_v39 = vsel %vm22_vm0, %v154_v53, -inf  ;;  %1132 = vmatpush3.bf16.msra.mxu0 %v1153_v49 }
 0x149   :  { %175 = vmax.xlane.f32.xlu0 %v174_v39  ;;  %v155_v56 = vand.u32 2147483647, %v1397_v55 }
 0x14b   :  { %v177_v48 = vsel %vm22_vm0, %v155_v56, -inf }
 0x14c   :  { %178 = vmax.xlane.f32.xlu1 %v177_v48 }
 0x1c9   :  { %v158_v59 = vpop.xlane.xlu0 %157 }
 0x1ca   :  { %v181_v60 = vsel %vm180_vm2, %v158_v59, -inf }
 0x1cb   :  { %v182_v61 = vrot.slane %v181_v60, 4 }
 0x1cd   :  { %v183_v62 = vmax.f32 %v181_v60, %v182_v61  ;;  %v161_v63 = vpop.xlane.xlu1 %160 }
 0x1ce   :  { %v188_v0 = vsel %vm180_vm2, %v161_v63, -inf  ;;  %v164_v1 = vpop.xlane.xlu0 %163 }
 0x1cf   :  { %v184_v2 = vrot.slane %v183_v62, 2  ;;  %v189_v3 = vrot.slane %v188_v0, 4  ;;  %v195_v4 = vsel %vm180_vm2, %v164_v1, -inf }
 0x1d0   :  { %v196_v5 = vrot.slane %v195_v4, 4 }
 0x1d1   :  { %v185_v6 = vmax.f32 %v183_v62, %v184_v2  ;;  %v190_v7 = vmax.f32 %v188_v0, %v189_v3  ;;  %v167_v8 = vpop.xlane.xlu1 %166 }
 0x1d2   :  { %v197_v9 = vmax.f32 %v195_v4, %v196_v5  ;;  %v202_v10 = vsel %vm180_vm2, %v167_v8, -inf  ;;  %v170_v11 = vpop.xlane.xlu0 %169 }
 0x1d3   :  { %v186_v12 = vrot.slane %v185_v6, 1  ;;  %v191_v13 = vrot.slane %v190_v7, 2  ;;  %v203_v14 = vrot.slane %v202_v10, 4  ;;  %v209_v15 = vsel %vm180_vm2, %v170_v11, -inf }
 0x1d4   :  { %v198_v16 = vrot.slane %v197_v9, 2  ;;  %v210_v17 = vrot.slane %v209_v15, 4 }
 0x1d5   :  { %v187_v18 = vmax.f32 %v185_v6, %v186_v12  ;;  %v192_v19 = vmax.f32 %v190_v7, %v191_v13  ;;  %v204_v22 = vmax.f32 %v202_v10, %v203_v14  ;;  %v173_v23 = vpop.xlane.xlu1 %172 }
 0x1d6   :  { %v199_v24 = vmax.f32 %v197_v9, %v198_v16  ;;  %v211_v26 = vmax.f32 %v209_v15, %v210_v17  ;;  %v216_v27 = vsel %vm180_vm2, %v173_v23, -inf  ;;  %v176_v30 = vpop.xlane.xlu0 %175 }
 0x1d7   :  { %vm237_vm3 = vcmp.eq.f32.partialorder %v187_v18, 0.0  ;;  %v246_v31 = vmul.f32 0.007874016, %v187_v18  ;;  %v193_v32 = vrot.slane %v192_v19, 1  ;;  %v205_v33 = vrot.slane %v204_v22, 2 }
 0x1d8   :  { %v200_v20 = vrot.slane %v199_v24, 1  ;;  %v212_v36 = vrot.slane %v211_v26, 2  ;;  %v217_v37 = vrot.slane %v216_v27, 4  ;;  %v223_v40 = vsel %vm180_vm2, %v176_v30, -inf }
 0x1d9   :  { %v194_v41 = vmax.f32 %v192_v19, %v193_v32  ;;  %v206_v28 = vmax.f32 %v204_v22, %v205_v33  ;;  %v224_v21 = vrot.slane %v223_v40, 4  ;;  %v1420_v44 = vsel %vm237_vm3, 1.0, %v246_v31  ;;  %v179_v29 = vpop.xlane.xlu1 %178 }
 0x1da   :  { %v201_v45 = vmax.f32 %v199_v24, %v200_v20  ;;  %v213_v46 = vmax.f32 %v211_v26, %v212_v36  ;;  %v218_v47 = vmax.f32 %v216_v27, %v217_v37  ;;  %v230_v59 = vsel %vm180_vm2, %v179_v29, -inf }
 0x1db   :  { %vm238_vm4 = vcmp.eq.f32.partialorder %v194_v41, 0.0  ;;  %v247_v38 = vmul.f32 0.007874016, %v194_v41  ;;  %v207_v52 = vrot.slane %v206_v28, 1  ;;  %v225_v53 = vmax.f32 %v223_v40, %v224_v21 }
 0x1dc   :  { %vm239_vm5 = vcmp.eq.f32.partialorder %v201_v45, 0.0  ;;  %v248_v54 = vmul.f32 0.007874016, %v201_v45  ;;  %v214_v39 = vrot.slane %v213_v46, 1  ;;  %v219_v56 = vrot.slane %v218_v47, 2 }
 0x1dd   :  { %v1422_v48 = vsel %vm238_vm4, 1.0, %v247_v38  ;;  %v208_v57 = vmax.f32 %v206_v28, %v207_v52  ;;  %v226_v49 = vrot.slane %v225_v53, 2  ;;  %1170 = vrcp.f32 %v1420_v44 }
 0x1de   :  { %v1426_v60 = vsel %vm239_vm5, 1.0, %v248_v54  ;;  %v215_v61 = vmax.f32 %v213_v46, %v214_v39  ;;  %v220_v62 = vmax.f32 %v218_v47, %v219_v56  ;;  %1172 = vrcp.f32 %v1422_v48 }
 0x1df   :  { %vm240_vm6 = vcmp.eq.f32.partialorder %v208_v57, 0.0  ;;  %v249_v63 = vmul.f32 0.007874016, %v208_v57  ;;  %v227_v0 = vmax.f32 %v225_v53, %v226_v49  ;;  %v231_v3 = vrot.slane %v230_v59, 4 }
 0x1e0   :  { %vm241_vm7 = vcmp.eq.f32.partialorder %v215_v61, 0.0  ;;  %v250_v1 = vmul.f32 0.007874016, %v215_v61  ;;  %v221_v2 = vrot.slane %v220_v62, 1  ;;  %1174 = vrcp.f32 %v1426_v60 }
 0x1e1   :  { %v1430_v4 = vsel %vm240_vm6, 1.0, %v249_v63  ;;  %v228_v5 = vrot.slane %v227_v0, 1  ;;  %v232_v8 = vmax.f32 %v230_v59, %v231_v3  ;;  %v329_v29 = vlaneseq }
 0x1e2   :  { %1176 = vrcp.f32 %v1430_v4  ;;  %v1433_v6 = vsel %vm241_vm7, 1.0, %v250_v1  ;;  %v222_v7 = vmax.f32 %v220_v62, %v221_v2 }
 0x1e3   :  { %v229_v9 = vmax.f32 %v227_v0, %v228_v5  ;;  %v233_v11 = vrot.slane %v232_v8, 2  ;;  %1178 = vrcp.f32 %v1433_v6 }
 0x1e4   :  { %vm242_vm8 = vcmp.eq.f32.partialorder %v222_v7, 0.0  ;;  %v251_v10 = vmul.f32 0.007874016, %v222_v7 }
 0x1e5   :  { %vm243_vm9 = vcmp.eq.f32.partialorder %v229_v9, 0.0  ;;  %v252_v12 = vmul.f32 0.007874016, %v229_v9  ;;  %v234_v14 = vmax.f32 %v232_v8, %v233_v11 }
 0x1e6   :  { %v1436_v13 = vsel %vm242_vm8, 1.0, %v251_v10 }
 0x1e7   :  { %1180 = vrcp.f32 %v1436_v13  ;;  %v1439_v15 = vsel %vm243_vm9, 1.0, %v252_v12  ;;  %v1171_v16 = vpop.eup %1170  ;;  %v235_v17 = vrot.slane %v234_v14, 1 }
 0x1e8   :  { %1182 = vrcp.f32 %v1439_v15  ;;  %v1173_v18 = vpop.eup %1172  ;;  %v263_v33 = vmul.f32 %v1171_v16, %v1363_v25 }
 0x1e9   :  { %v236_v19 = vmax.f32 %v234_v14, %v235_v17  ;;  %v265_v30 = vmul.f32 %v1173_v18, %v1368_v34 }
 0x1ea   :  { %v1175_v22 = vpop.eup %1174  ;;  %v1137_v21 = vround.rtne.f32 %v263_v33 }
 0x1eb   :  { %vm244_vm10 = vcmp.eq.f32.partialorder %v236_v19, 0.0  ;;  %v253_v24 = vmul.f32 0.007874016, %v236_v19  ;;  %v267_v31 = vmul.f32 %v1175_v22, %v1371_v35  ;;  %v1138_v28 = vround.rtne.f32 %v265_v30 }
 0x1ec   :  { %v1177_v23 = vpop.eup %1176  ;;  %v1260_v35 = vmov 1966171168   ;;  %v286_v53 = vmax.f32 %v1137_v21, -128.0 }
 0x1ed   :  { %v269_v26 = vmul.f32 %v1177_v23, %v1377_v42  ;;  %v1443_v27 = vsel %vm244_vm10, 1.0, %v253_v24  ;;  %v1179_v32 = vpop.eup %1178  ;;  %v1139_v42 = vround.rtne.f32 %v267_v31  ;;  %v327_v47 = vunpack.c.l.s4 %v1260_v35 }
 0x1ee   :  { %1184 = vrcp.f32 %v1443_v27  ;;  %v271_v40 = vmul.f32 %v1179_v32, %v1381_v43  ;;  %v287_v52 = vmax.f32 %v1138_v28, -128.0  ;;  %v294_v62 = vmin.f32 %v286_v53, 127.0 }
 0x1ef   :  { %v1140_v20 = vround.rtne.f32 %v269_v26  ;;  %v288_v25 = vmax.f32 %v1139_v42, -128.0  ;;  %v328_v57 = vunpack.c.0.s8 %v327_v47  ;;  %v1261_v26 = vmov 1983009808  }
 0x1f0   :  { %v1141_v38 = vround.rtne.f32 %v271_v40  ;;  %v295_v61 = vmin.f32 %v287_v52, 127.0  ;;  %v432_v30 = vunpack.c.l.s4 %v1261_v26  ;;  %v1110_v40 = vld [vmem:[%s1685_s2] ss:$0 sm:$0xff]  ;;  %s1262_s2 = smov 64  }
 0x1f1   :  { %v1181_v36 = vpop.eup %1180  ;;  %v289_v46 = vmax.f32 %v1140_v20, -128.0 }
 0x1f2   :  { %v1183_v37 = vpop.eup %1182  ;;  %v273_v41 = vmul.f32 %v1181_v36, %v1387_v50  ;;  %v330_v50 = vshrl.u32 %v329_v29, 7  ;;  %v290_v59 = vmax.f32 %v1141_v38, -128.0  ;;  %v1103_v7 = vpack.c.bf16 %v295_v61, %v294_v62 }
 0x1f3   :  { %v275_v45 = vmul.f32 %v1183_v37, %v1391_v51  ;;  %v297_v56 = vmin.f32 %v289_v46, 127.0  ;;  %v296_v51 = vmin.f32 %v288_v25, 127.0  ;;  %v433_v31 = vunpack.c.0.s8 %v432_v30 }
 0x1f4   :  { %v1142_v34 = vround.rtne.f32 %v273_v41  ;;  %v298_v5 = vmin.f32 %v290_v59, 127.0  ;;  %v331_v8 = vsub.s32 %v328_v57, %v330_v50 }
 0x1f5   :  { %v1143_v54 = vround.rtne.f32 %v275_v45  ;;  %v1104_v2 = vpack.c.bf16 %v297_v56, %v296_v51  ;;  %v1453_v32 = vsub.s32 %v433_v31, %v330_v50 }
 0x1f6   :  { %v291_v39 = vmax.f32 %v1142_v34, -128.0  ;;  %v332_v16 = vrot.slane %v1103_v7, %v331_v8 }
 0x1f7   :  { %v292_v0 = vmax.f32 %v1143_v54, -128.0  ;;  %v339_v12 = vrot.slane %v1104_v2, %v331_v8 }
 0x1f8   :  { %v1185_v43 = vpop.eup %1184  ;;  %v299_v1 = vmin.f32 %v291_v39, 127.0 }
 0x1f9   :  { %v277_v49 = vmul.f32 %v1185_v43, %v1397_v55  ;;  %v300_v9 = vmin.f32 %v292_v0, 127.0  ;;  %v354_v18 = vcombine.low %v332_v16, %v339_v12 }
 0x1fa   :  { %v1105_v11 = vpack.c.bf16 %v299_v1, %v298_v5 }
 0x1fb   :  { %v1144_v63 = vround.rtne.f32 %v277_v49  ;;  %v362_v22 = vrot.slane %v354_v18, %v331_v8 }
 0x1fc   :  { %v346_v17 = vrot.slane %v1105_v11, %v331_v8 }
 0x1fd   :  { %v293_v3 = vmax.f32 %v1144_v63, -128.0 }
 0x1ff   :  { %v301_v10 = vmin.f32 %v293_v3, 127.0 }
 0x201   :  { %v1106_v14 = vpack.c.bf16 %v301_v10, %v300_v9 }
 0x203   :  { %v353_v55 = vrot.slane %v1106_v14, %v331_v8 }
 0x205   :  { %v355_v19 = vcombine.low %v346_v17, %v353_v55 }
 0x207   :  { %v369_v23 = vrot.slane %v355_v19, %v331_v8 }
 0x209   :  { %v370_v24 = vcombine.low %v362_v22, %v369_v23 }
 0x20b   :  { %1134 = vmatmul.mubr.msk.bf16.vlgmr.msra.gmra.mrb[0].mxu0 %vm383_vm11, %v370_v24 }
 0x2de   :  { %v421_v33 = vpop.f32.mrb[0].mxu0 }
 0x2df   :  { %v430_v20 = vcombine.high %v421_v33, %v421_v33  ;;  %v437_v36 = vrot.slane %v421_v33, %v1453_v32  ;;  %v1135_v37 = vpop.f32.mrb[1].mxu0 }
 0x2e0   :  { %v424_v41 = vpop.f32.mrb[2].mxu0 }
 0x2e1   :  { %v444_v28 = vrot.slane %v430_v20, %v1453_v32  ;;  %v445_v42 = vcombine.high %v437_v36, %v437_v36  ;;  %v472_v21 = vmul.f32 %v437_v36, %v1420_v44  ;;  %v447_v45 = vcombine.high %v424_v41, %v424_v41  ;;  %v1136_v34 = vpop.f32.mrb[3].mxu0 }
 0x2e2   :  { %v454_v46 = vrot.slane %v424_v41, %v1453_v32 }
 0x2e3   :  { %v446_v35 = vcombine.high %v444_v28, %v444_v28  ;;  %v473_v47 = vmul.f32 %v445_v42, %v1422_v48  ;;  %v474_v29 = vmul.f32 %v444_v28, %v1426_v60  ;;  %v487_v38 = vadd.f32 %v1110_v40, %v472_v21 }
 0x2e4   :  { %v461_v52 = vrot.slane %v447_v45, %v1453_v32  ;;  %v462_v25 = vcombine.high %v454_v46, %v454_v46  ;;  %v476_v53 = vmul.f32 %v454_v46, %v1433_v6 }
 0x2e5   :  { %v475_v54 = vmul.f32 %v446_v35, %v1430_v4  ;;  %v488_v39 = vadd.f32 %v1110_v40, %v473_v47  ;;  %v1467_v56 = vadd.f32 %v1110_v40, %v474_v29  ;;  %v1111_v44 = vmul.f32 -1.442695, %v487_v38 }
 0x2e6   :  { %v463_v43 = vcombine.high %v461_v52, %v461_v52  ;;  %v477_v57 = vmul.f32 %v462_v25, %v1436_v13  ;;  %v478_v50 = vmul.f32 %v461_v52, %v1439_v15  ;;  %v1471_v48 = vadd.f32 %v1110_v40, %v476_v53 }
 0x2e7   :  { %1186 = vpow2.f32 %v1111_v44  ;;  %v1112_v60 = vmul.f32 -1.442695, %v488_v39  ;;  %v1113_v49 = vmul.f32 -1.442695, %v1467_v56  ;;  %v1474_v59 = vadd.f32 %v1110_v40, %v475_v54 }
 0x2e8   :  { %v479_v6 = vmul.f32 %v463_v43, %v1443_v27  ;;  %v1477_v4 = vadd.f32 %v1110_v40, %v477_v57  ;;  %v1479_v61 = vadd.f32 %v1110_v40, %v478_v50  ;;  %v1115_v51 = vmul.f32 -1.442695, %v1471_v48 }
 0x2e9   :  { %1188 = vpow2.f32 %v1112_v60  ;;  %v1114_v13 = vmul.f32 -1.442695, %v1474_v59 }
 0x2ea   :  { %1190 = vpow2.f32 %v1113_v49  ;;  %v1116_v15 = vmul.f32 -1.442695, %v1477_v4  ;;  %v1117_v62 = vmul.f32 -1.442695, %v1479_v61  ;;  %v1485_v63 = vadd.f32 %v1110_v40, %v479_v6  ;;  %v751_v6 = vld [vmem:[#allocation2] sm:$0x3] }
 0x2eb   :  { %1192 = vpow2.f32 %v1115_v51 }
 0x2ec   :  { %1194 = vpow2.f32 %v1116_v15  ;;  %v1118_v27 = vmul.f32 -1.442695, %v1485_v63 }
 0x2ed   :  { %1196 = vpow2.f32 %v1117_v62 }
 0x2ee   :  { %1198 = vpow2.f32 %v1114_v13 }
 0x2ef   :  { %1200 = vpow2.f32 %v1118_v27 }
 0x2f1   :  { %v1187_v0 = vpop.eup %1186 }
 0x2f2   :  { %v519_v1 = vadd.f32 1.0, %v1187_v0 }
 0x2f3   :  { %v1189_v2 = vpop.eup %1188 }
 0x2f4   :  { %v1191_v3 = vpop.eup %1190  ;;  %v520_v5 = vadd.f32 1.0, %v1189_v2  ;;  %1202 = vrcp.f32 %v519_v1 }
 0x2f5   :  { %v1193_v7 = vpop.eup %1192  ;;  %v521_v8 = vadd.f32 1.0, %v1191_v3 }
 0x2f6   :  { %v1195_v9 = vpop.eup %1194  ;;  %1204 = vrcp.f32 %v520_v5  ;;  %v523_v10 = vadd.f32 1.0, %v1193_v7 }
 0x2f7   :  { %v1197_v11 = vpop.eup %1196  ;;  %1206 = vrcp.f32 %v521_v8  ;;  %v524_v12 = vadd.f32 1.0, %v1195_v9 }
 0x2f8   :  { %v1199_v14 = vpop.eup %1198  ;;  %v525_v16 = vadd.f32 1.0, %v1197_v11  ;;  %1208 = vrcp.f32 %v523_v10 }
 0x2f9   :  { %v1201_v17 = vpop.eup %1200  ;;  %1210 = vrcp.f32 %v524_v12  ;;  %v522_v55 = vadd.f32 1.0, %v1199_v14 }
 0x2fa   :  { %1212 = vrcp.f32 %v525_v16  ;;  %v526_v18 = vadd.f32 1.0, %v1201_v17 }
 0x2fb   :  { %1214 = vrcp.f32 %v522_v55 }
 0x2fc   :  { %1216 = vrcp.f32 %v526_v18 }
 0x2fe   :  { %v1203_v19 = vpop.eup %1202 }
 0x2ff   :  { %543 = vst.msk [vmem:[#allocation3] sm:$0x3] %vm22_vm0, %v1203_v19  ;;  %v669_v22 = vrot.slane %v1203_v19, %v1453_v32  ;;  %v551_v23 = vmul.f32 %v1203_v19, %v487_v38 }
 0x300   :  { %v1205_v24 = vpop.eup %1204 }
 0x301   :  { %v1207_v26 = vpop.eup %1206  ;;  %544 = vst.msk [vmem:[#allocation3 + $0x2] sm:$0x3] %vm22_vm0, %v1205_v24  ;;  %719 = vrot.lane.b32.xlu1 %v669_v22, %s1262_s2  ;;  %v573_v30 = vrot.slane %v551_v23, %v1453_v32  ;;  %v552_v31 = vmul.f32 %v1205_v24, %v488_v39  ;;  %v676_v33 = vrot.slane %v1205_v24, %v1453_v32 }
 0x302   :  { %v1209_v20 = vpop.eup %1208  ;;  %545 = vst.msk [vmem:[#allocation3 + $0x4] sm:$0x3] %vm22_vm0, %v1207_v26  ;;  %v553_v36 = vmul.f32 %v1207_v26, %v1467_v56  ;;  %v683_v37 = vrot.slane %v1207_v26, %v1453_v32 }
 0x303   :  { %v1211_v40 = vpop.eup %1210  ;;  %547 = vst.msk [vmem:[#allocation3 + $0x8] sm:$0x3] %vm22_vm0, %v1209_v20  ;;  %623 = vrot.lane.b32.xlu0 %v573_v30, %s1263_s9  ;;  %v580_v41 = vrot.slane %v552_v31, %v1453_v32  ;;  %v555_v28 = vmul.f32 %v1209_v20, %v1471_v48  ;;  %v697_v42 = vrot.slane %v1209_v20, %v1453_v32 }
 0x304   :  { %v1213_v21 = vpop.eup %1212  ;;  %548 = vst.msk [vmem:[#allocation3 + $0xa] sm:$0x3] %vm22_vm0, %v1211_v40  ;;  %v587_v45 = vrot.slane %v553_v36, %v1453_v32  ;;  %v556_v34 = vmul.f32 %v1211_v40, %v1477_v4  ;;  %v704_v46 = vrot.slane %v1211_v40, %v1453_v32 }
 0x305   :  { %v1215_v35 = vpop.eup %1214  ;;  %549 = vst.msk [vmem:[#allocation3 + $0xc] sm:$0x3] %vm22_vm0, %v1213_v21  ;;  %625 = vrot.lane.b32.xlu1 %v580_v41, %s1263_s9  ;;  %v601_v47 = vrot.slane %v555_v28, %v1453_v32  ;;  %v557_v29 = vmul.f32 %v1213_v21, %v1479_v61  ;;  %v711_v38 = vrot.slane %v1213_v21, %v1453_v32 }
 0x306   :  { %v1217_v52 = vpop.eup %1216  ;;  %v554_v25 = vmul.f32 %v1215_v35, %v1474_v59  ;;  %546 = vst.msk [vmem:[#allocation3 + $0x6] sm:$0x3] %vm22_vm0, %v1215_v35  ;;  %v608_v53 = vrot.slane %v556_v34, %v1453_v32  ;;  %v690_v54 = vrot.slane %v1215_v35, %v1453_v32  ;;  %v753_v49 = vld [vmem:[#allocation3] sm:$0x3] }
 0x307   :  { %631 = vrot.lane.b32.xlu0 %v601_v47, %s1263_s9  ;;  %v558_v39 = vmul.f32 %v1217_v52, %v1485_v63  ;;  %550 = vst.msk [vmem:[#allocation3 + $0xe] sm:$0x3] %vm22_vm0, %v1217_v52  ;;  %v615_v56 = vrot.slane %v557_v29, %v1453_v32  ;;  %v718_v44 = vrot.slane %v1217_v52, %v1453_v32  ;;  %v755_v4 = vsub.f32 1.0, %v753_v49 }
 0x308   :  { %v594_v43 = vrot.slane %v554_v25, %v1453_v32  ;;  %v792_v13 = vld [vmem:[#allocation3 + $0x2] sm:$0x3]  ;;  %v754_v15 = vmul.f32 %v753_v49, %v751_v6 }
 0x309   :  { %627 = vrot.lane.b32.xlu1 %v587_v45, %s1263_s9  ;;  %v622_v57 = vrot.slane %v558_v39, %v1453_v32  ;;  %v794_v1 = vsub.f32 1.0, %v792_v13  ;;  %v833_v5 = vld [vmem:[#allocation3 + $0x4] sm:$0x3] }
 0x30a   :  { %v835_v16 = vsub.f32 1.0, %v833_v5 }
 0x30b   :  { %723 = vrot.lane.b32.xlu0 %v683_v37, %s1262_s2  ;;  %v956_v47 = vld [vmem:[#allocation3 + $0xa] sm:$0x3] }
 0x30d   :  { %629 = vrot.lane.b32.xlu1 %v594_v43, %s1263_s9  ;;  %v874_v55 = vld [vmem:[#allocation3 + $0x6] sm:$0x3] }
 0x30e   :  { %v876_v26 = vsub.f32 1.0, %v874_v55 }
 0x30f   :  { %633 = vrot.lane.b32.xlu0 %v608_v53, %s1263_s9 }
 0x311   :  { %721 = vrot.lane.b32.xlu1 %v676_v33, %s1262_s2  ;;  %v915_v33 = vld [vmem:[#allocation3 + $0x8] sm:$0x3] }
 0x312   :  { %v917_v34 = vsub.f32 1.0, %v915_v33 }
 0x313   :  { %725 = vrot.lane.b32.xlu0 %v690_v54, %s1262_s2 }
 0x315   :  { %727 = vrot.lane.b32.xlu1 %v697_v42, %s1262_s2 }
 0x317   :  { %637 = vrot.lane.b32.xlu0 %v622_v57, %s1263_s9  ;;  %v997_v57 = vld [vmem:[#allocation3 + $0xc] sm:$0x3] }
 0x319   :  { %635 = vrot.lane.b32.xlu1 %v615_v56, %s1263_s9 }
 0x31b   :  { %731 = vrot.lane.b32.xlu0 %v711_v38, %s1262_s2 }
 0x31d   :  { %729 = vrot.lane.b32.xlu1 %v704_v46, %s1262_s2 }
 0x321   :  { %733 = vrot.lane.b32.xlu1 %v718_v44, %s1262_s2  ;;  %v958_v44 = vsub.f32 1.0, %v956_v47 }
 0x373   :  { %v720_v32 = vpop.permute.xlu1 %719 }
 0x374   :  { %743 = vst.msk [vmem:[#allocation5] sm:$0x3] %vm22_vm0, %v720_v32 }
 0x375   :  { %v624_v50 = vpop.permute.xlu0 %623 }
 0x376   :  { %647 = vst.msk [vmem:[#allocation4] sm:$0x3] %vm22_vm0, %v624_v50 }
 0x377   :  { %v626_v48 = vpop.permute.xlu1 %625 }
 0x378   :  { %648 = vst.msk [vmem:[#allocation4 + $0x2] sm:$0x3] %vm22_vm0, %v626_v48 }
 0x379   :  { %v632_v60 = vpop.permute.xlu0 %631 }
 0x37a   :  { %651 = vst.msk [vmem:[#allocation4 + $0x8] sm:$0x3] %vm22_vm0, %v632_v60 }
 0x37b   :  { %v628_v59 = vpop.permute.xlu1 %627  ;;  %v759_v3 = vld [vmem:[#allocation5] sm:$0x3] }
 0x37c   :  { %649 = vst.msk [vmem:[#allocation4 + $0x4] sm:$0x3] %vm22_vm0, %v628_v59 }
 0x37d   :  { %v724_v61 = vpop.permute.xlu0 %723  ;;  %v756_v51 = vld [vmem:[#allocation4] sm:$0x3] }
 0x37e   :  { %745 = vst.msk [vmem:[#allocation5 + $0x4] sm:$0x3] %vm22_vm0, %v724_v61  ;;  %v757_v62 = vmul.f32 %v756_v51, %v755_v4  ;;  %v999_v4 = vsub.f32 1.0, %v997_v57  ;;  %v1038_v61 = vld [vmem:[#allocation3 + $0xe] sm:$0x3] }
 0x37f   :  { %v630_v63 = vpop.permute.xlu1 %629  ;;  %v796_v27 = vld [vmem:[#allocation4 + $0x2] sm:$0x3] }
 0x380   :  { %650 = vst.msk [vmem:[#allocation4 + $0x6] sm:$0x3] %vm22_vm0, %v630_v63  ;;  %v758_v0 = vadd.f32 %v757_v62, %v754_v15  ;;  %v797_v9 = vmul.f32 %v796_v27, %v794_v1 }
 0x381   :  { %v634_v2 = vpop.permute.xlu0 %633  ;;  %v919_v28 = vld [vmem:[#allocation4 + $0x8] sm:$0x3] }
 0x382   :  { %652 = vst.msk [vmem:[#allocation4 + $0xa] sm:$0x3] %vm22_vm0, %v634_v2  ;;  %v1542_v7 = vmul.f32 %v759_v3, %v758_v0  ;;  %v793_v8 = vmul.f32 %v792_v13, %v758_v0  ;;  %v920_v25 = vmul.f32 %v919_v28, %v917_v34  ;;  %v1040_v0 = vsub.f32 1.0, %v1038_v61 }
 0x383   :  { %v722_v10 = vpop.permute.xlu1 %721  ;;  %v837_v11 = vld [vmem:[#allocation4 + $0x4] sm:$0x3] }
 0x384   :  { %744 = vst.msk [vmem:[#allocation5 + $0x2] sm:$0x3] %vm22_vm0, %v722_v10  ;;  %v761_v12 = vsel %vm22_vm0, %v1542_v7, 0.0  ;;  %v798_v14 = vadd.f32 %v797_v9, %v793_v8  ;;  %v838_v19 = vmul.f32 %v837_v11, %v835_v16 }
 0x385   :  { %v726_v17 = vpop.permute.xlu0 %725  ;;  %762 = vadd.xlane.f32.xlu0 %v761_v12  ;;  %v841_v31 = vld [vmem:[#allocation5 + $0x4] sm:$0x3] }
 0x386   :  { %746 = vst.msk [vmem:[#allocation5 + $0x6] sm:$0x3] %vm22_vm0, %v726_v17  ;;  %v834_v18 = vmul.f32 %v833_v5, %v798_v14 }
 0x387   :  { %v728_v22 = vpop.permute.xlu1 %727  ;;  %v878_v23 = vld [vmem:[#allocation4 + $0x6] sm:$0x3] }
 0x388   :  { %747 = vst.msk [vmem:[#allocation5 + $0x8] sm:$0x3] %vm22_vm0, %v728_v22  ;;  %v839_v24 = vadd.f32 %v838_v19, %v834_v18  ;;  %v879_v37 = vmul.f32 %v878_v23, %v876_v26 }
 0x389   :  { %v638_v30 = vpop.permute.xlu0 %637  ;;  %v960_v54 = vld [vmem:[#allocation4 + $0xa] sm:$0x3] }
 0x38a   :  { %654 = vst.msk [vmem:[#allocation4 + $0xe] sm:$0x3] %vm22_vm0, %v638_v30  ;;  %v1550_v20 = vmul.f32 %v841_v31, %v839_v24  ;;  %v875_v36 = vmul.f32 %v874_v55, %v839_v24  ;;  %v961_v48 = vmul.f32 %v960_v54, %v958_v44 }
 0x38b   :  { %v636_v40 = vpop.permute.xlu1 %635  ;;  %v800_v41 = vld [vmem:[#allocation5 + $0x2] sm:$0x3] }
 0x38c   :  { %653 = vst.msk [vmem:[#allocation4 + $0xc] sm:$0x3] %vm22_vm0, %v636_v40  ;;  %v843_v42 = vsel %vm22_vm0, %v1550_v20, 0.0  ;;  %v1555_v21 = vmul.f32 %v800_v41, %v798_v14  ;;  %v880_v45 = vadd.f32 %v879_v37, %v875_v36 }
 0x38d   :  { %v732_v46 = vpop.permute.xlu0 %731  ;;  %844 = vadd.xlane.f32.xlu0 %v843_v42  ;;  %v882_v35 = vld [vmem:[#allocation5 + $0x6] sm:$0x3] }
 0x38e   :  { %749 = vst.msk [vmem:[#allocation5 + $0xc] sm:$0x3] %vm22_vm0, %v732_v46  ;;  %v802_v29 = vsel %vm22_vm0, %v1555_v21, 0.0  ;;  %v883_v38 = vmul.f32 %v882_v35, %v880_v45  ;;  %v916_v52 = vmul.f32 %v915_v33, %v880_v45 }
 0x38f   :  { %v730_v53 = vpop.permute.xlu1 %729  ;;  %803 = vadd.xlane.f32.xlu1 %v802_v29  ;;  %v923_v43 = vld [vmem:[#allocation5 + $0x8] sm:$0x3] }
 0x390   :  { %748 = vst.msk [vmem:[#allocation5 + $0xa] sm:$0x3] %vm22_vm0, %v730_v53  ;;  %v884_v39 = vsel %vm22_vm0, %v883_v38, 0.0  ;;  %v921_v56 = vadd.f32 %v920_v25, %v916_v52 }
 0x391   :  { %885 = vadd.xlane.f32.xlu0 %v884_v39  ;;  %v1042_v62 = vld [vmem:[#allocation4 + $0xe] sm:$0x3] }
 0x392   :  { %v924_v32 = vmul.f32 %v923_v43, %v921_v56  ;;  %v957_v50 = vmul.f32 %v956_v47, %v921_v56  ;;  %v1043_v8 = vmul.f32 %v1042_v62, %v1040_v0 }
 0x393   :  { %v734_v60 = vpop.permute.xlu1 %733  ;;  %v1001_v49 = vld [vmem:[#allocation4 + $0xc] sm:$0x3] }
 0x394   :  { %750 = vst.msk [vmem:[#allocation5 + $0xe] sm:$0x3] %vm22_vm0, %v734_v60  ;;  %v925_v59 = vsel %vm22_vm0, %v924_v32, 0.0  ;;  %v962_v6 = vadd.f32 %v961_v48, %v957_v50  ;;  %v1002_v13 = vmul.f32 %v1001_v49, %v999_v4 }
 0x395   :  { %926 = vadd.xlane.f32.xlu0 %v925_v59  ;;  %v1005_v1 = vld [vmem:[#allocation5 + $0xc] sm:$0x3] }
 0x396   :  { %v998_v51 = vmul.f32 %v997_v57, %v962_v6 }
 0x397   :  { %v964_v15 = vld [vmem:[#allocation5 + $0xa] sm:$0x3] }
 0x398   :  { %v965_v63 = vmul.f32 %v964_v15, %v962_v6  ;;  %v1003_v27 = vadd.f32 %v1002_v13, %v998_v51 }
 0x39a   :  { %v966_v2 = vsel %vm22_vm0, %v965_v63, 0.0  ;;  %v1006_v3 = vmul.f32 %v1005_v1, %v1003_v27  ;;  %v1039_v5 = vmul.f32 %v1038_v61, %v1003_v27 }
 0x39b   :  { %967 = vadd.xlane.f32.xlu1 %v966_v2  ;;  %v1046_v11 = vld [vmem:[#allocation5 + $0xe] sm:$0x3] }
 0x39c   :  { %v1007_v9 = vsel %vm22_vm0, %v1006_v3, 0.0  ;;  %v1044_v10 = vadd.f32 %v1043_v8, %v1039_v5 }
 0x39d   :  { %1008 = vadd.xlane.f32.xlu0 %v1007_v9 }
 0x39e   :  { %v1047_v12 = vmul.f32 %v1046_v11, %v1044_v10  ;;  %1078 = vst.msk [vmem:[#allocation2] sm:$0x3] %vm22_vm0, %v1044_v10 }
 0x3a0   :  { %v1048_v14 = vsel %vm22_vm0, %v1047_v12, 0.0 }
 0x3a1   :  { %1049 = vadd.xlane.f32.xlu1 %v1048_v14 }
 0x412   :  { %v763_v16 = vpop.xlane.xlu0 %762 }
 0x413   :  { %v764_v17 = vmul.f32 0.03125, %v763_v16 }
 0x415   :  { %v1569_v55 = vsub.f32 %v1542_v7, %v764_v17 }
 0x417   :  { %v766_v18 = vmul.f32 %v1569_v55, %v1569_v55 }
 0x419   :  { %v767_v19 = vsel %vm22_vm0, %v766_v18, 0.0 }
 0x41a   :  { %768 = vadd.xlane.f32.xlu0 %v767_v19  ;;  %v845_v22 = vpop.xlane.xlu0 %844 }
 0x41b   :  { %v846_v23 = vmul.f32 0.03125, %v845_v22 }
 0x41c   :  { %v804_v24 = vpop.xlane.xlu1 %803 }
 0x41d   :  { %v1575_v26 = vsub.f32 %v1550_v20, %v846_v23  ;;  %v805_v30 = vmul.f32 0.03125, %v804_v24 }
 0x41e   :  { %v886_v31 = vpop.xlane.xlu0 %885 }
 0x41f   :  { %v1578_v33 = vsub.f32 %v1555_v21, %v805_v30  ;;  %v887_v36 = vmul.f32 0.03125, %v886_v31  ;;  %v848_v7 = vmul.f32 %v1575_v26, %v1575_v26 }
 0x421   :  { %v1582_v37 = vsub.f32 %v883_v38, %v887_v36  ;;  %v849_v40 = vsel %vm22_vm0, %v848_v7, 0.0  ;;  %v807_v41 = vmul.f32 %v1578_v33, %v1578_v33 }
 0x422   :  { %850 = vadd.xlane.f32.xlu0 %v849_v40  ;;  %v927_v28 = vpop.xlane.xlu0 %926 }
 0x423   :  { %v928_v20 = vmul.f32 0.03125, %v927_v28  ;;  %v808_v42 = vsel %vm22_vm0, %v807_v41, 0.0  ;;  %v889_v21 = vmul.f32 %v1582_v37, %v1582_v37 }
 0x424   :  { %809 = vadd.xlane.f32.xlu1 %v808_v42 }
 0x425   :  { %v1590_v45 = vsub.f32 %v924_v32, %v928_v20  ;;  %v890_v34 = vsel %vm22_vm0, %v889_v21, 0.0 }
 0x427   :  { %v930_v46 = vmul.f32 %v1590_v45, %v1590_v45 }
 0x428   :  { %v968_v35 = vpop.xlane.xlu1 %967  ;;  %891 = vadd.xlane.f32.xlu1 %v890_v34 }
 0x429   :  { %v969_v47 = vmul.f32 0.03125, %v968_v35  ;;  %v931_v29 = vsel %vm22_vm0, %v930_v46, 0.0 }
 0x42a   :  { %932 = vadd.xlane.f32.xlu0 %v931_v29  ;;  %v1009_v38 = vpop.xlane.xlu0 %1008 }
 0x42b   :  { %v1596_v52 = vsub.f32 %v965_v63, %v969_v47  ;;  %v1010_v25 = vmul.f32 0.03125, %v1009_v38 }
 0x42d   :  { %v1598_v53 = vsub.f32 %v1006_v3, %v1010_v25  ;;  %v971_v54 = vmul.f32 %v1596_v52, %v1596_v52 }
 0x42e   :  { %v1050_v39 = vpop.xlane.xlu1 %1049 }
 0x42f   :  { %v1051_v56 = vmul.f32 0.03125, %v1050_v39  ;;  %v972_v44 = vsel %vm22_vm0, %v971_v54, 0.0  ;;  %v1012_v43 = vmul.f32 %v1598_v53, %v1598_v53 }
 0x430   :  { %973 = vadd.xlane.f32.xlu1 %v972_v44 }
 0x431   :  { %v1605_v57 = vsub.f32 %v1047_v12, %v1051_v56  ;;  %v1013_v32 = vsel %vm22_vm0, %v1012_v43, 0.0 }
 0x432   :  { %1014 = vadd.xlane.f32.xlu0 %v1013_v32 }
 0x433   :  { %v1053_v50 = vmul.f32 %v1605_v57, %v1605_v57 }
 0x435   :  { %v1054_v48 = vsel %vm22_vm0, %v1053_v50, 0.0 }
 0x436   :  { %1055 = vadd.xlane.f32.xlu1 %v1054_v48 }
 0x4a7   :  { %v769_v60 = vpop.xlane.xlu0 %768 }
 0x4a8   :  { %v770_v49 = vmul.f32 0.03125, %v769_v60 }
 0x4aa   :  { %v771_v59 = vadd.f32 1e-08, %v770_v49 }
 0x4ac   :  { %v772_v6 = vmax.f32 %v771_v59, 1e-10 }
 0x4ae   :  { %1218 = vrsqrt.f32 %v772_v6 }
 0x4af   :  { %v851_v4 = vpop.xlane.xlu0 %850 }
 0x4b0   :  { %v852_v61 = vmul.f32 0.03125, %v851_v4 }
 0x4b1   :  { %v810_v51 = vpop.xlane.xlu1 %809 }
 0x4b2   :  { %v853_v13 = vadd.f32 1e-08, %v852_v61  ;;  %v811_v15 = vmul.f32 0.03125, %v810_v51 }
 0x4b4   :  { %v854_v62 = vmax.f32 %v853_v13, 1e-10  ;;  %v812_v63 = vadd.f32 1e-08, %v811_v15 }
 0x4b5   :  { %v892_v27 = vpop.xlane.xlu1 %891 }
 0x4b6   :  { %1220 = vrsqrt.f32 %v854_v62  ;;  %v813_v0 = vmax.f32 %v812_v63, 1e-10  ;;  %v893_v1 = vmul.f32 0.03125, %v892_v27 }
 0x4b7   :  { %v933_v2 = vpop.xlane.xlu0 %932 }
 0x4b8   :  { %v1219_v3 = vpop.eup %1218  ;;  %1222 = vrsqrt.f32 %v813_v0  ;;  %v894_v5 = vadd.f32 1e-08, %v893_v1  ;;  %v934_v8 = vmul.f32 0.03125, %v933_v2 }
 0x4b9   :  { %v774_v9 = vmul.f32 %v1219_v3, %v1569_v55 }
 0x4ba   :  { %v895_v10 = vmax.f32 %v894_v5, 1e-10  ;;  %v935_v11 = vadd.f32 1e-08, %v934_v8 }
 0x4bb   :  { %v775_v12 = vpack.c.bf16 %v774_v9, %v774_v9 }
 0x4bc   :  { %1224 = vrsqrt.f32 %v895_v10  ;;  %v936_v14 = vmax.f32 %v935_v11, 1e-10 }
 0x4bd   :  { %v974_v16 = vpop.xlane.xlu1 %973  ;;  %v778_v17 = vunpack.c.l.bf16 %v775_v12  ;;  %777 = vst.msk [vmem:[%s1686_s3] sm:$0x1] %vm776_vm12, %v775_v12 }
 0x4be   :  { %1226 = vrsqrt.f32 %v936_v14  ;;  %v975_v18 = vmul.f32 0.03125, %v974_v16 }
 0x4bf   :  { %v1015_v19 = vpop.xlane.xlu0 %1014  ;;  %v779_v22 = vand.u32 2147483647, %v778_v17 }
 0x4c0   :  { %v1221_v23 = vpop.eup %1220  ;;  %v976_v24 = vadd.f32 1e-08, %v975_v18  ;;  %v1016_v55 = vmul.f32 0.03125, %v1015_v19 }
 0x4c1   :  { %v780_v30 = vsel %vm22_vm0, %v779_v22, -inf  ;;  %v856_v31 = vmul.f32 %v1221_v23, %v1575_v26 }
 0x4c2   :  { %v1223_v36 = vpop.eup %1222  ;;  %v977_v7 = vmax.f32 %v976_v24, 1e-10  ;;  %v1017_v40 = vadd.f32 1e-08, %v1016_v55  ;;  %781 = vmax.xlane.f32.xlu0 %v780_v30 }
 0x4c3   :  { %v1056_v41 = vpop.xlane.xlu1 %1055  ;;  %v857_v28 = vpack.c.bf16 %v856_v31, %v856_v31  ;;  %v815_v20 = vmul.f32 %v1223_v36, %v1578_v33 }
 0x4c4   :  { %1228 = vrsqrt.f32 %v977_v7  ;;  %v1018_v42 = vmax.f32 %v1017_v40, 1e-10  ;;  %v1057_v21 = vmul.f32 0.03125, %v1056_v41 }
 0x4c5   :  { %v860_v34 = vunpack.c.l.bf16 %v857_v28  ;;  %1120 = vst.msk [vmem:[%s1686_s3 + $0x2] sm:$0x1] %vm776_vm12, %v857_v28  ;;  %v816_v46 = vpack.c.bf16 %v815_v20, %v815_v20 }
 0x4c6   :  { %v1225_v35 = vpop.eup %1224  ;;  %1230 = vrsqrt.f32 %v1018_v42  ;;  %v1058_v26 = vadd.f32 1e-08, %v1057_v21 }
 0x4c7   :  { %v861_v47 = vand.u32 2147483647, %v860_v34  ;;  %1119 = vst.msk [vmem:[%s1686_s3 + $0x1] sm:$0x1] %vm776_vm12, %v816_v46  ;;  %v819_v33 = vunpack.c.l.bf16 %v816_v46  ;;  %v897_v29 = vmul.f32 %v1225_v35, %v1582_v37  ;;  %v752_v35 = vld [vmem:[#allocation6] sm:$0x1] }
 0x4c8   :  { %v1227_v38 = vpop.eup %1226  ;;  %v1059_v25 = vmax.f32 %v1058_v26, 1e-10 }
 0x4c9   :  { %v862_v54 = vsel %vm22_vm0, %v861_v47, -inf  ;;  %v820_v39 = vand.u32 2147483647, %v819_v33  ;;  %v898_v56 = vpack.c.bf16 %v897_v29, %v897_v29  ;;  %v938_v44 = vmul.f32 %v1227_v38, %v1590_v45 }
 0x4ca   :  { %1232 = vrsqrt.f32 %v1059_v25  ;;  %863 = vmax.xlane.f32.xlu0 %v862_v54 }
 0x4cb   :  { %v821_v43 = vsel %vm22_vm0, %v820_v39, -inf  ;;  %v901_v32 = vunpack.c.l.bf16 %v898_v56  ;;  %1121 = vst.msk [vmem:[%s1686_s3 + $0x3] sm:$0x1] %vm776_vm12, %v898_v56  ;;  %v939_v50 = vpack.c.bf16 %v938_v44, %v938_v44 }
 0x4cc   :  { %822 = vmax.xlane.f32.xlu1 %v821_v43 }
 0x4cd   :  { %v902_v37 = vand.u32 2147483647, %v901_v32  ;;  %v942_v48 = vunpack.c.l.bf16 %v939_v50  ;;  %1122 = vst.msk [vmem:[%s1686_s3 + $0x4] sm:$0x1] %vm776_vm12, %v939_v50 }
 0x4ce   :  { %v1229_v45 = vpop.eup %1228 }
 0x4cf   :  { %v903_v60 = vsel %vm22_vm0, %v902_v37, -inf  ;;  %v943_v49 = vand.u32 2147483647, %v942_v48  ;;  %v979_v59 = vmul.f32 %v1229_v45, %v1596_v52 }
 0x4d0   :  { %v1231_v6 = vpop.eup %1230  ;;  %904 = vmax.xlane.f32.xlu1 %v903_v60 }
 0x4d1   :  { %v944_v4 = vsel %vm22_vm0, %v943_v49, -inf  ;;  %v980_v61 = vpack.c.bf16 %v979_v59, %v979_v59  ;;  %v1020_v51 = vmul.f32 %v1231_v6, %v1598_v53 }
 0x4d2   :  { %945 = vmax.xlane.f32.xlu0 %v944_v4 }
 0x4d3   :  { %v983_v13 = vunpack.c.l.bf16 %v980_v61  ;;  %1123 = vst.msk [vmem:[%s1686_s3 + $0x5] sm:$0x1] %vm776_vm12, %v980_v61  ;;  %v1021_v15 = vpack.c.bf16 %v1020_v51, %v1020_v51 }
 0x4d4   :  { %v1233_v62 = vpop.eup %1232 }
 0x4d5   :  { %v984_v63 = vand.u32 2147483647, %v983_v13  ;;  %v1024_v27 = vunpack.c.l.bf16 %v1021_v15  ;;  %1124 = vst.msk [vmem:[%s1686_s3 + $0x6] sm:$0x1] %vm776_vm12, %v1021_v15  ;;  %v1061_v52 = vmul.f32 %v1233_v62, %v1605_v57 }
 0x4d7   :  { %v985_v53 = vsel %vm22_vm0, %v984_v63, -inf  ;;  %v1025_v0 = vand.u32 2147483647, %v1024_v27  ;;  %v1062_v1 = vpack.c.bf16 %v1061_v52, %v1061_v52 }
 0x4d8   :  { %986 = vmax.xlane.f32.xlu1 %v985_v53 }
 0x4d9   :  { %v1026_v2 = vsel %vm22_vm0, %v1025_v0, -inf  ;;  %v1065_v3 = vunpack.c.l.bf16 %v1062_v1  ;;  %1125 = vst.msk [vmem:[%s1686_s3 + $0x7] sm:$0x1] %vm776_vm12, %v1062_v1  ;;  %s1264_s3 = smov [#allocation7]  }
 0x4da   :  { %1027 = vmax.xlane.f32.xlu0 %v1026_v2  ;;  %s1093_s26 = sshll.u32 %s1264_s3, 4  ;;  %s1094_s26 = int_to_ptr.vmem [resolvable:$true] %s1093_s26 }
 0x4db   :  { %v1066_v5 = vand.u32 2147483647, %v1065_v3  ;;  %s1234_s27 = scalar_lea.vmem %s1094_s26, 16  ;;  %s1238_s28 = scalar_lea.vmem %s1094_s26, 32 }
 0x4dc   :  { %p1235_p0 = scmp.ne.s32.totalorder %s1094_s26, %s1234_s27  ;;  %p1239_p1 = scmp.lt.s32.totalorder %s1094_s26, %s1094_s26 }
 0x4dd   :  { %v1067_v57 = vsel %vm22_vm0, %v1066_v5, -inf  ;;  %p1240_p2 = scmp.lt.s32.totalorder %s1238_s28, %s1234_s27 }
 0x4de   :  { %1068 = vmax.xlane.f32.xlu1 %v1067_v57 }
 0x4df   :  { %p1241_p3 = por %p1240_p2, %p1239_p1 }
 0x4e1   :  { %p1242_p4 = pnand %p1241_p3, %p1235_p0 }
 0x54f   :  { %v782_v8 = vpop.xlane.xlu0 %781 }
 0x550   :  { %v783_v9 = vsel %vm180_vm2, %v782_v8, -inf }
 0x551   :  { %v784_v10 = vrot.slane %v783_v9, 4 }
 0x553   :  { %v785_v11 = vmax.f32 %v783_v9, %v784_v10 }
 0x555   :  { %v786_v12 = vrot.slane %v785_v11, 2 }
 0x557   :  { %v864_v58 = vpop.xlane.xlu0 %863  ;;  %v787_v16 = vmax.f32 %v785_v11, %v786_v12 }
 0x558   :  { %v865_v14 = vsel %vm180_vm2, %v864_v58, -inf }
 0x559   :  { %v866_v17 = vrot.slane %v865_v14, 4  ;;  %v823_v18 = vpop.xlane.xlu1 %822  ;;  %v788_v24 = vrot.slane %v787_v16, 1 }
 0x55a   :  { %v824_v19 = vsel %vm180_vm2, %v823_v18, -inf }
 0x55b   :  { %v867_v22 = vmax.f32 %v865_v14, %v866_v17  ;;  %v825_v23 = vrot.slane %v824_v19, 4  ;;  %v789_v42 = vmax.f32 %v787_v16, %v788_v24 }
 0x55d   :  { %v868_v55 = vrot.slane %v867_v22, 2  ;;  %v826_v30 = vmax.f32 %v824_v19, %v825_v23  ;;  %v905_v31 = vpop.xlane.xlu1 %904  ;;  %v790_v56 = vmax.f32 %v752_v35, %v789_v42 }
 0x55e   :  { %v906_v36 = vsel %vm180_vm2, %v905_v31, -inf }
 0x55f   :  { %v827_v7 = vrot.slane %v826_v30, 2  ;;  %v907_v40 = vrot.slane %v906_v36, 4  ;;  %v946_v41 = vpop.xlane.xlu0 %945  ;;  %v869_v28 = vmax.f32 %v867_v22, %v868_v55 }
 0x560   :  { %v947_v20 = vsel %vm180_vm2, %v946_v41, -inf }
 0x561   :  { %v828_v21 = vmax.f32 %v826_v30, %v827_v7  ;;  %v908_v34 = vmax.f32 %v906_v36, %v907_v40  ;;  %v948_v46 = vrot.slane %v947_v20, 4  ;;  %v870_v29 = vrot.slane %v869_v28, 1 }
 0x563   :  { %v829_v26 = vrot.slane %v828_v21, 1  ;;  %v909_v47 = vrot.slane %v908_v34, 2  ;;  %v949_v33 = vmax.f32 %v947_v20, %v948_v46  ;;  %v871_v45 = vmax.f32 %v869_v28, %v870_v29 }
 0x565   :  { %v830_v38 = vmax.f32 %v828_v21, %v829_v26  ;;  %v910_v25 = vmax.f32 %v908_v34, %v909_v47  ;;  %v950_v54 = vrot.slane %v949_v33, 2  ;;  %v987_v39 = vpop.xlane.xlu1 %986 }
 0x566   :  { %v988_v44 = vsel %vm180_vm2, %v987_v39, -inf }
 0x567   :  { %v911_v43 = vrot.slane %v910_v25, 1  ;;  %v951_v32 = vmax.f32 %v949_v33, %v950_v54  ;;  %v989_v50 = vrot.slane %v988_v44, 4  ;;  %v1028_v37 = vpop.xlane.xlu0 %1027  ;;  %v831_v48 = vmax.f32 %v790_v56, %v830_v38 }
 0x568   :  { %v1029_v60 = vsel %vm180_vm2, %v1028_v37, -inf }
 0x569   :  { %v912_v49 = vmax.f32 %v910_v25, %v911_v43  ;;  %v952_v59 = vrot.slane %v951_v32, 1  ;;  %v990_v6 = vmax.f32 %v988_v44, %v989_v50  ;;  %v1030_v4 = vrot.slane %v1029_v60, 4 }
 0x56a   :  { %v872_v61 = vmax.f32 %v831_v48, %v871_v45 }
 0x56b   :  { %v991_v51 = vrot.slane %v990_v6, 2  ;;  %v1031_v13 = vmax.f32 %v1029_v60, %v1030_v4  ;;  %v1069_v15 = vpop.xlane.xlu1 %1068  ;;  %v953_v62 = vmax.f32 %v951_v32, %v952_v59 }
 0x56c   :  { %v1070_v63 = vsel %vm180_vm2, %v1069_v15, -inf  ;;  %v913_v0 = vmax.f32 %v872_v61, %v912_v49 }
 0x56d   :  { %v992_v27 = vmax.f32 %v990_v6, %v991_v51  ;;  %v1032_v52 = vrot.slane %v1031_v13, 2  ;;  %v1071_v53 = vrot.slane %v1070_v63, 4 }
 0x56e   :  { %v954_v9 = vmax.f32 %v913_v0, %v953_v62 }
 0x56f   :  { %v993_v1 = vrot.slane %v992_v27, 1  ;;  %v1033_v2 = vmax.f32 %v1031_v13, %v1032_v52  ;;  %v1072_v3 = vmax.f32 %v1070_v63, %v1071_v53 }
 0x571   :  { %v994_v5 = vmax.f32 %v992_v27, %v993_v1  ;;  %v1034_v57 = vrot.slane %v1033_v2, 1  ;;  %v1073_v8 = vrot.slane %v1072_v3, 2 }
 0x573   :  { %v1035_v10 = vmax.f32 %v1033_v2, %v1034_v57  ;;  %v1074_v11 = vmax.f32 %v1072_v3, %v1073_v8  ;;  %v995_v12 = vmax.f32 %v954_v9, %v994_v5 }
 0x575   :  { %v1075_v58 = vrot.slane %v1074_v11, 1  ;;  %v1036_v16 = vmax.f32 %v995_v12, %v1035_v10 }
 0x577   :  { %v1076_v14 = vmax.f32 %v1074_v11, %v1075_v58 }
 0x579   :  { %v1077_v17 = vmax.f32 %v1036_v16, %v1076_v14 }
 0x57b   :  { %1080 = vst.msk [vmem:[#allocation6] sm:$0x1] %vm24_vm13, %v1077_v17  ;;  %vm1081_vm14 = vcmp.eq.f32.partialorder %v1077_v17, 0.0  ;;  %v1082_v18 = vmul.f32 0.007874016, %v1077_v17 }
 0x57d   :  { %v1083_v19 = vsel %vm1081_vm14, 1.0, %v1082_v18 }
 0x57e   :  { %1084 = vst.msk [vmem:[#allocation7] sm:$0x1] %vm24_vm13, %v1083_v19 }
 0x57f   :  { %1245 = shalt.err (!%p1242_p4)
}
 0x580   :  { %s1246_s0 = scalar_lea.hbm %s1687_s4, 16 }
 0x581   :  { %p1247_p5 = scmp.ne.s32.totalorder %s1687_s4, %s1246_s0  ;;  %p1250_p6 = scmp.lt.u32.totalorder %s1246_s0, %s1687_s4 }
 0x583   :  { %p1252_p7 = pnand %p1250_p6, %p1247_p5 }
 0x585   :  { %1255 = shalt.err (!%p1252_p7)
}
 0x586   :  { %1096 = dma.vmem_to_hbm [thread:$0]  %s1094_s26, 16, %s1687_s4, [#allocation8]  }
 0x587   :  { %1256 = dma.done.wait [#allocation8], 16  }
 0x588   :  { %1257 = vsyncadd [#allocation8], 4294967280 }
 0x589   :  { %1102 = vsyncpa [#allocation8], 1 }

// kernel: cascade_forward.18
= control target key start
LH: loop header
LB: loop body
LE: loop exit
PB: predicated region body
PF: predicated region fallthrough
CT: control target
= control target key end

     0   :  { %v296_v0 = vmov 0   ;;  %v42_v2 = vlaneseq  ;;  %v297_v3 = vmov 0.0   ;;  %vm298_vm0 = vmmov 0   ;;  %s299_s24 = smov 96   ;;  %s406_s1 = inlined_call_operand.<no memory space> [shape: f32[1,1,1], index: 1, kind: input, shape index: {}]   ;;  %s407_s4 = inlined_call_operand.vmem [shape: bf16[32,64], index: 4, kind: input, shape index: {}]   ;;  %s408_s2 = inlined_call_operand.vmem [shape: f32[16,32], index: 2, kind: input, shape index: {}]   ;;  %s409_s3 = inlined_call_operand.vmem [shape: bf16[32,32], index: 3, kind: input, shape index: {}]   ;;  %s410_s0 = inlined_call_operand.vmem [shape: bf16[16,32], index: 0, kind: input, shape index: {}]   ;;  %s411_s6 = inlined_call_operand.vmem [shape: f32[1,64], index: 6, kind: input, shape index: {}]   ;;  %s412_s8 = inlined_call_operand.vmem [shape: bf16[16,32], index: 8, kind: output, shape index: {1}]   ;;  %s413_s9 = inlined_call_operand.vmem [shape: bf16[16,32], index: 9, kind: output, shape index: {2}]   ;;  %s414_s5 = inlined_call_operand.vmem [shape: f32[1,32], index: 5, kind: input, shape index: {}]   ;;  %s415_s7 = inlined_call_operand.vmem [shape: bf16[16,32], index: 7, kind: output, shape index: {0}]  }
   0x1   :  { %289 = vset.pattern.permute.xlu0 %v296_v0  ;;  %v15_v1 = vstv %s406_s1  ;;  %275 = vmatprep.subr.bf16.mxu1 %v297_v3  ;;  %v290_v4 = vld [vmem:[%s407_s4] sm:$0xff]   ;;  %v291_v5 = vld [vmem:[%s407_s4 + $0x8] sm:$0xff]   ;;  %vm85_vm1 = vcmask 261120   ;;  %vm208_vm3 = vcmask 257024  }
   0x2   :  { %16 = vst [vmem:[#allocation2] sm:$0x1] %v15_v1  ;;  %279 = vmatprep.mubr.msk.bf16.mxu1 %vm298_vm0, %v297_v3  ;;  %267 = vmatprep.subr.bf16.mxu0 %v297_v3  ;;  %v130_v6 = vld [vmem:[%s408_s2] sm:$0xff]  ;;  %v131_v7 = vld [vmem:[%s408_s2 + $0x8] sm:$0xff]  ;;  %v43_v8 = vshrl.u32 %v42_v2, 7 }
   0x3   :  { %276 = vmatpush3.bf16.msra.mxu1 %v290_v4  ;;  %271 = vmatprep.mubr.msk.bf16.mxu0 %vm298_vm0, %v297_v3  ;;  %v132_v9 = vpack.c.bf16 %v131_v7, %v130_v6  ;;  %v292_v15 = vld [vmem:[%s409_s3] sm:$0xff]   ;;  %v293_v16 = vld [vmem:[%s409_s3 + $0x8] sm:$0xff]  }
   0x4   :  { %277 = vmatprep.subr.bf16.mxu1 %v297_v3  ;;  %v44_v11 = vsub.s32 0, %v43_v8  ;;  %268 = vmatpush3.bf16.msra.mxu0 %v292_v15  ;;  %v258_v18 = vld [vmem:[%s410_s0] sm:$0xff]  }
   0x5   :  { %269 = vmatprep.subr.bf16.mxu0 %v297_v3  ;;  %v259_v19 = vunpack.c.l.bf16 %v258_v18  ;;  %v260_v20 = vunpack.c.h.bf16 %v258_v18  ;;  %v245_v33 = vld [vmem:[%s411_s6] ss:$0 sm:$0xff] }
   0x6   :  { %v241_v44 = vld [vmem:[%s414_s5] ss:$0 sm:$0xff] }
   0x7   :  { %278 = vmatpush3.bf16.msra.mxu1 %v291_v5 }
   0x8   :  { %270 = vmatpush3.bf16.msra.mxu0 %v293_v16 }
   0x9   :  { %v32_v10 = vld [vmem:[#allocation2] sm:$0x1] }
   0xa   :  { %vm33_vm2 = vcmp.eq.f32.partialorder %v32_v10, 0.0  ;;  %v35_v12 = vmul.f32 0.007874016, %v32_v10  ;;  %280 = vmatmul.mubr.msk.bf16.vlgmr.msra.gmra.mrb[0].mxu1 %vm85_vm1, %v132_v9 }
   0xc   :  { %v36_v13 = vsel %vm33_vm2, 1.0, %v35_v12 }
   0xd   :  { %v45_v14 = vrot.slane %v36_v13, %v44_v11 }
   0xf   :  { %47 = vperm.xlu0 %289, %v45_v14  }
  0x8e   :  { %v48_v17 = vpop.permute.xlu0 %47 }
  0x8f   :  { %294 = vrcp.f32 %v48_v17 }
  0x99   :  { %v295_v21 = vpop.eup %294 }
  0x9a   :  { %v51_v22 = vmul.f32 %v295_v21, %v259_v19  ;;  %v52_v23 = vmul.f32 %v295_v21, %v260_v20 }
  0x9c   :  { %v283_v24 = vround.rtne.f32 %v51_v22  ;;  %v284_v25 = vround.rtne.f32 %v52_v23 }
  0x9e   :  { %v55_v26 = vmax.f32 %v283_v24, -128.0  ;;  %v56_v27 = vmax.f32 %v284_v25, -128.0 }
  0xa0   :  { %v57_v28 = vmin.f32 %v55_v26, 127.0  ;;  %v58_v29 = vmin.f32 %v56_v27, 127.0 }
  0xa2   :  { %v59_v30 = vmul.f32 %v57_v28, %v48_v17  ;;  %v60_v31 = vmul.f32 %v58_v29, %v48_v17 }
  0xa4   :  { %v61_v32 = vpack.c.bf16 %v60_v31, %v59_v30 }
  0xa6   :  { %272 = vmatmul.mubr.msk.bf16.vlgmr.msra.gmra.mrb[0].mxu0 %vm85_vm1, %v61_v32 }
  0xdd   :  { %v193_v34 = vpop.f32.mrb[0].mxu1 }
  0xde   :  { %v194_v35 = vadd.f32 %v245_v33, %v193_v34  ;;  %v281_v36 = vpop.f32.mrb[1].mxu1 }
  0xdf   :  { %v196_v37 = vpop.f32.mrb[2].mxu1 }
  0xe0   :  { %v255_v38 = vpack.c.bf16 %v194_v35, %v194_v35  ;;  %v197_v39 = vadd.f32 %v245_v33, %v196_v37  ;;  %v282_v40 = vpop.f32.mrb[3].mxu1 }
  0xe2   :  { %219 = vst.msk [vmem:[%s412_s8] sm:$0xf] %vm208_vm3, %v255_v38  ;;  %v256_v41 = vpack.c.bf16 %v197_v39, %v197_v39  ;;  %221 = vrot.lane.b32.xlu0 %v255_v38, %s299_s24 }
  0xe4   :  { %220 = vst.msk [vmem:[%s412_s8 + $0x4] sm:$0xf] %vm208_vm3, %v256_v41  ;;  %223 = vrot.lane.b32.xlu1 %v256_v41, %s299_s24 }
 0x154   :  { %v222_v42 = vpop.permute.xlu0 %221 }
 0x155   :  { %227 = vst.msk [vmem:[%s413_s9] sm:$0xf] %vm208_vm3, %v222_v42 }
 0x156   :  { %v224_v43 = vpop.permute.xlu1 %223 }
 0x157   :  { %228 = vst.msk [vmem:[%s413_s9 + $0x4] sm:$0xf] %vm208_vm3, %v224_v43 }
 0x179   :  { %v123_v45 = vpop.f32.mrb[0].mxu0 }
 0x17a   :  { %v124_v46 = vadd.f32 %v241_v44, %v123_v45  ;;  %v273_v47 = vpop.f32.mrb[1].mxu0 }
 0x17b   :  { %v126_v48 = vpop.f32.mrb[2].mxu0 }
 0x17c   :  { %v253_v49 = vpack.c.bf16 %v124_v46, %v124_v46  ;;  %v127_v50 = vadd.f32 %v241_v44, %v126_v48  ;;  %v274_v51 = vpop.f32.mrb[3].mxu0 }
 0x17e   :  { %209 = vst.msk [vmem:[%s415_s7] sm:$0xf] %vm208_vm3, %v253_v49  ;;  %v254_v52 = vpack.c.bf16 %v127_v50, %v127_v50 }
 0x180   :  { %210 = vst.msk [vmem:[%s415_s7 + $0x4] sm:$0xf] %vm208_vm3, %v254_v52 }

// kernel: cascade_forward.19
= control target key start
LH: loop header
LB: loop body
LE: loop exit
PB: predicated region body
PF: predicated region fallthrough
CT: control target
= control target key end

     0   :  { %10 = vsyncpa [#allocation3], 0  ;;  %s1300_s0 = inlined_call_operand.vmem [shape: bf16[2,8,32], index: 0, kind: input, shape index: {}]   ;;  %s1301_s1 = inlined_call_operand.vmem [shape: bf16[2,8,32], index: 1, kind: input, shape index: {}]   ;;  %s1302_s2 = inlined_call_operand.vmem [shape: bf16[2,8,32], index: 2, kind: input, shape index: {}]   ;;  %s1303_s3 = inlined_call_operand.vmem [shape: bf16[2,8,32], index: 3, kind: output, shape index: {0}]   ;;  %s1304_s4 = inlined_call_operand.hbm [shape: f32[2,8,8], index: 4, kind: output, shape index: {1}]  }
   0x1   :  { %12 = vsyncpa [#allocation3 + $0x1], 0  ;;  %s1113_s15 = smov 0   ;;  %s1115_s16 = smov 0  }
   0x2   :  { %s1117_s17 = smov 0   ;;  %s1119_s18 = smov 0  }
   0x3 LB: > { %s1134_s19 = sadd.s32 4294967295, %s1077_s18   ;;  %s855_s20 = sadd.s32 4294967294, %s1077_s18   ;;  %s1077_s18 = sphi %s1119_s18, %s1310_s18   ;;  %s1073_s17 = sphi %s1117_s17, %s1309_s17   ;;  %s1069_s16 = sphi %s1115_s16, %s1308_s16   ;;  %s1065_s15 = sphi %s1113_s15, %s1307_s15  }
   0x4   : > { %s1138_s21 = sadd.s32 1, %s1077_s18   ;;  %s129_s22 = sadd.s32 1, %s1073_s17 }
   0x5   : > { %s126_s23 = ssub.s32 %s1077_s18, %s1138_s21  ;;  %p139_p0 = scmp.ne.s32.totalorder %s1073_s17, %s1069_s16 }
   0x6   : > { %p127_p1 = scmp.eq.s32.totalorder %s126_s23, 0  ;;  %p140_p2 = scmp.eq.s32.totalorder %s1134_s19, 1 }
   0x7   : > { %p145_p3 = scmp.ne.s32.totalorder %s1069_s16, %s1065_s15  ;;  %p146_p4 = scmp.eq.s32.totalorder %s855_s20, 1 }
   0x8   : > { %s1149_s24 = scalar_select %p127_p1, %s1073_s17, %s129_s22  }
   0x9   : > { %p1151_p5 = por %p140_p2, %p139_p0  ;;  %p1155_p6 = por %p146_p4, %p145_p3 }
   0xa   : > { %p858_p7 = scmp.ge.s32.totalorder %s1077_s18, 1  ;;  %p185_p8 = scmp.lt.s32.totalorder %s1077_s18, 3 }
   0xc   : > { %p186_p9 = pnand %p858_p7, %p185_p8 }
   0xd   : > { %p222_p10 = scmp.lt.s32.totalorder (!%p186_p9), %s1134_s19, 1  ;;  %v1079_v0 = vmov (!%p186_p9), 0.0   ;;  %vm1080_vm0 = vmmov (!%p186_p9), 0   ;;  %vm242_vm1 = vcmask (!%p186_p9), 64512   ;;  %s1081_s9 = smov (!%p186_p9), 120   ;;  %vm305_vm2 = vcmask (!%p186_p9), 1043456  }
   0xe   : > { %189 = sbr.rel (%p186_p9) target bundleno = 1485 (0x5cd), region = 32  ;;  %901 = vmatprep.subr.bf16.mxu0 (!%p186_p9), %v1079_v0  ;;  %903 = vmatprep.mubr.msk.bf16.mxu0 (!%p186_p9), %vm1080_vm0, %v1079_v0  ;;  %s1082_s10 = smov (!%p186_p9), 112   ;;  %vm350_vm3 = vcmask (!%p186_p9), 60416  }
   0xf   : > { %907 = vmatprep.subr.bf16.mxu1 (!%p186_p9), %v1079_v0  ;;  %909 = vmatprep.mubr.msk.bf16.mxu1 (!%p186_p9), %vm1080_vm0, %v1079_v0  ;;  %s1083_s11 = smov (!%p186_p9), 104   ;;  %s1084_s30 = smov (!%p186_p9), 8  }
  0x10   : > { %s879_s6 = sshll.u32 (!%p186_p9), %s1134_s19, 7  ;;  %s1086_s13 = smov (!%p186_p9), [#allocation2]  }
  0x15   : > { %s223_s27 = scalar_select %p222_p10, %s1134_s19, 1 }
  0x17   : > { %s1169_s28 = sshll.u32 %s223_s27, 2  ;;  %s219_s27 = sand.u32 1, %s1069_s16  }
  0x18   : > { %s229_s5 = scalar_lea.vmem %s1301_s1, %s1169_s28  ;;  %s225_s8 = scalar_lea.vmem %s1300_s0, %s1169_s28 }
  0x19   : > { %v240_v1 = vld [vmem:[%s229_s5] sm:$0xf]  ;;  %s233_s14 = scalar_lea.vmem %s1302_s2, %s1169_s28  ;;  %s1224_s23 = scalar_lea.vmem %s1303_s3, %s1169_s28 }
  0x1a   : > { %v247_v2 = vsel %vm242_vm1, %v240_v1, 0  ;;  %v239_v3 = vld [vmem:[%s225_s8] sm:$0xf]  ;;  %v867_v10 = vcombine.low %v240_v1, %v240_v1  ;;  %s859_s28 = sshll.u32 %s219_s27, 3  ;;  %s1085_s5 = smov 16  }
  0x1b   : > { %902 = vmatpush3.bf16.xpose.msra.mxu0 %v247_v2  ;;  %v866_v11 = vcombine.low %v239_v3, %v239_v3  ;;  %v1195_v17 = vld [vmem:[%s233_s14] sm:$0xf]  ;;  %s221_s29 = scalar_lea.vmem [#allocation2], %s859_s28  ;;  %s1019_s14 = sshll.u32 %s1086_s13, 4  ;;  %s1020_s14 = int_to_ptr.vmem [resolvable:$false] %s1019_s14 }
  0x1c   : > { %919 = vmatprep.subr.bf16.mxu0 %v1079_v0  ;;  %361 = vrot.lane.b32.xlu1 %v867_v10, %s1081_s9  ;;  %v307_v18 = vsel %vm305_vm2, %v1195_v17, 0  ;;  %v869_v2 = vcombine.low %v1195_v17, %v1195_v17  ;;  %s748_s7 = sshll.u32 %s221_s29, 4  ;;  %s1021_s20 = scalar_lea.vmem %s1020_s14, 256  ;;  %s749_s7 = int_to_ptr.vmem [resolvable:$true] %s748_s7 }
  0x1d   : > { %908 = vmatpush3.bf16.msra.mxu1 %v307_v18  ;;  %s1015_s12 = scalar_lea.vmem %s749_s7, 128  ;;  %p1022_p0 = scmp.lt.s32.totalorder %s749_s7, %s1020_s14 }
  0x1e   : > { %913 = vmatprep.subr.bf16.mxu1 %v1079_v0  ;;  %p1016_p11 = scmp.ne.s32.totalorder %s749_s7, %s1015_s12  ;;  %p1023_p1 = scmp.lt.s32.totalorder %s1021_s20, %s1015_s12 }
  0x20   : > { %356 = vrot.lane.b32.xlu1 %v866_v11, %s1081_s9  ;;  %p1017_p12 = pnand %p1016_p11, %p1151_p5  ;;  %p1024_p2 = por %p1023_p1, %p1022_p0 }
  0x22   : > { %904 = vmatmul.mubr.msk.bf16.vlgmr.msra.gmra.mrb[0].mxu0 %vm242_vm1, %v239_v3  ;;  %p1018_p13 = pneg %p1017_p12 }
  0x23   : > { %921 = vmatprep.mubr.msk.bf16.mxu0 %vm1080_vm0, %v1079_v0 }
  0x24   : > { %483 = vrot.lane.b32.xlu1 %v866_v11, %s1082_s10  ;;  %p1025_p3 = pnand %p1024_p2, %p1018_p13 }
  0x28   : > { %606 = vrot.lane.b32.xlu1 %v867_v10, %s1083_s11 }
  0x2c   : > { %604 = vrot.lane.b32.xlu1 %v866_v11, %s1083_s11 }
  0x8e   : > { %v362_v21 = vpop.permute.xlu1 %361 }
  0x8f   : > { %v367_v23 = vsel %vm242_vm1, %v362_v21, 0 }
  0x92   : > { %v357_v25 = vpop.permute.xlu1 %356 }
  0x96   : > { %v484_v27 = vpop.permute.xlu1 %483 }
  0x9a   : > { %v607_v29 = vpop.permute.xlu1 %606 }
  0x9b   : > { %v612_v30 = vsel %vm242_vm1, %v607_v29, 0 }
  0x9e   : > { %v605_v31 = vpop.permute.xlu1 %604 }
  0xf5   : > { %v283_v4 = vpop.f32.mrb[0].mxu0 }
  0xf6   : > { %v289_v5 = vmul.f32 0.35355338, %v283_v4  ;;  %v905_v6 = vpop.f32.mrb[1].mxu0 }
  0xf7   : > { %v286_v7 = vpop.f32.mrb[2].mxu0 }
  0xf8   : > { %v906_v8 = vpop.f32.mrb[3].mxu0  ;;  %v290_v9 = vsel %vm242_vm1, %v289_v5, -inf }
  0xf9   : > { %291 = vmax.xlane.f32.xlu0 %v290_v9 }
 0x186   : > { %v292_v12 = vpop.xlane.xlu0 %291 }
 0x187   : > { %v293_v13 = vsub.f32 %v289_v5, %v292_v12 }
 0x189   : > { %v294_v14 = vmul.f32 1.442695, %v293_v13 }
 0x18b   : > { %999 = vpow2.f32 %v294_v14 }
 0x195   : > { %v1000_v15 = vpop.eup %999 }
 0x196   : > { %v296_v16 = vsel %vm242_vm1, %v1000_v15, 0.0 }
 0x197   : > { %297 = vadd.xlane.f32.xlu0 %v296_v16 }
 0x1ad   : > { %485 = vrot.lane.b32.xlu0 %v867_v10, %s1082_s10 }
 0x224   : > { %v298_v19 = vpop.xlane.xlu0 %297 }
 0x225   : > { %1001 = vrcp.f32 %v298_v19 }
 0x228   : > { %v486_v26 = vpop.permute.xlu0 %485 }
 0x229   : > { %v491_v28 = vsel %vm242_vm1, %v486_v26, 0 }
 0x22f   : > { %v1002_v20 = vpop.eup %1001 }
 0x230   : > { %v1201_v22 = vmul.f32 %v1002_v20, %v1000_v15 }
 0x232   : > { %v301_v24 = vpack.c.bf16 %v1201_v22, %v1201_v22 }
 0x234   : > { %910 = vmatmul.mubr.msk.bf16.vlgmr.msra.gmra.mrb[0].mxu1 %vm242_vm1, %v301_v24 }
 0x235   : > { %914 = vmatpush3.bf16.xpose.msra.mxu1 %v367_v23  ;;  %915 = vmatprep.mubr.msk.bf16.mxu1 %vm1080_vm0, %v1079_v0 }
 0x236   : > { %925 = vmatprep.subr.bf16.mxu1 %v1079_v0 }
 0x23c   : > { %916 = vmatmul.mubr.msk.bf16.vlgmr.msra.gmra.mrb[4].mxu1 %vm242_vm1, %v357_v25 }
 0x23d   : > { %926 = vmatpush3.bf16.xpose.msra.mxu1 %v491_v28  ;;  %927 = vmatprep.mubr.msk.bf16.mxu1 %vm1080_vm0, %v1079_v0 }
 0x23e   : > { %937 = vmatprep.subr.bf16.mxu1 %v1079_v0 }
 0x244   : > { %928 = vmatmul.mubr.msk.bf16.vlgmr.msra.gmra.mrb[8].mxu1 %vm242_vm1, %v484_v27 }
 0x245   : > { %938 = vmatpush3.bf16.xpose.msra.mxu1 %v612_v30  ;;  %939 = vmatprep.mubr.msk.bf16.mxu1 %vm1080_vm0, %v1079_v0 }
 0x24c   : > { %940 = vmatmul.mubr.msk.bf16.vlgmr.msra.gmra.mrb[12].mxu1 %vm242_vm1, %v605_v31 }
 0x307   : > { %v343_v32 = vpop.f32.mrb[0].mxu1 }
 0x308   : > { %v349_v33 = vpack.c.bf16 %v343_v32, %v343_v32  ;;  %v911_v34 = vpop.f32.mrb[1].mxu1 }
 0x309   : > { %v346_v35 = vpop.f32.mrb[2].mxu1 }
 0x30a   : > { %351 = vst.msk [vmem:[%s1224_s23] sm:$0xf] %vm350_vm3, %v349_v33  ;;  %v912_v36 = vpop.f32.mrb[3].mxu1 }
 0x30f   : > { %v403_v37 = vpop.f32.mrb[4].mxu1 }
 0x310   : > { %v409_v38 = vmul.f32 0.35355338, %v403_v37  ;;  %v917_v39 = vpop.f32.mrb[5].mxu1 }
 0x311   : > { %v406_v40 = vpop.f32.mrb[6].mxu1 }
 0x312   : > { %v918_v41 = vpop.f32.mrb[7].mxu1  ;;  %v410_v42 = vsel %vm242_vm1, %v409_v38, -inf }
 0x313   : > { %411 = vmax.xlane.f32.xlu1 %v410_v42 }
 0x317   : > { %v527_v43 = vpop.f32.mrb[8].mxu1 }
 0x318   : > { %v533_v44 = vmul.f32 0.35355338, %v527_v43  ;;  %v929_v45 = vpop.f32.mrb[9].mxu1 }
 0x319   : > { %v530_v46 = vpop.f32.mrb[10].mxu1 }
 0x31a   : > { %v534_v47 = vsel %vm242_vm1, %v533_v44, -inf  ;;  %v930_v48 = vpop.f32.mrb[11].mxu1 }
 0x31b   : > { %535 = vmax.xlane.f32.xlu0 %v534_v47 }
 0x31f   : > { %v648_v49 = vpop.f32.mrb[12].mxu1 }
 0x320   : > { %v654_v50 = vmul.f32 0.35355338, %v648_v49  ;;  %v941_v51 = vpop.f32.mrb[13].mxu1 }
 0x321   : > { %v651_v52 = vpop.f32.mrb[14].mxu1 }
 0x322   : > { %v655_v53 = vsel %vm242_vm1, %v654_v50, -inf  ;;  %v942_v54 = vpop.f32.mrb[15].mxu1 }
 0x323   : > { %656 = vmax.xlane.f32.xlu1 %v655_v53 }
 0x3a0   : > { %v412_v55 = vpop.xlane.xlu1 %411 }
 0x3a1   : > { %v413_v56 = vsub.f32 %v409_v38, %v412_v55 }
 0x3a3   : > { %v414_v57 = vmul.f32 1.442695, %v413_v56 }
 0x3a5   : > { %1003 = vpow2.f32 %v414_v57 }
 0x3a8   : > { %v536_v58 = vpop.xlane.xlu0 %535 }
 0x3a9   : > { %v537_v59 = vsub.f32 %v533_v44, %v536_v58 }
 0x3ab   : > { %v538_v60 = vmul.f32 1.442695, %v537_v59 }
 0x3ad   : > { %1005 = vpow2.f32 %v538_v60 }
 0x3af   : > { %v1004_v61 = vpop.eup %1003 }
 0x3b0   : > { %v416_v62 = vsel %vm242_vm1, %v1004_v61, 0.0  ;;  %v657_v3 = vpop.xlane.xlu1 %656 }
 0x3b1   : > { %417 = vadd.xlane.f32.xlu1 %v416_v62  ;;  %v658_v4 = vsub.f32 %v654_v50, %v657_v3 }
 0x3b3   : > { %v659_v5 = vmul.f32 1.442695, %v658_v4 }
 0x3b5   : > { %1007 = vpow2.f32 %v659_v5 }
 0x3b7   : > { %v1006_v63 = vpop.eup %1005 }
 0x3b8   : > { %v540_v1 = vsel %vm242_vm1, %v1006_v63, 0.0 }
 0x3b9   : > { %541 = vadd.xlane.f32.xlu0 %v540_v1 }
 0x3bf   : > { %v1008_v6 = vpop.eup %1007 }
 0x3c0   : > { %v661_v7 = vsel %vm242_vm1, %v1008_v6, 0.0 }
 0x3c2   : > { %546 = vrot.lane.b32.xlu1 %v869_v2, %s1082_s10  ;;  %s1259_s10 = scalar_lea.hbm %s1304_s4, %s879_s6 }
 0x3cf   : > { %425 = vrot.lane.b32.xlu0 %v869_v2, %s1081_s9 }
 0x3e6   : > { %662 = vadd.xlane.f32.xlu1 %v661_v7 }
 0x3f7   : > { %667 = vrot.lane.b32.xlu1 %v869_v2, %s1083_s11  ;;  %s732_s11 = scalar_lea.sflag [#allocation3], %s219_s27 }
 0x43e   : > { %v418_v8 = vpop.xlane.xlu1 %417 }
 0x43f   : > { %1009 = vrcp.f32 %v418_v8 }
 0x442   : > { %v547_v14 = vpop.permute.xlu1 %546 }
 0x443   : > { %v552_v16 = vsel %vm305_vm2, %v547_v14, 0 }
 0x446   : > { %v542_v9 = vpop.xlane.xlu0 %541 }
 0x447   : > { %1011 = vrcp.f32 %v542_v9 }
 0x449   : > { %v1010_v10 = vpop.eup %1009 }
 0x44a   : > { %v420_v11 = vmul.f32 %v1010_v10, %v1004_v61  ;;  %v426_v12 = vpop.permute.xlu0 %425 }
 0x44b   : > { %v431_v13 = vsel %vm305_vm2, %v426_v12, 0 }
 0x44c   : > { %920 = vmatpush3.bf16.msra.mxu0 %v431_v13  ;;  %v421_v15 = vpack.c.bf16 %v420_v11, %v420_v11  ;;  %v482_v24 = vadd.f32 %v420_v11, %v1201_v22 }
 0x44d   : > { %931 = vmatprep.subr.bf16.mxu0 %v1079_v0 }
 0x44f   : > { %922 = vmatmul.mubr.msk.bf16.vlgmr.msra.gmra.mrb[4].mxu0 %vm242_vm1, %v421_v15 }
 0x450   : > { %932 = vmatpush3.bf16.msra.mxu0 %v552_v16  ;;  %933 = vmatprep.mubr.msk.bf16.mxu0 %vm1080_vm0, %v1079_v0 }
 0x451   : > { %v1012_v17 = vpop.eup %1011  ;;  %943 = vmatprep.subr.bf16.mxu0 %v1079_v0 }
 0x452   : > { %v544_v18 = vmul.f32 %v1012_v17, %v1006_v63 }
 0x454   : > { %v545_v19 = vpack.c.bf16 %v544_v18, %v544_v18  ;;  %v603_v27 = vadd.f32 %v544_v18, %v482_v24 }
 0x457   : > { %934 = vmatmul.mubr.msk.bf16.vlgmr.msra.gmra.mrb[8].mxu0 %vm242_vm1, %v545_v19 }
 0x458   : > { %945 = vmatprep.mubr.msk.bf16.mxu0 %vm1080_vm0, %v1079_v0 }
 0x473   : > { %v663_v20 = vpop.xlane.xlu1 %662 }
 0x474   : > { %1013 = vrcp.f32 %v663_v20 }
 0x477   : > { %v668_v21 = vpop.permute.xlu1 %667 }
 0x478   : > { %v673_v23 = vsel %vm305_vm2, %v668_v21, 0 }
 0x479   : > { %944 = vmatpush3.bf16.msra.mxu0 %v673_v23 }
 0x47e   : > { %v1014_v25 = vpop.eup %1013 }
 0x47f   : > { %v665_v26 = vmul.f32 %v1014_v25, %v1008_v6 }
 0x481   : > { %v666_v28 = vpack.c.bf16 %v665_v26, %v665_v26  ;;  %v724_v29 = vadd.f32 %v665_v26, %v603_v27 }
 0x483   : > { %946 = vmatmul.mubr.msk.bf16.vlgmr.msra.gmra.mrb[12].mxu0 %vm242_vm1, %v666_v28  ;;  %v725_v30 = vmul.f32 0.25, %v724_v29 }
 0x485   : > { %726 = vst.msk [vmem:[%s221_s29] sm:$0xff] %vm242_vm1, %v725_v30 }
 0x522   : > { %v467_v0 = vpop.f32.mrb[4].mxu0 }
 0x523   : > { %v882_v31 = vpack.c.bf16 %v467_v0, %v467_v0  ;;  %v923_v32 = vpop.f32.mrb[5].mxu0 }
 0x524   : > { %v470_v33 = vpop.f32.mrb[6].mxu0 }
 0x525   : > { %477 = vrot.lane.b32.xlu0 %v882_v31, %s1084_s30  ;;  %v924_v22 = vpop.f32.mrb[7].mxu0 }
 0x52a   : > { %v588_v34 = vpop.f32.mrb[8].mxu0 }
 0x52b   : > { %v883_v35 = vpack.c.bf16 %v588_v34, %v588_v34  ;;  %v935_v36 = vpop.f32.mrb[9].mxu0 }
 0x52c   : > { %v591_v37 = vpop.f32.mrb[10].mxu0 }
 0x52d   : > { %598 = vrot.lane.b32.xlu1 %v883_v35, %s1085_s5  ;;  %v936_v38 = vpop.f32.mrb[11].mxu0 }
 0x52e   : > { %1028 = shalt.err (!%p1025_p3)
}
 0x52f   : > { %s1029_s19 = scalar_lea.hbm %s1259_s10, 128  ;;  %s1033_s28 = scalar_lea.hbm %s1304_s4, 256 }
 0x530   : > { %p1030_p4 = scmp.ne.s32.totalorder %s1259_s10, %s1029_s19  ;;  %p1034_p9 = scmp.lt.u32.totalorder %s1259_s10, %s1304_s4 }
 0x531   : > { %p1035_p10 = scmp.lt.u32.totalorder %s1033_s28, %s1029_s19  ;;  %p1037_p12 = scmp.lt.u32.totalorder %s1029_s19, %s1259_s10 }
 0x532   : > { %p1031_p7 = pnand %p1030_p4, %p1151_p5 }
 0x533   : > { %p1036_p11 = por %p1035_p10, %p1034_p9 }
 0x534   : > { %p1032_p8 = pneg %p1031_p7 }
 0x535   : > { %p1038_p13 = por %p1037_p12, %p1036_p11 }
 0x537   : > { %p1039_p0 = pnand %p1038_p13, %p1032_p8 }
 0x539   : > { %1042 = shalt.err (!%p1039_p0)
}
 0x53a   : > { %949 = dma.vmem_to_hbm [thread:$0]  (%p1151_p5), %s749_s7, 128, %s1259_s10, %s732_s11   ;;  %vm480_vm4 = vcmask 126016   ;;  %vm601_vm5 = vcmask 191616   ;;  %vm722_vm6 = vcmask 257216  }
 0x53b   : > { %s1087_s5 = smov 24  }
 0x556   : > { %v709_v39 = vpop.f32.mrb[12].mxu0 }
 0x557   : > { %v884_v40 = vpack.c.bf16 %v709_v39, %v709_v39  ;;  %v947_v41 = vpop.f32.mrb[13].mxu0 }
 0x558   : > { %v712_v42 = vpop.f32.mrb[14].mxu0 }
 0x559   : > { %719 = vrot.lane.b32.xlu0 %v884_v40, %s1087_s5  ;;  %v948_v43 = vpop.f32.mrb[15].mxu0 }
 0x597   : > { %v478_v44 = vpop.permute.xlu0 %477 }
 0x598   : > { %481 = vst.msk [vmem:[%s1224_s23] sm:$0xf] %vm480_vm4, %v478_v44 }
 0x59f   : > { %v599_v45 = vpop.permute.xlu1 %598 }
 0x5a0   : > { %602 = vst.msk [vmem:[%s1224_s23] sm:$0xf] %vm601_vm5, %v599_v45 }
 0x5cb   : > { %v720_v46 = vpop.permute.xlu0 %719 }
 0x5cc   : > { %723 = vst.msk [vmem:[%s1224_s23] sm:$0xf] %vm722_vm6, %v720_v46 }
 0x5cd PF: > { %p955_p5 = scmp.ge.s32.totalorder %s1077_s18, 2  ;;  %s767_s25 = sand.u32 1, %s1065_s15  }
 0x5ce   : > { %s768_s6 = scalar_lea.sflag [#allocation3], %s767_s25 }
 0x5cf   : > { %p952_p1 = pnand %p955_p5, %p1155_p6 }
 0x5d1   : > { %1060 = dma.done.wait (!%p952_p1), %s768_s6, 128  }
 0x5d2   : > { %1062 = vsyncadd (!%p952_p1), %s768_s6, 4294967168  ;;  %p15_p2 = scmp.ge.s32.totalorder %s1138_s21, 4   ;;  %s1307_s15 = smov %s1069_s16 }
 0x5d3   : > { %s1308_s16 = smov %s1073_s17  ;;  %s1309_s17 = smov %s1149_s24 }
 0x5d4   : > { %s1310_s18 = smov %s1138_s21  ;;  %17 = sbr.rel (!%p15_p2) target bundleno = 3 (0x3), region = 85 }
 0x5db   :  { %773 = vsyncpa [#allocation3], 1 }
 0x5dc   :  { %775 = vsyncpa [#allocation3 + $0x1], 1 }

// kernel: cascade_forward.21
= control target key start
LH: loop header
LB: loop body
LE: loop exit
PB: predicated region body
PF: predicated region fallthrough
CT: control target
= control target key end

     0   :  { %v152_v1 = vmov 0.0   ;;  %vm153_vm0 = vmmov 0   ;;  %s204_s0 = inlined_call_operand.vmem [shape: f32[16,32], index: 0, kind: input, shape index: {}]   ;;  %s205_s1 = inlined_call_operand.vmem [shape: bf16[32,16], index: 1, kind: input, shape index: {}]   ;;  %s206_s2 = inlined_call_operand.vmem [shape: f32[1,16], index: 2, kind: input, shape index: {}]   ;;  %s207_s3 = inlined_call_operand.hbm [shape: f32[16,16], index: 3, kind: output, shape index: {}]  }
   0x1   :  { %v126_v0 = vld [vmem:[%s205_s1] sm:$0xff]   ;;  %113 = vmatprep.subr.bf16.mxu0 %v152_v1  ;;  %v127_v2 = vld [vmem:[%s205_s1 + $0x8] sm:$0xff]   ;;  %117 = vmatprep.mubr.msk.bf16.mxu0 %vm153_vm0, %v152_v1 }
   0x2   :  { %114 = vmatpush3.bf16.msra.mxu0 %v126_v0  ;;  %v16_v3 = vld [vmem:[%s204_s0] sm:$0xff]  ;;  %v17_v4 = vld [vmem:[%s204_s0 + $0x8] sm:$0xff] }
   0x3   :  { %115 = vmatprep.subr.bf16.mxu0 %v152_v1 }
   0x4   :  { %8 = vsyncpa [#allocation3], 0  ;;  %v18_v5 = vpack.c.bf16 %v17_v4, %v16_v3  ;;  %vm42_vm1 = vcmask 261120   ;;  %v106_v6 = vld [vmem:[%s206_s2] ss:$0 sm:$0xff]  ;;  %s154_s1 = smov [#allocation2]  }
   0x5   :  { %s95_s22 = sshll.u32 %s154_s1, 4  ;;  %vm87_vm2 = vcmask 130048   ;;  %s96_s22 = int_to_ptr.vmem [resolvable:$true] %s95_s22 }
   0x6   :  { %116 = vmatpush3.bf16.msra.mxu0 %v127_v2  ;;  %s128_s0 = scalar_lea.vmem %s96_s22, 256  ;;  %p133_p1 = scmp.lt.s32.totalorder %s96_s22, %s96_s22 }
   0x7   :  { %p129_p0 = scmp.ne.s32.totalorder %s96_s22, %s128_s0  ;;  %p134_p2 = scmp.lt.s32.totalorder %s128_s0, %s128_s0 }
   0x9   :  { %118 = vmatmul.mubr.msk.bf16.vlgmr.msra.gmra.mrb[0].mxu0 %vm42_vm1, %v18_v5  ;;  %p135_p3 = por %p134_p2, %p133_p1 }
   0xb   :  { %p136_p4 = pnand %p135_p3, %p129_p0 }
  0xdc   :  { %v80_v7 = vpop.f32.mrb[0].mxu0 }
  0xdd   :  { %v81_v8 = vadd.f32 %v106_v6, %v80_v7  ;;  %v119_v9 = vpop.f32.mrb[1].mxu0 }
  0xde   :  { %v83_v10 = vpop.f32.mrb[2].mxu0 }
  0xdf   :  { %88 = vst.msk [vmem:[#allocation2] sm:$0xff] %vm87_vm2, %v81_v8  ;;  %v84_v11 = vadd.f32 %v106_v6, %v83_v10  ;;  %v120_v12 = vpop.f32.mrb[3].mxu0 }
  0xe1   :  { %89 = vst.msk [vmem:[#allocation2 + $0x8] sm:$0xff] %vm87_vm2, %v84_v11 }
  0xe2   :  { %139 = shalt.err (!%p136_p4)
}
  0xe3   :  { %s140_s24 = scalar_lea.hbm %s207_s3, 256 }
  0xe4   :  { %p141_p5 = scmp.ne.s32.totalorder %s207_s3, %s140_s24  ;;  %p144_p6 = scmp.lt.u32.totalorder %s140_s24, %s207_s3 }
  0xe6   :  { %p146_p7 = pnand %p144_p6, %p141_p5 }
  0xe8   :  { %149 = shalt.err (!%p146_p7)
}
  0xe9   :  { %s155_s29 = smov 128   ;;  %s156_s30 = smov 8  }
  0xea   :  { %101 = dma.vmem_to_hbm [thread:$0]  %s96_s22, 256, %s207_s3, [#allocation3], %s155_s29, %s155_s29, %s156_s30  }
  0xeb   :  { %150 = dma.done.wait [#allocation3], 256  }
  0xec   :  { %151 = vsyncadd [#allocation3], 4294967040 }
  0xed   :  { %105 = vsyncpa [#allocation3], 1 }

</bundles_post_ra>
